<compile_context>
chip_gen: v7x
topology: tpu7x:2x2x1
jax: 0.10.0
libtpu: 0.0.40
codegen_flags: <defaults>
</compile_context>

<pallas_src>
import functools
import math

import jax
import jax.numpy as jnp
from jax.experimental import pallas as pl
from jax.experimental.pallas import tpu as pltpu

NEG_SLOPE = 0.2
CIN_PAD = 8      # input channels 6 padded to 8 (sublane-aligned weight tile)
COUT_PAD = 128   # transform head output 9 padded to one lane group


def _lrelu(v):
    return jnp.where(v > 0, v, NEG_SLOPE * v)


def _mm(a, w_bf16):
    """bf16 operands, f32 accumulation on the MXU."""
    return jnp.dot(a.astype(jnp.bfloat16), w_bf16,
                   preferred_element_type=jnp.float32)


# ----------------------------------------------------------------------------
# Fused kernel: whole Transform_Net forward for Bt batch elements per step.
# Row layout of the x block: row = j*(Bt*N) + b*N + p  (neighbour-major).
# ----------------------------------------------------------------------------
def _transform_net_kernel(x_ref, w1_ref, t1_ref, w2_ref, t2_ref,
                          w3_ref, t3_ref, w4_ref, t4_ref,
                          w5_ref, t5_ref, wt_ref, tb_ref, o_ref, *,
                          n_points, k_neighbors, bt):
    n, k = n_points, k_neighbors
    x = x_ref[0]                                            # (K*Bt*N, 8) bf16

    # conv1: 1x1 Conv2d(6->64) + folded BN + LeakyReLU
    h = _lrelu(_mm(x, w1_ref[...]) + t1_ref[...])           # (K*Bt*N, 64) f32
    # conv2: 1x1 Conv2d(64->128) + folded BN + LeakyReLU
    h = _lrelu(_mm(h, w2_ref[...]) + t2_ref[...])           # (K*Bt*N, 128)

    # max over the k neighbours (leading axis after the split)
    h = jnp.max(h.reshape(k, bt * n, 128), axis=0)          # (Bt*N, 128)

    # conv3: 1x1 Conv1d(128->1024) + folded BN + LeakyReLU
    h = _lrelu(_mm(h, w3_ref[...]) + t3_ref[...])           # (Bt*N, 1024)

    # global max over points -> per-element feature
    g = jnp.max(h.reshape(bt, n, 1024), axis=1)             # (Bt, 1024)

    # linear1(1024->512, no bias) + folded BN + LeakyReLU
    g = _lrelu(_mm(g, w4_ref[...]) + t4_ref[...])           # (Bt, 512)
    # linear2(512->256, no bias) + folded BN + LeakyReLU
    g = _lrelu(_mm(g, w5_ref[...]) + t5_ref[...])           # (Bt, 256)

    # transform head: Linear(256->9) (padded to 128 lanes); compact store
    o_ref[0] = _mm(g, wt_ref[...]) + tb_ref[...]            # (Bt, 128)


# ----------------------------------------------------------------------------
# Parameters (deterministic init; transform head matches the PyTorch __init__)
# ----------------------------------------------------------------------------
def init_params(key):
    ks = jax.random.split(key, 10)

    def he(k, shape):
        return jax.random.normal(k, shape, jnp.float32) * math.sqrt(2.0 / shape[0])

    def bn(k, c):
        k1, k2, k3, k4 = jax.random.split(k, 4)
        return {"gamma": jax.random.uniform(k1, (c,), jnp.float32, 0.5, 1.5),
                "beta": 0.1 * jax.random.normal(k2, (c,), jnp.float32),
                "mean": 0.1 * jax.random.normal(k3, (c,), jnp.float32),
                "var": jax.random.uniform(k4, (c,), jnp.float32, 0.5, 1.5)}

    return {
        "conv1_w": he(ks[0], (6, 64)),      "bn1": bn(ks[1], 64),
        "conv2_w": he(ks[2], (64, 128)),    "bn2": bn(ks[3], 128),
        "conv3_w": he(ks[4], (128, 1024)),  "bn3_1024": bn(ks[5], 1024),
        "lin1_w": he(ks[6], (1024, 512)),   "bn3_512": bn(ks[7], 512),
        "lin2_w": he(ks[8], (512, 256)),    "bn4": bn(ks[9], 256),
        # transform head exactly as in the module: weight = 0, bias = eye(3)
        "t_w": jnp.zeros((256, 9), jnp.float32),
        "t_b": jnp.eye(3, dtype=jnp.float32).reshape(9),
    }


def _fold_bn(w, bn, eps=1e-5):
    s = bn["gamma"] * jax.lax.rsqrt(bn["var"] + eps)
    return w * s[None, :], (bn["beta"] - bn["mean"] * s)[None, :]


def prepare_operands(params):
    """Fold inference BN into the bias-free matmuls; pad once; bf16 weights."""
    w1, t1 = _fold_bn(params["conv1_w"], params["bn1"])
    w2, t2 = _fold_bn(params["conv2_w"], params["bn2"])
    w3, t3 = _fold_bn(params["conv3_w"], params["bn3_1024"])
    w4, t4 = _fold_bn(params["lin1_w"], params["bn3_512"])   # re-bound bn3(512)
    w5, t5 = _fold_bn(params["lin2_w"], params["bn4"])
    w1p = jnp.zeros((CIN_PAD, 64), jnp.float32).at[:6].set(w1)
    wtp = jnp.zeros((256, COUT_PAD), jnp.float32).at[:, :9].set(params["t_w"])
    tbp = jnp.zeros((1, COUT_PAD), jnp.float32).at[0, :9].set(params["t_b"])
    bf = lambda a: a.astype(jnp.bfloat16)
    # weights bf16 (halved VMEM/DMA); BN shifts stay f32 for the epilogue adds
    return (bf(w1p), t1, bf(w2), t2, bf(w3), t3, bf(w4), t4, bf(w5), t5,
            bf(wtp), tbp)


# ----------------------------------------------------------------------------
# Forward (single fused pallas_call; whole wrapper is jitted)
# ----------------------------------------------------------------------------
@functools.partial(jax.jit, static_argnames=("bt",))
def transform_net_forward(ops, x, *, bt=2):
    """x: (B, 6, N, K) -- same layout as the PyTorch module's input."""
    b, c, n, k = x.shape
    if b % bt != 0:          # trace-time fallback so any batch size works
        bt = 1
    nb = b // bt
    assert (bt * n) % 8 == 0, "Bt*N must be sublane-aligned"

    # rows per block: neighbour-major (j, b, p); 1x1 convs become row matmuls.
    xt = jnp.transpose(x, (0, 3, 2, 1))                        # (B, K, N, 6)
    xt = jnp.pad(xt, ((0, 0), (0, 0), (0, 0), (0, CIN_PAD - c)))
    xt = xt.astype(jnp.bfloat16)                               # stream in bf16
    xt = xt.reshape(nb, bt, k, n, CIN_PAD)
    xt = jnp.transpose(xt, (0, 2, 1, 3, 4))                    # (nb,K,Bt,N,C)
    x_rows = xt.reshape(nb, k * bt * n, CIN_PAD)

    (w1, t1, w2, t2, w3, t3, w4, t4, w5, t5, wt, tb) = ops
    kernel = functools.partial(_transform_net_kernel,
                               n_points=n, k_neighbors=k, bt=bt)

    def wspec(shape):
        return pl.BlockSpec(shape, lambda i: (0, 0))

    out = pl.pallas_call(
        kernel,
        out_shape=jax.ShapeDtypeStruct((nb, bt, COUT_PAD), jnp.float32),
        grid=(nb,),
        in_specs=[
            pl.BlockSpec((1, k * bt * n, CIN_PAD), lambda i: (i, 0, 0)),
            wspec((CIN_PAD, 64)),  wspec((1, 64)),
            wspec((64, 128)),      wspec((1, 128)),
            wspec((128, 1024)),    wspec((1, 1024)),
            wspec((1024, 512)),    wspec((1, 512)),
            wspec((512, 256)),     wspec((1, 256)),
            wspec((256, COUT_PAD)), wspec((1, COUT_PAD)),
        ],
        out_specs=pl.BlockSpec((1, bt, COUT_PAD), lambda i: (i, 0, 0)),
        compiler_params=pltpu.CompilerParams(
            dimension_semantics=("parallel",)),   # nb >= 2 keeps both v7x TCs busy
    )(x_rows, w1, t1, w2, t2, w3, t3, w4, t4, w5, t5, wt, tb)

    return out.reshape(b, COUT_PAD)[:, :9].reshape(b, 3, 3)


# ----------------------------------------------------------------------------
# Pure-JAX reference (unfused, f32) for the correctness check
# ----------------------------------------------------------------------------
def reference_forward(params, x):
    b = x.shape[0]

    def bn_apply(v, bn, eps=1e-5):
        s = bn["gamma"] * jax.lax.rsqrt(bn["var"] + eps)
        return v * s + (bn["beta"] - bn["mean"] * s)

    def lrelu(v):
        return jnp.where(v > 0, v, NEG_SLOPE * v)

    h = jnp.einsum("bcnk,cd->bnkd", x, params["conv1_w"])
    h = lrelu(bn_apply(h, params["bn1"]))
    h = jnp.einsum("bnkc,cd->bnkd", h, params["conv2_w"])
    h = lrelu(bn_apply(h, params["bn2"]))
    h = jnp.max(h, axis=2)                       # max over k neighbours
    h = jnp.einsum("bnc,cd->bnd", h, params["conv3_w"])
    h = lrelu(bn_apply(h, params["bn3_1024"]))
    g = jnp.max(h, axis=1)                       # global max over points
    g = lrelu(bn_apply(g @ params["lin1_w"], params["bn3_512"]))
    g = lrelu(bn_apply(g @ params["lin2_w"], params["bn4"]))
    out = g @ params["t_w"] + params["t_b"][None, :]
    return out.reshape(b, 3, 3)


if __name__ == "__main__":
    key = jax.random.PRNGKey(0)
    k_x, k_p, k_t = jax.random.split(key, 3)

    B, N, K = 4, 64, 8                           # batch, points, k-neighbours
    x = jax.random.normal(k_x, (B, 6, N, K), jnp.float32)

    params = init_params(k_p)

    # (a) module-faithful init: zero head weight + identity bias => identity.
    out_id = transform_net_forward(prepare_operands(params), x, bt=2)
    out_id = jax.block_until_ready(out_id)
    assert out_id.shape == (B, 3, 3), out_id.shape
    assert bool(jnp.all(jnp.isfinite(out_id)))
    assert bool(jnp.allclose(out_id, jnp.eye(3)[None], atol=1e-3))

    # (b) non-vacuous check: random head weight so conv1..linear2 all influence
    #     the output; compare against the f32 reference (tolerance covers the
    #     kernel's bf16 operand streaming).
    params_rt = dict(params)
    params_rt["t_w"] = 0.1 * jax.random.normal(k_t, (256, 9), jnp.float32)
    out = transform_net_forward(prepare_operands(params_rt), x, bt=2)
    out = jax.block_until_ready(out)
    ref = reference_forward(params_rt, x)
    rel_err = jnp.max(jnp.abs(out - ref)) / (jnp.max(jnp.abs(ref)) + 1e-6)
    assert bool(rel_err < 6e-2), float(rel_err)

    print("KERNEL_OK")
</pallas_src>

<mosaic_0001>
module attributes {stable_mosaic.version = 11 : i64} {
  func.func @_transform_net_kernel(%arg0: i32, %arg1: memref<1x1024x8xbf16, #tpu.memory_space<vmem>>, %arg2: memref<8x64xbf16, #tpu.memory_space<vmem>>, %arg3: memref<1x64xf32, #tpu.memory_space<vmem>>, %arg4: memref<64x128xbf16, #tpu.memory_space<vmem>>, %arg5: memref<1x128xf32, #tpu.memory_space<vmem>>, %arg6: memref<128x1024xbf16, #tpu.memory_space<vmem>>, %arg7: memref<1x1024xf32, #tpu.memory_space<vmem>>, %arg8: memref<1024x512xbf16, #tpu.memory_space<vmem>>, %arg9: memref<1x512xf32, #tpu.memory_space<vmem>>, %arg10: memref<512x256xbf16, #tpu.memory_space<vmem>>, %arg11: memref<1x256xf32, #tpu.memory_space<vmem>>, %arg12: memref<256x128xbf16, #tpu.memory_space<vmem>>, %arg13: memref<1x128xf32, #tpu.memory_space<vmem>>, %arg14: memref<1x2x128xf32, #tpu.memory_space<vmem>>) attributes {dimension_semantics = [#tpu.dimension_semantics<parallel>], iteration_bounds = array<i64: 2>, scalar_prefetch = 0 : i64, scratch_operands = 0 : i64, tpu.core_type = #tpu.core_type<tc>, window_params = [{transform_indices = @transform_0, window_bounds = array<i64: 1, 1024, 8>}, {pipeline_mode = #tpu.pipeline_mode<synchronous>, transform_indices = @transform_1, window_bounds = array<i64: 8, 64>}, {pipeline_mode = #tpu.pipeline_mode<synchronous>, transform_indices = @transform_2, window_bounds = array<i64: 1, 64>}, {pipeline_mode = #tpu.pipeline_mode<synchronous>, transform_indices = @transform_3, window_bounds = array<i64: 64, 128>}, {pipeline_mode = #tpu.pipeline_mode<synchronous>, transform_indices = @transform_4, window_bounds = array<i64: 1, 128>}, {pipeline_mode = #tpu.pipeline_mode<synchronous>, transform_indices = @transform_5, window_bounds = array<i64: 128, 1024>}, {pipeline_mode = #tpu.pipeline_mode<synchronous>, transform_indices = @transform_6, window_bounds = array<i64: 1, 1024>}, {pipeline_mode = #tpu.pipeline_mode<synchronous>, transform_indices = @transform_7, window_bounds = array<i64: 1024, 512>}, {pipeline_mode = #tpu.pipeline_mode<synchronous>, transform_indices = @transform_8, window_bounds = array<i64: 1, 512>}, {pipeline_mode = #tpu.pipeline_mode<synchronous>, transform_indices = @transform_9, window_bounds = array<i64: 512, 256>}, {pipeline_mode = #tpu.pipeline_mode<synchronous>, transform_indices = @transform_10, window_bounds = array<i64: 1, 256>}, {pipeline_mode = #tpu.pipeline_mode<synchronous>, transform_indices = @transform_11, window_bounds = array<i64: 256, 128>}, {pipeline_mode = #tpu.pipeline_mode<synchronous>, transform_indices = @transform_12, window_bounds = array<i64: 1, 128>}, {transform_indices = @transform_13, window_bounds = array<i64: 1, 2, 128>}]} {
    %c0 = arith.constant 0 : index
    %c0_0 = arith.constant 0 : index
    %c0_1 = arith.constant 0 : index
    %0 = vector.load %arg1[%c0, %c0_0, %c0_1] : memref<1x1024x8xbf16, #tpu.memory_space<vmem>>, vector<1x1024x8xbf16>
    %1 = vector.shape_cast %0 : vector<1x1024x8xbf16> to vector<1024x8xbf16>
    %c0_2 = arith.constant 0 : index
    %c0_3 = arith.constant 0 : index
    %2 = vector.load %arg2[%c0_2, %c0_3] : memref<8x64xbf16, #tpu.memory_space<vmem>>, vector<8x64xbf16>
    %cst = arith.constant dense<0.000000e+00> : vector<1024x64xf32>
    %3 = tpu.matmul %1, %2, %cst {dimension_numbers = #tpu.dot_dimension_numbers<[1], [0], [0], [1], [0, 0, 1, 1], [], []>} : vector<1024x8xbf16>, vector<8x64xbf16>, vector<1024x64xf32> -> vector<1024x64xf32>
    %c0_4 = arith.constant 0 : index
    %c0_5 = arith.constant 0 : index
    %4 = vector.load %arg3[%c0_4, %c0_5] : memref<1x64xf32, #tpu.memory_space<vmem>>, vector<1x64xf32>
    %5 = vector.broadcast %4 : vector<1x64xf32> to vector<1024x64xf32>
    %6 = arith.addf %3, %5 : vector<1024x64xf32>
    %cst_6 = arith.constant 0.000000e+00 : f32
    %7 = vector.broadcast %cst_6 : f32 to vector<1024x64xf32>
    %8 = arith.cmpf ogt, %6, %7 : vector<1024x64xf32>
    %cst_7 = arith.constant 2.000000e-01 : f32
    %9 = vector.broadcast %cst_7 : f32 to vector<1024x64xf32>
    %10 = arith.mulf %9, %6 : vector<1024x64xf32>
    %11 = arith.select %8, %6, %10 : vector<1024x64xi1>, vector<1024x64xf32>
    %c0_8 = arith.constant 0 : index
    %c0_9 = arith.constant 0 : index
    %12 = vector.load %arg4[%c0_8, %c0_9] : memref<64x128xbf16, #tpu.memory_space<vmem>>, vector<64x128xbf16>
    %13 = arith.truncf %11 : vector<1024x64xf32> to vector<1024x64xbf16>
    %cst_10 = arith.constant dense<0.000000e+00> : vector<1024x128xf32>
    %14 = tpu.matmul %13, %12, %cst_10 {dimension_numbers = #tpu.dot_dimension_numbers<[1], [0], [0], [1], [0, 0, 1, 1], [], []>} : vector<1024x64xbf16>, vector<64x128xbf16>, vector<1024x128xf32> -> vector<1024x128xf32>
    %c0_11 = arith.constant 0 : index
    %c0_12 = arith.constant 0 : index
    %15 = vector.load %arg5[%c0_11, %c0_12] : memref<1x128xf32, #tpu.memory_space<vmem>>, vector<1x128xf32>
    %16 = vector.broadcast %15 : vector<1x128xf32> to vector<1024x128xf32>
    %17 = arith.addf %14, %16 : vector<1024x128xf32>
    %cst_13 = arith.constant 0.000000e+00 : f32
    %18 = vector.broadcast %cst_13 : f32 to vector<1024x128xf32>
    %19 = arith.cmpf ogt, %17, %18 : vector<1024x128xf32>
    %cst_14 = arith.constant 2.000000e-01 : f32
    %20 = vector.broadcast %cst_14 : f32 to vector<1024x128xf32>
    %21 = arith.mulf %20, %17 : vector<1024x128xf32>
    %22 = arith.select %19, %17, %21 : vector<1024x128xi1>, vector<1024x128xf32>
    %23 = vector.shape_cast %22 : vector<1024x128xf32> to vector<8x128x128xf32>
    %cst_15 = arith.constant dense<0xFF800000> : vector<128x128xf32>
    %24 = vector.multi_reduction <maximumf>, %23, %cst_15 [0] : vector<8x128x128xf32> to vector<128x128xf32>
    %c0_16 = arith.constant 0 : index
    %c0_17 = arith.constant 0 : index
    %25 = vector.load %arg6[%c0_16, %c0_17] : memref<128x1024xbf16, #tpu.memory_space<vmem>>, vector<128x1024xbf16>
    %26 = arith.truncf %24 : vector<128x128xf32> to vector<128x128xbf16>
    %cst_18 = arith.constant dense<0.000000e+00> : vector<128x1024xf32>
    %27 = tpu.matmul %26, %25, %cst_18 {dimension_numbers = #tpu.dot_dimension_numbers<[1], [0], [0], [1], [0, 0, 1, 1], [], []>} : vector<128x128xbf16>, vector<128x1024xbf16>, vector<128x1024xf32> -> vector<128x1024xf32>
    %c0_19 = arith.constant 0 : index
    %c0_20 = arith.constant 0 : index
    %28 = vector.load %arg7[%c0_19, %c0_20] : memref<1x1024xf32, #tpu.memory_space<vmem>>, vector<1x1024xf32>
    %29 = vector.broadcast %28 : vector<1x1024xf32> to vector<128x1024xf32>
    %30 = arith.addf %27, %29 : vector<128x1024xf32>
    %cst_21 = arith.constant 0.000000e+00 : f32
    %31 = vector.broadcast %cst_21 : f32 to vector<128x1024xf32>
    %32 = arith.cmpf ogt, %30, %31 : vector<128x1024xf32>
    %cst_22 = arith.constant 2.000000e-01 : f32
    %33 = vector.broadcast %cst_22 : f32 to vector<128x1024xf32>
    %34 = arith.mulf %33, %30 : vector<128x1024xf32>
    %35 = arith.select %32, %30, %34 : vector<128x1024xi1>, vector<128x1024xf32>
    %36 = vector.shape_cast %35 : vector<128x1024xf32> to vector<2x64x1024xf32>
    %cst_23 = arith.constant dense<0xFF800000> : vector<2x1024xf32>
    %37 = vector.multi_reduction <maximumf>, %36, %cst_23 [1] : vector<2x64x1024xf32> to vector<2x1024xf32>
    %c0_24 = arith.constant 0 : index
    %c0_25 = arith.constant 0 : index
    %38 = vector.load %arg8[%c0_24, %c0_25] : memref<1024x512xbf16, #tpu.memory_space<vmem>>, vector<1024x512xbf16>
    %39 = arith.truncf %37 : vector<2x1024xf32> to vector<2x1024xbf16>
    %cst_26 = arith.constant dense<0.000000e+00> : vector<2x512xf32>
    %40 = tpu.matmul %39, %38, %cst_26 {dimension_numbers = #tpu.dot_dimension_numbers<[1], [0], [0], [1], [0, 0, 1, 1], [], []>} : vector<2x1024xbf16>, vector<1024x512xbf16>, vector<2x512xf32> -> vector<2x512xf32>
    %c0_27 = arith.constant 0 : index
    %c0_28 = arith.constant 0 : index
    %41 = vector.load %arg9[%c0_27, %c0_28] : memref<1x512xf32, #tpu.memory_space<vmem>>, vector<1x512xf32>
    %42 = vector.broadcast %41 : vector<1x512xf32> to vector<2x512xf32>
    %43 = arith.addf %40, %42 : vector<2x512xf32>
    %cst_29 = arith.constant 0.000000e+00 : f32
    %44 = vector.broadcast %cst_29 : f32 to vector<2x512xf32>
    %45 = arith.cmpf ogt, %43, %44 : vector<2x512xf32>
    %cst_30 = arith.constant 2.000000e-01 : f32
    %46 = vector.broadcast %cst_30 : f32 to vector<2x512xf32>
    %47 = arith.mulf %46, %43 : vector<2x512xf32>
    %48 = arith.select %45, %43, %47 : vector<2x512xi1>, vector<2x512xf32>
    %c0_31 = arith.constant 0 : index
    %c0_32 = arith.constant 0 : index
    %49 = vector.load %arg10[%c0_31, %c0_32] : memref<512x256xbf16, #tpu.memory_space<vmem>>, vector<512x256xbf16>
    %50 = arith.truncf %48 : vector<2x512xf32> to vector<2x512xbf16>
    %cst_33 = arith.constant dense<0.000000e+00> : vector<2x256xf32>
    %51 = tpu.matmul %50, %49, %cst_33 {dimension_numbers = #tpu.dot_dimension_numbers<[1], [0], [0], [1], [0, 0, 1, 1], [], []>} : vector<2x512xbf16>, vector<512x256xbf16>, vector<2x256xf32> -> vector<2x256xf32>
    %c0_34 = arith.constant 0 : index
    %c0_35 = arith.constant 0 : index
    %52 = vector.load %arg11[%c0_34, %c0_35] : memref<1x256xf32, #tpu.memory_space<vmem>>, vector<1x256xf32>
    %53 = vector.broadcast %52 : vector<1x256xf32> to vector<2x256xf32>
    %54 = arith.addf %51, %53 : vector<2x256xf32>
    %cst_36 = arith.constant 0.000000e+00 : f32
    %55 = vector.broadcast %cst_36 : f32 to vector<2x256xf32>
    %56 = arith.cmpf ogt, %54, %55 : vector<2x256xf32>
    %cst_37 = arith.constant 2.000000e-01 : f32
    %57 = vector.broadcast %cst_37 : f32 to vector<2x256xf32>
    %58 = arith.mulf %57, %54 : vector<2x256xf32>
    %59 = arith.select %56, %54, %58 : vector<2x256xi1>, vector<2x256xf32>
    %c0_38 = arith.constant 0 : index
    %c0_39 = arith.constant 0 : index
    %60 = vector.load %arg12[%c0_38, %c0_39] : memref<256x128xbf16, #tpu.memory_space<vmem>>, vector<256x128xbf16>
    %61 = arith.truncf %59 : vector<2x256xf32> to vector<2x256xbf16>
    %cst_40 = arith.constant dense<0.000000e+00> : vector<2x128xf32>
    %62 = tpu.matmul %61, %60, %cst_40 {dimension_numbers = #tpu.dot_dimension_numbers<[1], [0], [0], [1], [0, 0, 1, 1], [], []>} : vector<2x256xbf16>, vector<256x128xbf16>, vector<2x128xf32> -> vector<2x128xf32>
    %c0_41 = arith.constant 0 : index
    %c0_42 = arith.constant 0 : index
    %63 = vector.load %arg13[%c0_41, %c0_42] : memref<1x128xf32, #tpu.memory_space<vmem>>, vector<1x128xf32>
    %64 = vector.broadcast %63 : vector<1x128xf32> to vector<2x128xf32>
    %65 = arith.addf %62, %64 : vector<2x128xf32>
    %c0_43 = arith.constant 0 : index
    %c0_44 = arith.constant 0 : index
    %c0_45 = arith.constant 0 : index
    %66 = vector.load %arg14[%c0_43, %c0_44, %c0_45] : memref<1x2x128xf32, #tpu.memory_space<vmem>>, vector<1x2x128xf32>
    %67 = vector.shape_cast %66 : vector<1x2x128xf32> to vector<2x128xf32>
    %68 = vector.shape_cast %65 : vector<2x128xf32> to vector<1x2x128xf32>
    tpu.vector_store %arg14[%c0_43, %c0_44, %c0_45], %68 {strides = array<i32>} : memref<1x2x128xf32, #tpu.memory_space<vmem>>, vector<1x2x128xf32>,
    return
  }
  func.func @transform_0(%arg0: i32) -> (i32, i32, i32) {
    %c0_i32 = arith.constant 0 : i32
    %c0_i32_0 = arith.constant 0 : i32
    %c0_i32_1 = arith.constant 0 : i32
    return %arg0, %c0_i32, %c0_i32_0 : i32, i32, i32
  }
  func.func @transform_1(%arg0: i32) -> (i32, i32) {
    %c0_i32 = arith.constant 0 : i32
    %c0_i32_0 = arith.constant 0 : i32
    %c0_i32_1 = arith.constant 0 : i32
    return %c0_i32, %c0_i32_0 : i32, i32
  }
  func.func @transform_2(%arg0: i32) -> (i32, i32) {
    %c0_i32 = arith.constant 0 : i32
    %c0_i32_0 = arith.constant 0 : i32
    %c0_i32_1 = arith.constant 0 : i32
    return %c0_i32, %c0_i32_0 : i32, i32
  }
  func.func @transform_3(%arg0: i32) -> (i32, i32) {
    %c0_i32 = arith.constant 0 : i32
    %c0_i32_0 = arith.constant 0 : i32
    %c0_i32_1 = arith.constant 0 : i32
    return %c0_i32, %c0_i32_0 : i32, i32
  }
  func.func @transform_4(%arg0: i32) -> (i32, i32) {
    %c0_i32 = arith.constant 0 : i32
    %c0_i32_0 = arith.constant 0 : i32
    %c0_i32_1 = arith.constant 0 : i32
    return %c0_i32, %c0_i32_0 : i32, i32
  }
  func.func @transform_5(%arg0: i32) -> (i32, i32) {
    %c0_i32 = arith.constant 0 : i32
    %c0_i32_0 = arith.constant 0 : i32
    %c0_i32_1 = arith.constant 0 : i32
    return %c0_i32, %c0_i32_0 : i32, i32
  }
  func.func @transform_6(%arg0: i32) -> (i32, i32) {
    %c0_i32 = arith.constant 0 : i32
    %c0_i32_0 = arith.constant 0 : i32
    %c0_i32_1 = arith.constant 0 : i32
    return %c0_i32, %c0_i32_0 : i32, i32
  }
  func.func @transform_7(%arg0: i32) -> (i32, i32) {
    %c0_i32 = arith.constant 0 : i32
    %c0_i32_0 = arith.constant 0 : i32
    %c0_i32_1 = arith.constant 0 : i32
    return %c0_i32, %c0_i32_0 : i32, i32
  }
  func.func @transform_8(%arg0: i32) -> (i32, i32) {
    %c0_i32 = arith.constant 0 : i32
    %c0_i32_0 = arith.constant 0 : i32
    %c0_i32_1 = arith.constant 0 : i32
    return %c0_i32, %c0_i32_0 : i32, i32
  }
  func.func @transform_9(%arg0: i32) -> (i32, i32) {
    %c0_i32 = arith.constant 0 : i32
    %c0_i32_0 = arith.constant 0 : i32
    %c0_i32_1 = arith.constant 0 : i32
    return %c0_i32, %c0_i32_0 : i32, i32
  }
  func.func @transform_10(%arg0: i32) -> (i32, i32) {
    %c0_i32 = arith.constant 0 : i32
    %c0_i32_0 = arith.constant 0 : i32
    %c0_i32_1 = arith.constant 0 : i32
    return %c0_i32, %c0_i32_0 : i32, i32
  }
  func.func @transform_11(%arg0: i32) -> (i32, i32) {
    %c0_i32 = arith.constant 0 : i32
    %c0_i32_0 = arith.constant 0 : i32
    %c0_i32_1 = arith.constant 0 : i32
    return %c0_i32, %c0_i32_0 : i32, i32
  }
  func.func @transform_12(%arg0: i32) -> (i32, i32) {
    %c0_i32 = arith.constant 0 : i32
    %c0_i32_0 = arith.constant 0 : i32
    %c0_i32_1 = arith.constant 0 : i32
    return %c0_i32, %c0_i32_0 : i32, i32
  }
  func.func @transform_13(%arg0: i32) -> (i32, i32, i32) {
    %c0_i32 = arith.constant 0 : i32
    %c0_i32_0 = arith.constant 0 : i32
    %c0_i32_1 = arith.constant 0 : i32
    return %arg0, %c0_i32, %c0_i32_0 : i32, i32, i32
  }
}

</mosaic_0001>

<bundles_post_ra>
// kernel: transform_net_forward.1
= control target key start
LH: loop header
LB: loop body
LE: loop exit
PB: predicated region body
PF: predicated region fallthrough
CT: control target
= control target key end

     0   :  { %18 = vsyncpa [#allocation3], 0  ;;  %s9327_s25 = smov 0   ;;  %s11747_s0 = inlined_call_operand.vmem [shape: bf16[2,1024,8], index: 0, kind: input, shape index: {}]   ;;  %s11748_s1 = inlined_call_operand.vmem [shape: bf16[8,64], index: 1, kind: input, shape index: {}]   ;;  %s11749_s2 = inlined_call_operand.vmem [shape: f32[1,64], index: 2, kind: input, shape index: {}]   ;;  %s11750_s3 = inlined_call_operand.vmem [shape: bf16[64,128], index: 3, kind: input, shape index: {}]   ;;  %s11751_s4 = inlined_call_operand.vmem [shape: f32[1,128], index: 4, kind: input, shape index: {}]   ;;  %s11752_s5 = inlined_call_operand.vmem [shape: bf16[128,1024], index: 5, kind: input, shape index: {}]   ;;  %s11753_s6 = inlined_call_operand.vmem [shape: f32[1,1024], index: 6, kind: input, shape index: {}]   ;;  %s11754_s7 = inlined_call_operand.hbm [shape: bf16[1024,512], index: 7, kind: input, shape index: {}]   ;;  %s11755_s8 = inlined_call_operand.vmem [shape: f32[1,512], index: 8, kind: input, shape index: {}]   ;;  %s11756_s9 = inlined_call_operand.vmem [shape: bf16[512,256], index: 9, kind: input, shape index: {}]   ;;  %s11757_s10 = inlined_call_operand.vmem [shape: f32[1,256], index: 10, kind: input, shape index: {}]   ;;  %s11758_s11 = inlined_call_operand.vmem [shape: bf16[256,128], index: 11, kind: input, shape index: {}]   ;;  %s11759_s12 = inlined_call_operand.vmem [shape: f32[1,128], index: 12, kind: input, shape index: {}]   ;;  %s11760_s13 = inlined_call_operand.vmem [shape: f32[2,2,128], index: 13, kind: output, shape index: {}]  }
   0x1 LB: > { %s9333_s26 = sadd.s32 4294967295, %s9251_s25   ;;  %p7556_p0 = scmp.ge.s32.totalorder %s9251_s25, 1  ;;  %s9251_s25 = sphi %s9327_s25, %s24_s25  }
   0x2   : > { %p333_p1 = scmp.lt.s32.totalorder %s9251_s25, 3  ;;  %s9253_s27 = smov [#allocation2]  }
   0x3   : > { %s363_s28 = sshll.u32 %s9253_s27, 4  ;;  %p11761_p3 = scmp.eq.s32.totalorder %s9333_s26, 0  ;;  %s364_s28 = int_to_ptr.vmem [resolvable:$true] %s363_s28 }
   0x4   : > { %p9337_p2 = pnand %p7556_p0, %p333_p1  ;;  %s9213_s16 = scalar_lea.hbm %s11754_s7, 32768 }
   0x5   : > { %p9214_p6 = scmp.ne.s32.totalorder %s11754_s7, %s9213_s16  ;;  %p9220_p10 = scmp.lt.u32.totalorder %s9213_s16, %s11754_s7 }
   0x6   : > { %s11773_s29 = scalar_select %p9337_p2, 1, 0 }
   0x7   : > { %p8629_p4 = pneg %p9337_p2 }
   0x9   : > { %p9346_p5 = pnand %p11761_p3, %p8629_p4 }
   0xb   : > { %p9215_p7 = pneg %p9346_p5 }
   0xd   : > { %p9216_p8 = pnand %p9215_p7, %p9214_p6 }
   0xf   : > { %p9217_p9 = pneg %p9216_p8 }
  0x11   : > { %p9222_p11 = pnand %p9220_p10, %p9217_p9 }
  0x13   : > { %9225 = shalt.err (!%p9222_p11)
}
  0x14   : > { %s9226_s21 = scalar_lea.vmem %s364_s28, 32768  ;;  %p9234_p1 = scmp.lt.s32.totalorder %s364_s28, %s364_s28 }
  0x15   : > { %p9227_p12 = scmp.ne.s32.totalorder %s364_s28, %s9226_s21  ;;  %p9235_p4 = scmp.lt.s32.totalorder %s9226_s21, %s9226_s21 }
  0x17   : > { %p9229_p13 = pnand %p9227_p12, %p9215_p7  ;;  %p9236_p3 = por %p9235_p4, %p9234_p1 }
  0x19   : > { %p9230_p0 = pneg %p9229_p13 }
  0x1b   : > { %p9237_p2 = pnand %p9236_p3, %p9230_p0 }
  0x1d   : > { %9240 = shalt.err (!%p9237_p2)
}
  0x1e   : > { %s9254_s22 = smov 256   ;;  %s9255_s23 = smov 16  }
  0x1f   : > { %8632 = dma.hbm_to_vmem [thread:$0]  (!%p9346_p5), %s11754_s7, 32768, %s364_s28, [#allocation3], %s9254_s22, %s9254_s22, %s9255_s23  }
  0x20   : > { %p11775_p6 = scmp.ne.s32.totalorder %s11773_s29, 0 }
  0x22   : > { %402 = sbr.rel (%p11775_p6) target bundleno = 1982 (0x7be), region = 72 }
  0x29   : > { %p11776_p8 = scmp.eq.s32.totalorder %s9333_s26, 0 }
  0x2b   : > { %9246 = dma.done.wait (%p11776_p8), [#allocation3], 32768   ;;  %p11777_p7 = pmov %p11776_p8 }
  0x2c   : > { %p445_p2 = scmp.lt.s32.totalorder %s9333_s26, 1  ;;  %vm1104_vm0 = vcmask 1043456   ;;  %vm911_vm1 = vcmask 64512   ;;  %v583_v0 = vld [vmem:[%s11748_s1] sm:$0xf]  ;;  %v8702_v26 = vld [vmem:[%s11750_s3 + $0x8] sm:$0xff]  }
  0x2d   : > { %9248 = vsyncadd (%p11777_p7), [#allocation3], 4294934528  ;;  %8623 = vmatprep.subr.msk.bf16.mxu0 %vm1104_vm0, %v583_v0  ;;  %v1106_v1 = vsel %vm1104_vm0, %v583_v0, 0  ;;  %8624 = vmatprep.subr.msk.bf16.mxu1 %vm1104_vm0, %v583_v0  ;;  %v8693_v17 = vld [vmem:[%s11750_s3] sm:$0xff]   ;;  %v8707_v31 = vld [vmem:[%s11750_s3 + $0x10] sm:$0xff]   ;;  %vm2140_vm6 = vcmask 523264  }
  0x2e   : > { %s11808_s26 = smov (!%p445_p2, %s9333_s26), 1  ;;  %8322 = vmatpush3.bf16.msra.mxu0 %v1106_v1  ;;  %8588 = vmatpush3.bf16.msra.mxu1 %v1106_v1  ;;  %v8714_v37 = vld [vmem:[%s11750_s3 + $0x18] sm:$0xff]  }
  0x2f   : > { %s8165_s30 = sshll.u32 %s11808_s26, 9  ;;  %8451 = vmatprep.subr.bf16.mxu1 %v8693_v17  ;;  %s7563_s14 = sshll.u32 %s11808_s26, 1 }
  0x30   : > { %s9380_s28 = scalar_lea.vmem %s11747_s0, %s8165_s30  ;;  %s453_s17 = scalar_lea.vmem %s11760_s13, %s7563_s14 }
  0x31   : > { %v8647_v2 = vld [vmem:[%s9380_s28] sm:$0xff]   ;;  %v8648_v3 = vld [vmem:[%s9380_s28 + $0x8] sm:$0xff]   ;;  %v8649_v4 = vld [vmem:[%s9380_s28 + $0x10] sm:$0xff]  }
  0x32   : > { %8323 = vmatprep.mubr.msk.bf16.mxu0 %vm911_vm1, %v8647_v2  ;;  %v8650_v5 = vld [vmem:[%s9380_s28 + $0x18] sm:$0xff]   ;;  %v8651_v6 = vld [vmem:[%s9380_s28 + $0x20] sm:$0xff]   ;;  %v8652_v7 = vld [vmem:[%s9380_s28 + $0x28] sm:$0xff]  }
  0x33   : > { %8324 = vmatmul.mubr.msk.bf16.vlgmr.msra.gmra.mrb[0].mxu0 %vm911_vm1, %v8648_v3  ;;  %v8653_v8 = vld [vmem:[%s9380_s28 + $0x30] sm:$0xff]   ;;  %v8654_v9 = vld [vmem:[%s9380_s28 + $0x38] sm:$0xff]   ;;  %v8655_v10 = vld [vmem:[%s9380_s28 + $0x40] sm:$0xff]  }
  0x34   : > { %8327 = vmatprep.mubr.msk.bf16.mxu0 %vm911_vm1, %v8649_v4  ;;  %v8656_v11 = vld [vmem:[%s9380_s28 + $0x48] sm:$0xff]   ;;  %v8657_v12 = vld [vmem:[%s9380_s28 + $0x50] sm:$0xff]   ;;  %v8658_v13 = vld [vmem:[%s9380_s28 + $0x58] sm:$0xff]  }
  0x35   : > { %v8659_v14 = vld [vmem:[%s9380_s28 + $0x60] sm:$0xff]   ;;  %v8692_v16 = vld [vmem:[%s9380_s28 + $0x1a8] sm:$0xff]   ;;  %v8661_v19 = vld [vmem:[%s9380_s28 + $0x70] sm:$0xff]  }
  0x36   : > { %v8691_v15 = vld [vmem:[%s9380_s28 + $0x1a0] sm:$0xff]   ;;  %v8660_v18 = vld [vmem:[%s9380_s28 + $0x68] sm:$0xff]   ;;  %v8696_v20 = vld [vmem:[%s9380_s28 + $0x1b0] sm:$0xff]  }
  0x37   : > { %8427 = vmatprep.mubr.msk.bf16.mxu1 %vm911_vm1, %v8691_v15  ;;  %v8697_v21 = vld [vmem:[%s9380_s28 + $0x1b8] sm:$0xff]   ;;  %v8663_v23 = vld [vmem:[%s9380_s28 + $0x80] sm:$0xff]   ;;  %v8701_v25 = vld [vmem:[%s9380_s28 + $0x1c8] sm:$0xff]  }
  0x38   : > { %8428 = vmatmul.mubr.msk.bf16.vlgmr.msra.gmra.mrb[0].mxu1 %vm911_vm1, %v8692_v16  ;;  %v8662_v22 = vld [vmem:[%s9380_s28 + $0x78] sm:$0xff]   ;;  %v8700_v24 = vld [vmem:[%s9380_s28 + $0x1c0] sm:$0xff]   ;;  %v8664_v27 = vld [vmem:[%s9380_s28 + $0x88] sm:$0xff]  }
  0x39   : > { %8452 = vmatpush3.bf16.msra.mxu1 %v8693_v17  ;;  %8431 = vmatprep.mubr.msk.bf16.mxu1 %vm911_vm1, %v8696_v20  ;;  %v8665_v28 = vld [vmem:[%s9380_s28 + $0x90] sm:$0xff]   ;;  %v8706_v30 = vld [vmem:[%s9380_s28 + $0x1d8] sm:$0xff]   ;;  %v8667_v33 = vld [vmem:[%s9380_s28 + $0xa0] sm:$0xff]  }
  0x3a   : > { %8453 = vmatprep.subr.bf16.mxu1 %v8702_v26  ;;  %v8705_v29 = vld [vmem:[%s9380_s28 + $0x1d0] sm:$0xff]   ;;  %v8666_v32 = vld [vmem:[%s9380_s28 + $0x98] sm:$0xff]   ;;  %v8710_v34 = vld [vmem:[%s9380_s28 + $0x1e0] sm:$0xff]  }
  0x3b   : > { %8328 = vmatmul.mubr.msk.bf16.gmra.mrb[4].mxu0 %vm911_vm1, %v8650_v5  ;;  %v8711_v35 = vld [vmem:[%s9380_s28 + $0x1e8] sm:$0xff]   ;;  %v8712_v36 = vld [vmem:[%s9380_s28 + $0x1f0] sm:$0xff]   ;;  %v8713_v40 = vld [vmem:[%s9380_s28 + $0x1f8] sm:$0xff]  }
  0x3c   : > { %8331 = vmatprep.mubr.msk.bf16.mxu0 %vm911_vm1, %v8651_v6  ;;  %v8668_v38 = vld [vmem:[%s9380_s28 + $0xa8] sm:$0xff]   ;;  %v8669_v39 = vld [vmem:[%s9380_s28 + $0xb0] sm:$0xff]   ;;  %v8670_v41 = vld [vmem:[%s9380_s28 + $0xb8] sm:$0xff]  }
  0x3d   : > { %8454 = vmatpush3.bf16.msra.mxu1 %v8702_v26  ;;  %v8671_v42 = vld [vmem:[%s9380_s28 + $0xc0] sm:$0xff]   ;;  %v8672_v43 = vld [vmem:[%s9380_s28 + $0xc8] sm:$0xff]   ;;  %v8673_v44 = vld [vmem:[%s9380_s28 + $0xd0] sm:$0xff]  }
  0x3e   : > { %8455 = vmatprep.subr.bf16.mxu1 %v8707_v31  ;;  %v8674_v45 = vld [vmem:[%s9380_s28 + $0xd8] sm:$0xff]   ;;  %v8675_v46 = vld [vmem:[%s9380_s28 + $0xe0] sm:$0xff]   ;;  %v8676_v47 = vld [vmem:[%s9380_s28 + $0xe8] sm:$0xff]  }
  0x3f   : > { %v8677_v48 = vld [vmem:[%s9380_s28 + $0xf0] sm:$0xff]   ;;  %v8678_v49 = vld [vmem:[%s9380_s28 + $0xf8] sm:$0xff]   ;;  %v8679_v50 = vld [vmem:[%s9380_s28 + $0x100] sm:$0xff]  }
  0x40   : > { %8432 = vmatmul.mubr.msk.bf16.gmra.mrb[4].mxu1 %vm911_vm1, %v8697_v21  ;;  %v8680_v51 = vld [vmem:[%s9380_s28 + $0x108] sm:$0xff]   ;;  %v8681_v52 = vld [vmem:[%s9380_s28 + $0x110] sm:$0xff]   ;;  %v8682_v53 = vld [vmem:[%s9380_s28 + $0x118] sm:$0xff]  }
  0x41   : > { %8435 = vmatprep.mubr.msk.bf16.mxu1 %vm911_vm1, %v8700_v24  ;;  %8456 = vmatpush3.bf16.msra.mxu1 %v8707_v31  ;;  %v8683_v54 = vld [vmem:[%s9380_s28 + $0x120] sm:$0xff]   ;;  %v8684_v55 = vld [vmem:[%s9380_s28 + $0x128] sm:$0xff]   ;;  %v8685_v56 = vld [vmem:[%s9380_s28 + $0x130] sm:$0xff]  }
  0x42   : > { %8457 = vmatprep.subr.bf16.mxu1 %v8714_v37  ;;  %v8686_v57 = vld [vmem:[%s9380_s28 + $0x138] sm:$0xff]   ;;  %v8687_v58 = vld [vmem:[%s9380_s28 + $0x140] sm:$0xff]   ;;  %v8688_v59 = vld [vmem:[%s9380_s28 + $0x148] sm:$0xff]  }
  0x43   : > { %8332 = vmatmul.mubr.msk.bf16.gmra.mrb[8].mxu0 %vm911_vm1, %v8652_v7  ;;  %v8689_v60 = vld [vmem:[%s9380_s28 + $0x150] sm:$0xff]   ;;  %v8690_v61 = vld [vmem:[%s9380_s28 + $0x158] sm:$0xff]   ;;  %v8694_v62 = vld [vmem:[%s9380_s28 + $0x160] sm:$0xff]  }
  0x44   : > { %8335 = vmatprep.mubr.msk.bf16.mxu0 %vm911_vm1, %v8653_v8  ;;  %v8695_v63 = vld [vmem:[%s9380_s28 + $0x168] sm:$0xff]   ;;  %v8698_v0 = vld [vmem:[%s9380_s28 + $0x170] sm:$0xff]   ;;  %v8699_v1 = vld [vmem:[%s9380_s28 + $0x178] sm:$0xff]  }
  0x45   : > { %8458 = vmatpush3.bf16.msra.mxu1 %v8714_v37  ;;  %v8703_v2 = vld [vmem:[%s9380_s28 + $0x180] sm:$0xff]   ;;  %v8704_v3 = vld [vmem:[%s9380_s28 + $0x188] sm:$0xff]   ;;  %v8708_v4 = vld [vmem:[%s9380_s28 + $0x190] sm:$0xff]  }
  0x46   : > { %v8709_v5 = vld [vmem:[%s9380_s28 + $0x198] sm:$0xff]   ;;  %v9528_v6 = vld [vmem:[%s11749_s2] ss:$0 sm:$0xff] }
  0x48   : > { %8436 = vmatmul.mubr.msk.bf16.gmra.mrb[8].mxu1 %vm911_vm1, %v8701_v25 }
  0x49   : > { %8439 = vmatprep.mubr.msk.bf16.mxu1 %vm911_vm1, %v8705_v29 }
  0x4b   : > { %8336 = vmatmul.mubr.msk.bf16.gmra.mrb[12].mxu0 %vm911_vm1, %v8654_v9 }
  0x4c   : > { %8339 = vmatprep.mubr.msk.bf16.mxu0 %vm911_vm1, %v8655_v10 }
  0x50   : > { %8440 = vmatmul.mubr.msk.bf16.gmra.mrb[12].mxu1 %vm911_vm1, %v8706_v30 }
  0x51   : > { %8443 = vmatprep.mubr.msk.bf16.mxu1 %vm911_vm1, %v8710_v34 }
  0x53   : > { %8340 = vmatmul.mubr.msk.bf16.gmra.mrb[16].mxu0 %vm911_vm1, %v8656_v11 }
  0x54   : > { %8343 = vmatprep.mubr.msk.bf16.mxu0 %vm911_vm1, %v8657_v12 }
  0x58   : > { %8444 = vmatmul.mubr.msk.bf16.gmra.mrb[16].mxu1 %vm911_vm1, %v8711_v35 }
  0x59   : > { %8447 = vmatprep.mubr.msk.bf16.mxu1 %vm911_vm1, %v8712_v36 }
  0x5b   : > { %8344 = vmatmul.mubr.msk.bf16.gmra.mrb[20].mxu0 %vm911_vm1, %v8658_v13 }
  0x5c   : > { %8347 = vmatprep.mubr.msk.bf16.mxu0 %vm911_vm1, %v8659_v14 }
  0x60   : > { %8448 = vmatmul.mubr.msk.bf16.gmra.mrb[20].mxu1 %vm911_vm1, %v8713_v40 }
  0x63   : > { %8348 = vmatmul.mubr.msk.bf16.gmra.mrb[24].mxu0 %vm911_vm1, %v8660_v18 }
  0x64   : > { %8351 = vmatprep.mubr.msk.bf16.mxu0 %vm911_vm1, %v8661_v19 }
  0x6b   : > { %8352 = vmatmul.mubr.msk.bf16.gmra.mrb[28].mxu0 %vm911_vm1, %v8662_v22 }
  0x6c   : > { %8355 = vmatprep.mubr.msk.bf16.mxu0 %vm911_vm1, %v8663_v23 }
  0x73   : > { %8356 = vmatmul.mubr.msk.bf16.gmra.mrb[32].mxu0 %vm911_vm1, %v8664_v27 }
  0x74   : > { %8359 = vmatprep.mubr.msk.bf16.mxu0 %vm911_vm1, %v8665_v28 }
  0x7b   : > { %8360 = vmatmul.mubr.msk.bf16.gmra.mrb[36].mxu0 %vm911_vm1, %v8666_v32 }
  0x7c   : > { %8363 = vmatprep.mubr.msk.bf16.mxu0 %vm911_vm1, %v8667_v33 }
  0x83   : > { %8364 = vmatmul.mubr.msk.bf16.gmra.mrb[40].mxu0 %vm911_vm1, %v8668_v38 }
  0x84   : > { %8367 = vmatprep.mubr.msk.bf16.mxu0 %vm911_vm1, %v8669_v39 }
  0x8b   : > { %8368 = vmatmul.mubr.msk.bf16.gmra.mrb[44].mxu0 %vm911_vm1, %v8670_v41 }
  0x8c   : > { %8371 = vmatprep.mubr.msk.bf16.mxu0 %vm911_vm1, %v8671_v42 }
  0x93   : > { %8372 = vmatmul.mubr.msk.bf16.gmra.mrb[48].mxu0 %vm911_vm1, %v8672_v43 }
  0x94   : > { %8375 = vmatprep.mubr.msk.bf16.mxu0 %vm911_vm1, %v8673_v44 }
  0x9b   : > { %8376 = vmatmul.mubr.msk.bf16.gmra.mrb[52].mxu0 %vm911_vm1, %v8674_v45 }
  0x9c   : > { %8379 = vmatprep.mubr.msk.bf16.mxu0 %vm911_vm1, %v8675_v46 }
  0xa3   : > { %8380 = vmatmul.mubr.msk.bf16.gmra.mrb[56].mxu0 %vm911_vm1, %v8676_v47 }
  0xa4   : > { %8383 = vmatprep.mubr.msk.bf16.mxu0 %vm911_vm1, %v8677_v48 }
  0xab   : > { %8384 = vmatmul.mubr.msk.bf16.gmra.mrb[60].mxu0 %vm911_vm1, %v8678_v49 }
  0xac   : > { %8387 = vmatprep.mubr.msk.bf16.mxu0 %vm911_vm1, %v8679_v50 }
  0xb3   : > { %8388 = vmatmul.mubr.msk.bf16.gmra.mrb[64].mxu0 %vm911_vm1, %v8680_v51 }
  0xb4   : > { %8391 = vmatprep.mubr.msk.bf16.mxu0 %vm911_vm1, %v8681_v52 }
  0xbb   : > { %8392 = vmatmul.mubr.msk.bf16.gmra.mrb[68].mxu0 %vm911_vm1, %v8682_v53 }
  0xbc   : > { %8395 = vmatprep.mubr.msk.bf16.mxu0 %vm911_vm1, %v8683_v54 }
  0xc3   : > { %8396 = vmatmul.mubr.msk.bf16.gmra.mrb[72].mxu0 %vm911_vm1, %v8684_v55 }
  0xc4   : > { %8399 = vmatprep.mubr.msk.bf16.mxu0 %vm911_vm1, %v8685_v56 }
  0xcb   : > { %8400 = vmatmul.mubr.msk.bf16.gmra.mrb[76].mxu0 %vm911_vm1, %v8686_v57 }
  0xcc   : > { %8403 = vmatprep.mubr.msk.bf16.mxu0 %vm911_vm1, %v8687_v58 }
  0xd3   : > { %8404 = vmatmul.mubr.msk.bf16.gmra.mrb[80].mxu0 %vm911_vm1, %v8688_v59 }
  0xd4   : > { %8407 = vmatprep.mubr.msk.bf16.mxu0 %vm911_vm1, %v8689_v60 }
  0xdb   : > { %8408 = vmatmul.mubr.msk.bf16.gmra.mrb[84].mxu0 %vm911_vm1, %v8690_v61 }
  0xdc   : > { %8411 = vmatprep.mubr.msk.bf16.mxu0 %vm911_vm1, %v8694_v62 }
  0xe3   : > { %8412 = vmatmul.mubr.msk.bf16.gmra.mrb[88].mxu0 %vm911_vm1, %v8695_v63 }
  0xe4   : > { %8415 = vmatprep.mubr.msk.bf16.mxu0 %vm911_vm1, %v8698_v0 }
  0xeb   : > { %8416 = vmatmul.mubr.msk.bf16.gmra.mrb[92].mxu0 %vm911_vm1, %v8699_v1 }
  0xec   : > { %8419 = vmatprep.mubr.msk.bf16.mxu0 %vm911_vm1, %v8703_v2 }
  0xf3   : > { %8420 = vmatmul.mubr.msk.bf16.gmra.mrb[96].mxu0 %vm911_vm1, %v8704_v3 }
  0xf4   : > { %8423 = vmatprep.mubr.msk.bf16.mxu0 %vm911_vm1, %v8708_v4 }
  0xfb   : > { %8424 = vmatmul.mubr.msk.bf16.gmra.mrb[100].mxu0 %vm911_vm1, %v8709_v5 }
 0x106   : > { %v8325_v7 = vpop.f32.mrb[0].mxu0 }
 0x107   : > { %v1151_v8 = vadd.f32 %v8325_v7, %v9528_v6  ;;  %v1142_v9 = vpop.f32.mrb[1].mxu0 }
 0x108   : > { %v1143_v10 = vadd.f32 %v9528_v6, %v1142_v9  ;;  %v8326_v11 = vpop.f32.mrb[2].mxu0 }
 0x109   : > { %v1783_v12 = vmul.f32 0.2, %v1151_v8  ;;  %v1154_v13 = vadd.f32 %v8326_v11, %v9528_v6  ;;  %v1145_v14 = vpop.f32.mrb[3].mxu0  ;;  %vm1655_vm2 = vcmp.gt.f32.partialorder %v1151_v8, 0.0 }
 0x10a   : > { %v1781_v15 = vmul.f32 0.2, %v1143_v10  ;;  %v1146_v16 = vadd.f32 %v9528_v6, %v1145_v14  ;;  %vm1653_vm3 = vcmp.gt.f32.partialorder %v1143_v10, 0.0 }
 0x10b   : > { %vm1656_vm4 = vcmp.gt.f32.partialorder %v1154_v13, 0.0  ;;  %v1784_v17 = vmul.f32 0.2, %v1154_v13  ;;  %v1911_v19 = vsel %vm1655_vm2, %v1151_v8, %v1783_v12 }
 0x10c   : > { %vm1654_vm5 = vcmp.gt.f32.partialorder %v1146_v16, 0.0  ;;  %v1782_v18 = vmul.f32 0.2, %v1146_v16  ;;  %v1909_v21 = vsel %vm1653_vm3, %v1143_v10, %v1781_v15 }
 0x10d   : > { %v1912_v20 = vsel %vm1656_vm4, %v1154_v13, %v1784_v17 }
 0x10e   : > { %v2046_v22 = vpack.c.bf16 %v1912_v20, %v1911_v19  ;;  %v1910_v23 = vsel %vm1654_vm5, %v1146_v16, %v1782_v18  ;;  %v8329_v24 = vpop.f32.mrb[4].mxu0 }
 0x10f   : > { %v2045_v25 = vpack.c.bf16 %v1910_v23, %v1909_v21  ;;  %v1167_v26 = vadd.f32 %v8329_v24, %v9528_v6  ;;  %v1158_v27 = vpop.f32.mrb[5].mxu0 }
 0x110   : > { %v1159_v28 = vadd.f32 %v9528_v6, %v1158_v27  ;;  %v8330_v29 = vpop.f32.mrb[6].mxu0 }
 0x111   : > { %v1787_v30 = vmul.f32 0.2, %v1167_v26  ;;  %v1170_v31 = vadd.f32 %v8330_v29, %v9528_v6  ;;  %v1161_v32 = vpop.f32.mrb[7].mxu0  ;;  %8459 = vmatprep.mubr.msk.bf16.mxu1 %vm2140_vm6, %v2045_v25  ;;  %vm1659_vm7 = vcmp.gt.f32.partialorder %v1167_v26, 0.0 }
 0x112   : > { %v1785_v33 = vmul.f32 0.2, %v1159_v28  ;;  %v1162_v34 = vadd.f32 %v9528_v6, %v1161_v32  ;;  %8460 = vmatmul.mubr.msk.bf16.vlgmr.msra.gmra.mrb[24].mxu1 %vm2140_vm6, %v2046_v22  ;;  %vm1657_vm8 = vcmp.gt.f32.partialorder %v1159_v28, 0.0 }
 0x113   : > { %vm1660_vm9 = vcmp.gt.f32.partialorder %v1170_v31, 0.0  ;;  %v1788_v35 = vmul.f32 0.2, %v1170_v31  ;;  %v1915_v37 = vsel %vm1659_vm7, %v1167_v26, %v1787_v30 }
 0x114   : > { %vm1658_vm10 = vcmp.gt.f32.partialorder %v1162_v34, 0.0  ;;  %v1786_v36 = vmul.f32 0.2, %v1162_v34  ;;  %v1913_v39 = vsel %vm1657_vm8, %v1159_v28, %v1785_v33 }
 0x115   : > { %v1916_v38 = vsel %vm1660_vm9, %v1170_v31, %v1788_v35 }
 0x116   : > { %v2048_v40 = vpack.c.bf16 %v1916_v38, %v1915_v37  ;;  %v1914_v41 = vsel %vm1658_vm10, %v1162_v34, %v1786_v36  ;;  %v8333_v42 = vpop.f32.mrb[8].mxu0 }
 0x117   : > { %v2047_v43 = vpack.c.bf16 %v1914_v41, %v1913_v39  ;;  %v1183_v44 = vadd.f32 %v8333_v42, %v9528_v6  ;;  %v1174_v45 = vpop.f32.mrb[9].mxu0  ;;  %v8429_v42 = vpop.f32.mrb[0].mxu1 }
 0x118   : > { %v1175_v46 = vadd.f32 %v9528_v6, %v1174_v45  ;;  %v8334_v47 = vpop.f32.mrb[10].mxu0  ;;  %v1558_v45 = vpop.f32.mrb[1].mxu1 }
 0x119   : > { %v1791_v48 = vmul.f32 0.2, %v1183_v44  ;;  %v1186_v49 = vadd.f32 %v8334_v47, %v9528_v6  ;;  %v1177_v50 = vpop.f32.mrb[11].mxu0  ;;  %8463 = vmatprep.mubr.msk.bf16.mxu1 %vm2140_vm6, %v2047_v43  ;;  %vm1663_vm11 = vcmp.gt.f32.partialorder %v1183_v44, 0.0 }
 0x11a   : > { %v1789_v51 = vmul.f32 0.2, %v1175_v46  ;;  %v1178_v52 = vadd.f32 %v9528_v6, %v1177_v50  ;;  %8464 = vmatmul.mubr.msk.bf16.gmra.mrb[28].mxu1 %vm2140_vm6, %v2048_v40  ;;  %vm1661_vm12 = vcmp.gt.f32.partialorder %v1175_v46, 0.0 }
 0x11b   : > { %vm1664_vm13 = vcmp.gt.f32.partialorder %v1186_v49, 0.0  ;;  %v1792_v53 = vmul.f32 0.2, %v1186_v49  ;;  %v1919_v55 = vsel %vm1663_vm11, %v1183_v44, %v1791_v48  ;;  %v8430_v48 = vpop.f32.mrb[2].mxu1 }
 0x11c   : > { %vm1662_vm14 = vcmp.gt.f32.partialorder %v1178_v52, 0.0  ;;  %v1790_v54 = vmul.f32 0.2, %v1178_v52  ;;  %v1917_v57 = vsel %vm1661_vm12, %v1175_v46, %v1789_v51  ;;  %v1567_v51 = vadd.f32 %v8429_v42, %v9528_v6 }
 0x11d   : > { %v1920_v56 = vsel %vm1664_vm13, %v1186_v49, %v1792_v53 }
 0x11e   : > { %v2050_v58 = vpack.c.bf16 %v1920_v56, %v1919_v55  ;;  %v1918_v59 = vsel %vm1662_vm14, %v1178_v52, %v1790_v54  ;;  %v8337_v60 = vpop.f32.mrb[12].mxu0  ;;  %v1561_v52 = vpop.f32.mrb[3].mxu1  ;;  %v1559_v54 = vadd.f32 %v9528_v6, %v1558_v45  ;;  %v1570_v55 = vadd.f32 %v8430_v48, %v9528_v6 }
 0x11f   : > { %v2049_v61 = vpack.c.bf16 %v1918_v59, %v1917_v57  ;;  %v1199_v62 = vadd.f32 %v8337_v60, %v9528_v6  ;;  %v1190_v63 = vpop.f32.mrb[13].mxu0  ;;  %v1562_v56 = vadd.f32 %v9528_v6, %v1561_v52  ;;  %vm1759_vm12 = vcmp.gt.f32.partialorder %v1567_v51, 0.0 }
 0x120   : > { %v1191_v0 = vadd.f32 %v9528_v6, %v1190_v63  ;;  %v8338_v1 = vpop.f32.mrb[14].mxu0  ;;  %v1887_v60 = vmul.f32 0.2, %v1567_v51  ;;  %vm1757_vm13 = vcmp.gt.f32.partialorder %v1559_v54, 0.0  ;;  %vm1760_vm14 = vcmp.gt.f32.partialorder %v1570_v55, 0.0 }
 0x121   : > { %v1795_v2 = vmul.f32 0.2, %v1199_v62  ;;  %v1202_v3 = vadd.f32 %v8338_v1, %v9528_v6  ;;  %v1193_v4 = vpop.f32.mrb[15].mxu0  ;;  %8467 = vmatprep.mubr.msk.bf16.mxu1 %vm2140_vm6, %v2049_v61  ;;  %vm1667_vm15 = vcmp.gt.f32.partialorder %v1199_v62, 0.0 }
 0x122   : > { %v1793_v5 = vmul.f32 0.2, %v1191_v0  ;;  %v1194_v7 = vadd.f32 %v9528_v6, %v1193_v4  ;;  %8468 = vmatmul.mubr.msk.bf16.gmra.mrb[32].mxu1 %vm2140_vm6, %v2050_v58  ;;  %vm1665_vm0 = vcmp.gt.f32.partialorder %v1191_v0, 0.0  ;;  %v1888_v4 = vmul.f32 0.2, %v1570_v55 }
 0x123   : > { %vm1668_vm1 = vcmp.gt.f32.partialorder %v1202_v3, 0.0  ;;  %v1796_v8 = vmul.f32 0.2, %v1202_v3  ;;  %v1923_v10 = vsel %vm1667_vm15, %v1199_v62, %v1795_v2 }
 0x124   : > { %vm1666_vm2 = vcmp.gt.f32.partialorder %v1194_v7, 0.0  ;;  %v1794_v9 = vmul.f32 0.2, %v1194_v7  ;;  %v1921_v12 = vsel %vm1665_vm0, %v1191_v0, %v1793_v5  ;;  %v1885_v0 = vmul.f32 0.2, %v1559_v54 }
 0x125   : > { %v1924_v11 = vsel %vm1668_vm1, %v1202_v3, %v1796_v8  ;;  %v9570_v3 = vsel %vm1759_vm12, %v1567_v51, %v1887_v60 }
 0x126   : > { %v2052_v13 = vpack.c.bf16 %v1924_v11, %v1923_v10  ;;  %v1922_v14 = vsel %vm1666_vm2, %v1194_v7, %v1794_v9  ;;  %v8341_v15 = vpop.f32.mrb[16].mxu0  ;;  %v9574_v9 = vsel %vm1757_vm13, %v1559_v54, %v1885_v0  ;;  %v8433_v10 = vpop.f32.mrb[4].mxu1 }
 0x127   : > { %v2051_v16 = vpack.c.bf16 %v1922_v14, %v1921_v12  ;;  %v1215_v17 = vadd.f32 %v8341_v15, %v9528_v6  ;;  %v1206_v18 = vpop.f32.mrb[17].mxu0  ;;  %v1574_v14 = vpop.f32.mrb[5].mxu1 }
 0x128   : > { %v1207_v19 = vadd.f32 %v9528_v6, %v1206_v18  ;;  %v8342_v20 = vpop.f32.mrb[18].mxu0  ;;  %v8434_v18 = vpop.f32.mrb[6].mxu1 }
 0x129   : > { %v1799_v21 = vmul.f32 0.2, %v1215_v17  ;;  %v1218_v22 = vadd.f32 %v8342_v20, %v9528_v6  ;;  %v1209_v23 = vpop.f32.mrb[19].mxu0  ;;  %8471 = vmatprep.mubr.msk.bf16.mxu1 %vm2140_vm6, %v2051_v16  ;;  %vm1671_vm3 = vcmp.gt.f32.partialorder %v1215_v17, 0.0 }
 0x12a   : > { %v1797_v24 = vmul.f32 0.2, %v1207_v19  ;;  %v1210_v25 = vadd.f32 %v9528_v6, %v1209_v23  ;;  %8472 = vmatmul.mubr.msk.bf16.gmra.mrb[36].mxu1 %vm2140_vm6, %v2052_v13  ;;  %vm1669_vm4 = vcmp.gt.f32.partialorder %v1207_v19, 0.0  ;;  %v9578_v13 = vsel %vm1760_vm14, %v1570_v55, %v1888_v4 }
 0x12b   : > { %vm1672_vm5 = vcmp.gt.f32.partialorder %v1218_v22, 0.0  ;;  %v1800_v26 = vmul.f32 0.2, %v1218_v22  ;;  %v1927_v28 = vsel %vm1671_vm3, %v1215_v17, %v1799_v21  ;;  %v2098_v17 = vpack.c.bf16 %v9578_v13, %v9570_v3  ;;  %v1577_v21 = vpop.f32.mrb[7].mxu1  ;;  %v3406_v13 = vld [vmem:[%s11752_s5 + $0x100] sm:$0xff] }
 0x12c   : > { %vm1670_vm7 = vcmp.gt.f32.partialorder %v1210_v25, 0.0  ;;  %v1798_v27 = vmul.f32 0.2, %v1210_v25  ;;  %v1925_v30 = vsel %vm1669_vm4, %v1207_v19, %v1797_v24  ;;  %vm1758_vm3 = vcmp.gt.f32.partialorder %v1562_v56, 0.0 }
 0x12d   : > { %v1928_v29 = vsel %vm1672_vm5, %v1218_v22, %v1800_v26  ;;  %v1886_v23 = vmul.f32 0.2, %v1562_v56  ;;  %v1583_v24 = vadd.f32 %v8433_v10, %v9528_v6 }
 0x12e   : > { %v2054_v31 = vpack.c.bf16 %v1928_v29, %v1927_v28  ;;  %v1926_v32 = vsel %vm1670_vm7, %v1210_v25, %v1798_v27  ;;  %v8345_v33 = vpop.f32.mrb[20].mxu0  ;;  %v1575_v25 = vadd.f32 %v9528_v6, %v1574_v14  ;;  %v1586_v29 = vadd.f32 %v8434_v18, %v9528_v6 }
 0x12f   : > { %v2053_v34 = vpack.c.bf16 %v1926_v32, %v1925_v30  ;;  %v1231_v35 = vadd.f32 %v8345_v33, %v9528_v6  ;;  %v1222_v36 = vpop.f32.mrb[21].mxu0  ;;  %v1578_v30 = vadd.f32 %v9528_v6, %v1577_v21  ;;  %vm1763_vm4 = vcmp.gt.f32.partialorder %v1583_v24, 0.0 }
 0x130   : > { %v1223_v37 = vadd.f32 %v9528_v6, %v1222_v36  ;;  %v8346_v38 = vpop.f32.mrb[22].mxu0  ;;  %vm1761_vm5 = vcmp.gt.f32.partialorder %v1575_v25, 0.0  ;;  %v1889_v42 = vmul.f32 0.2, %v1575_v25  ;;  %v1892_v55 = vmul.f32 0.2, %v1586_v29 }
 0x131   : > { %vm1675_vm8 = vcmp.gt.f32.partialorder %v1231_v35, 0.0  ;;  %v1803_v39 = vmul.f32 0.2, %v1231_v35  ;;  %v1234_v40 = vadd.f32 %v8346_v38, %v9528_v6  ;;  %v1225_v41 = vpop.f32.mrb[23].mxu0  ;;  %8475 = vmatprep.mubr.msk.bf16.mxu1 %vm2140_vm6, %v2053_v34  ;;  %v9587_v34 = vsel %vm1758_vm3, %v1562_v56, %v1886_v23 }
 0x132   : > { %vm1673_vm9 = vcmp.gt.f32.partialorder %v1223_v37, 0.0  ;;  %v1801_v43 = vmul.f32 0.2, %v1223_v37  ;;  %v1226_v44 = vadd.f32 %v9528_v6, %v1225_v41  ;;  %8476 = vmatmul.mubr.msk.bf16.gmra.mrb[40].mxu1 %vm2140_vm6, %v2054_v31  ;;  %v1891_v38 = vmul.f32 0.2, %v1583_v24 }
 0x133   : > { %v1931_v46 = vsel %vm1675_vm8, %v1231_v35, %v1803_v39  ;;  %vm1676_vm10 = vcmp.gt.f32.partialorder %v1234_v40, 0.0  ;;  %v1804_v47 = vmul.f32 0.2, %v1234_v40  ;;  %vm1762_vm12 = vcmp.gt.f32.partialorder %v1578_v30, 0.0 }
 0x134   : > { %v1929_v49 = vsel %vm1673_vm9, %v1223_v37, %v1801_v43  ;;  %vm1674_vm11 = vcmp.gt.f32.partialorder %v1226_v44, 0.0  ;;  %v1802_v50 = vmul.f32 0.2, %v1226_v44  ;;  %v2097_v37 = vpack.c.bf16 %v9587_v34, %v9574_v9 }
 0x135   : > { %v1932_v53 = vsel %vm1676_vm10, %v1234_v40, %v1804_v47  ;;  %v9597_v45 = vsel %vm1763_vm4, %v1583_v24, %v1891_v38  ;;  %v1890_v56 = vmul.f32 0.2, %v1578_v30 }
 0x136   : > { %v2056_v57 = vpack.c.bf16 %v1932_v53, %v1931_v46  ;;  %v1930_v58 = vsel %vm1674_vm11, %v1226_v44, %v1802_v50  ;;  %v8349_v59 = vpop.f32.mrb[24].mxu0  ;;  %v8437_v46 = vpop.f32.mrb[8].mxu1  ;;  %vm1764_vm11 = vcmp.gt.f32.partialorder %v1586_v29, 0.0 }
 0x137   : > { %v2055_v61 = vpack.c.bf16 %v1930_v58, %v1929_v49  ;;  %v1247_v62 = vadd.f32 %v8349_v59, %v9528_v6  ;;  %v1238_v63 = vpop.f32.mrb[25].mxu0  ;;  %v9600_v49 = vsel %vm1761_vm5, %v1575_v25, %v1889_v42  ;;  %v1590_v50 = vpop.f32.mrb[9].mxu1  ;;  %v9607_v4 = vsel %vm1762_vm12, %v1578_v30, %v1890_v56 }
 0x138   : > { %v1239_v1 = vadd.f32 %v9528_v6, %v1238_v63  ;;  %v8350_v2 = vpop.f32.mrb[26].mxu0  ;;  %v8438_v53 = vpop.f32.mrb[10].mxu1  ;;  %v2099_v10 = vpack.c.bf16 %v9607_v4, %v9600_v49 }
 0x139   : > { %vm1679_vm15 = vcmp.gt.f32.partialorder %v1247_v62, 0.0  ;;  %v1807_v5 = vmul.f32 0.2, %v1247_v62  ;;  %v1250_v7 = vadd.f32 %v8350_v2, %v9528_v6  ;;  %v1241_v8 = vpop.f32.mrb[27].mxu0  ;;  %8479 = vmatprep.mubr.msk.bf16.mxu1 %vm2140_vm6, %v2055_v61  ;;  %v1599_v61 = vadd.f32 %v8437_v46, %v9528_v6 }
 0x13a   : > { %vm1677_vm0 = vcmp.gt.f32.partialorder %v1239_v1, 0.0  ;;  %v1805_v11 = vmul.f32 0.2, %v1239_v1  ;;  %v1242_v12 = vadd.f32 %v9528_v6, %v1241_v8  ;;  %8480 = vmatmul.mubr.msk.bf16.gmra.mrb[44].mxu1 %vm2140_vm6, %v2056_v57  ;;  %v1593_v57 = vpop.f32.mrb[11].mxu1  ;;  %v9605_v2 = vsel %vm1764_vm11, %v1586_v29, %v1892_v55 }
 0x13b   : > { %v1935_v15 = vsel %vm1679_vm15, %v1247_v62, %v1807_v5  ;;  %vm1680_vm1 = vcmp.gt.f32.partialorder %v1250_v7, 0.0  ;;  %v1808_v16 = vmul.f32 0.2, %v1250_v7  ;;  %v1591_v62 = vadd.f32 %v9528_v6, %v1590_v50 }
 0x13c   : > { %v1933_v19 = vsel %vm1677_vm0, %v1239_v1, %v1805_v11  ;;  %vm1678_vm2 = vcmp.gt.f32.partialorder %v1242_v12, 0.0  ;;  %v1806_v20 = vmul.f32 0.2, %v1242_v12  ;;  %v2100_v8 = vpack.c.bf16 %v9605_v2, %v9597_v45 }
 0x13d   : > { %v1936_v22 = vsel %vm1680_vm1, %v1250_v7, %v1808_v16  ;;  %vm1767_vm13 = vcmp.gt.f32.partialorder %v1599_v61, 0.0  ;;  %vm1765_vm1 = vcmp.gt.f32.partialorder %v1591_v62, 0.0  ;;  %v1893_v25 = vmul.f32 0.2, %v1591_v62 }
 0x13e   : > { %v2058_v26 = vpack.c.bf16 %v1936_v22, %v1935_v15  ;;  %v1934_v27 = vsel %vm1678_vm2, %v1242_v12, %v1806_v20  ;;  %v8353_v28 = vpop.f32.mrb[28].mxu0  ;;  %v1895_v15 = vmul.f32 0.2, %v1599_v61  ;;  %v1602_v29 = vadd.f32 %v8438_v53, %v9528_v6 }
 0x13f   : > { %v2057_v31 = vpack.c.bf16 %v1934_v27, %v1933_v19  ;;  %v1263_v32 = vadd.f32 %v8353_v28, %v9528_v6  ;;  %v1254_v33 = vpop.f32.mrb[29].mxu0  ;;  %v8441_v19 = vpop.f32.mrb[12].mxu1  ;;  %v1594_v30 = vadd.f32 %v9528_v6, %v1593_v57 }
 0x140   : > { %v1255_v35 = vadd.f32 %v9528_v6, %v1254_v33  ;;  %v8354_v36 = vpop.f32.mrb[30].mxu0  ;;  %v1606_v22 = vpop.f32.mrb[13].mxu1  ;;  %v9619_v24 = vsel %vm1767_vm13, %v1599_v61, %v1895_v15  ;;  %v1615_v38 = vadd.f32 %v8441_v19, %v9528_v6  ;;  %vm1768_vm3 = vcmp.gt.f32.partialorder %v1602_v29, 0.0 }
 0x141   : > { %vm1683_vm7 = vcmp.gt.f32.partialorder %v1263_v32, 0.0  ;;  %v1811_v39 = vmul.f32 0.2, %v1263_v32  ;;  %v1266_v40 = vadd.f32 %v8354_v36, %v9528_v6  ;;  %v1257_v41 = vpop.f32.mrb[31].mxu0  ;;  %8483 = vmatprep.mubr.msk.bf16.mxu1 %vm2140_vm6, %v2057_v31  ;;  %v9623_v36 = vsel %vm1765_vm1, %v1591_v62, %v1893_v25 }
 0x142   : > { %vm1681_vm8 = vcmp.gt.f32.partialorder %v1255_v35, 0.0  ;;  %v1809_v43 = vmul.f32 0.2, %v1255_v35  ;;  %v1258_v44 = vadd.f32 %v9528_v6, %v1257_v41  ;;  %8484 = vmatmul.mubr.msk.bf16.gmra.mrb[48].mxu1 %vm2140_vm6, %v2058_v26  ;;  %v8442_v26 = vpop.f32.mrb[14].mxu1  ;;  %v1896_v42 = vmul.f32 0.2, %v1602_v29 }
 0x143   : > { %v1939_v47 = vsel %vm1683_vm7, %v1263_v32, %v1811_v39  ;;  %vm1684_vm9 = vcmp.gt.f32.partialorder %v1266_v40, 0.0  ;;  %v1812_v48 = vmul.f32 0.2, %v1266_v40  ;;  %v1609_v31 = vpop.f32.mrb[15].mxu1  ;;  %vm1766_vm4 = vcmp.gt.f32.partialorder %v1594_v30, 0.0 }
 0x144   : > { %v1937_v51 = vsel %vm1681_vm8, %v1255_v35, %v1809_v43  ;;  %vm1682_vm10 = vcmp.gt.f32.partialorder %v1258_v44, 0.0  ;;  %v1810_v52 = vmul.f32 0.2, %v1258_v44  ;;  %v1894_v46 = vmul.f32 0.2, %v1594_v30  ;;  %v8445_v53 = vpop.f32.mrb[16].mxu1 }
 0x145   : > { %v1940_v54 = vsel %vm1684_vm9, %v1266_v40, %v1812_v48  ;;  %v1622_v57 = vpop.f32.mrb[17].mxu1  ;;  %vm1771_vm9 = vcmp.gt.f32.partialorder %v1615_v38, 0.0 }
 0x146   : > { %v2060_v58 = vpack.c.bf16 %v1940_v54, %v1939_v47  ;;  %v1938_v59 = vsel %vm1682_vm10, %v1258_v44, %v1810_v52  ;;  %v8357_v60 = vpop.f32.mrb[32].mxu0  ;;  %v1607_v47 = vadd.f32 %v9528_v6, %v1606_v22  ;;  %v9631_v52 = vsel %vm1768_vm3, %v1602_v29, %v1896_v42 }
 0x147   : > { %v2059_v63 = vpack.c.bf16 %v1938_v59, %v1937_v51  ;;  %v1279_v0 = vadd.f32 %v8357_v60, %v9528_v6  ;;  %v1270_v1 = vpop.f32.mrb[33].mxu0  ;;  %v2102_v56 = vpack.c.bf16 %v9631_v52, %v9619_v24  ;;  %v9638_v59 = vsel %vm1766_vm4, %v1594_v30, %v1894_v46  ;;  %v8446_v60 = vpop.f32.mrb[18].mxu1 }
 0x148   : > { %v1271_v5 = vadd.f32 %v9528_v6, %v1270_v1  ;;  %v8358_v7 = vpop.f32.mrb[34].mxu0  ;;  %vm1769_vm11 = vcmp.gt.f32.partialorder %v1607_v47, 0.0 }
 0x149   : > { %vm1687_vm14 = vcmp.gt.f32.partialorder %v1279_v0, 0.0  ;;  %v1815_v11 = vmul.f32 0.2, %v1279_v0  ;;  %v1282_v12 = vadd.f32 %v8358_v7, %v9528_v6  ;;  %v1273_v14 = vpop.f32.mrb[35].mxu0  ;;  %8487 = vmatprep.mubr.msk.bf16.mxu1 %vm2140_vm6, %v2059_v63  ;;  %v2101_v63 = vpack.c.bf16 %v9638_v59, %v9623_v36  ;;  %v9897_v59 = vld [vmem:[%s11751_s4] ss:$0 sm:$0xff] }
 0x14a   : > { %vm1685_vm15 = vcmp.gt.f32.partialorder %v1271_v5, 0.0  ;;  %v1813_v16 = vmul.f32 0.2, %v1271_v5  ;;  %v1274_v18 = vadd.f32 %v9528_v6, %v1273_v14  ;;  %8488 = vmatmul.mubr.msk.bf16.gmra.mrb[52].mxu1 %vm2140_vm6, %v2060_v58  ;;  %v1899_v7 = vmul.f32 0.2, %v1615_v38 }
 0x14b   : > { %v1943_v20 = vsel %vm1687_vm14, %v1279_v0, %v1815_v11  ;;  %vm1688_vm0 = vcmp.gt.f32.partialorder %v1282_v12, 0.0  ;;  %v1816_v21 = vmul.f32 0.2, %v1282_v12  ;;  %v1625_v0 = vpop.f32.mrb[19].mxu1  ;;  %v1897_v11 = vmul.f32 0.2, %v1607_v47 }
 0x14c   : > { %vm1686_vm2 = vcmp.gt.f32.partialorder %v1274_v18, 0.0  ;;  %v1814_v23 = vmul.f32 0.2, %v1274_v18  ;;  %v1941_v27 = vsel %vm1685_vm15, %v1271_v5, %v1813_v16  ;;  %v1618_v16 = vadd.f32 %v8442_v26, %v9528_v6 }
 0x14d   : > { %v1944_v28 = vsel %vm1688_vm0, %v1282_v12, %v1816_v21  ;;  %v9648_v22 = vsel %vm1771_vm9, %v1615_v38, %v1899_v7  ;;  %v8449_v38 = vpop.f32.mrb[20].mxu1 }
 0x14e   : > { %v2062_v32 = vpack.c.bf16 %v1944_v28, %v1943_v20  ;;  %v1942_v33 = vsel %vm1686_vm2, %v1274_v18, %v1814_v23  ;;  %v8361_v35 = vpop.f32.mrb[36].mxu0  ;;  %v1610_v18 = vadd.f32 %v9528_v6, %v1609_v31  ;;  %vm1772_vm12 = vcmp.gt.f32.partialorder %v1618_v16, 0.0 }
 0x14f   : > { %v2061_v39 = vpack.c.bf16 %v1942_v33, %v1941_v27  ;;  %v1295_v40 = vadd.f32 %v8361_v35, %v9528_v6  ;;  %v1286_v41 = vpop.f32.mrb[37].mxu0  ;;  %v1900_v27 = vmul.f32 0.2, %v1618_v16  ;;  %v9655_v33 = vsel %vm1769_vm11, %v1607_v47, %v1897_v11 }
 0x150   : > { %v1287_v43 = vadd.f32 %v9528_v6, %v1286_v41  ;;  %v8362_v44 = vpop.f32.mrb[38].mxu0  ;;  %vm1770_vm13 = vcmp.gt.f32.partialorder %v1610_v18, 0.0  ;;  %v1898_v30 = vmul.f32 0.2, %v1610_v18  ;;  %v1638_v41 = vpop.f32.mrb[21].mxu1 }
 0x151   : > { %vm1691_vm5 = vcmp.gt.f32.partialorder %v1295_v40, 0.0  ;;  %v1819_v48 = vmul.f32 0.2, %v1295_v40  ;;  %v1298_v50 = vadd.f32 %v8362_v44, %v9528_v6  ;;  %v1289_v51 = vpop.f32.mrb[39].mxu0  ;;  %8491 = vmatprep.mubr.msk.bf16.mxu1 %vm2140_vm6, %v2061_v39  ;;  %v9657_v35 = vsel %vm1772_vm12, %v1618_v16, %v1900_v27  ;;  %v9665_v46 = vpop.f32.mrb[22].mxu1 }
 0x152   : > { %vm1689_vm7 = vcmp.gt.f32.partialorder %v1287_v43, 0.0  ;;  %v1817_v54 = vmul.f32 0.2, %v1287_v43  ;;  %v1290_v55 = vadd.f32 %v9528_v6, %v1289_v51  ;;  %8492 = vmatmul.mubr.msk.bf16.gmra.mrb[56].mxu1 %vm2140_vm6, %v2062_v32  ;;  %v9663_v44 = vsel %vm1770_vm13, %v1610_v18, %v1898_v30 }
 0x153   : > { %vm1692_vm8 = vcmp.gt.f32.partialorder %v1298_v50, 0.0  ;;  %v1820_v58 = vmul.f32 0.2, %v1298_v50  ;;  %v1947_v61 = vsel %vm1691_vm5, %v1295_v40, %v1819_v48  ;;  %v2104_v40 = vpack.c.bf16 %v9657_v35, %v9648_v22 }
 0x154   : > { %vm1690_vm10 = vcmp.gt.f32.partialorder %v1290_v55, 0.0  ;;  %v1818_v62 = vmul.f32 0.2, %v1290_v55  ;;  %v1945_v1 = vsel %vm1689_vm7, %v1287_v43, %v1817_v54  ;;  %v2103_v48 = vpack.c.bf16 %v9663_v44, %v9655_v33  ;;  %v9671_v54 = vpop.f32.mrb[23].mxu1 }
 0x155   : > { %v1948_v5 = vsel %vm1692_vm8, %v1298_v50, %v1820_v58  ;;  %v1631_v50 = vadd.f32 %v8445_v53, %v9528_v6  ;;  %v1623_v51 = vadd.f32 %v9528_v6, %v1622_v57  ;;  %v1626_v57 = vadd.f32 %v9528_v6, %v1625_v0 }
 0x156   : > { %v2064_v12 = vpack.c.bf16 %v1948_v5, %v1947_v61  ;;  %v1946_v14 = vsel %vm1690_vm10, %v1290_v55, %v1818_v62  ;;  %v8365_v15 = vpop.f32.mrb[40].mxu0 }
 0x157   : > { %v2063_v19 = vpack.c.bf16 %v1946_v14, %v1945_v1  ;;  %v1311_v20 = vadd.f32 %v8365_v15, %v9528_v6  ;;  %v1302_v21 = vpop.f32.mrb[41].mxu0  ;;  %v1634_v1 = vadd.f32 %v8446_v60, %v9528_v6  ;;  %vm1775_vm2 = vcmp.gt.f32.partialorder %v1631_v50, 0.0 }
 0x158   : > { %v1303_v23 = vadd.f32 %v9528_v6, %v1302_v21  ;;  %v8366_v25 = vpop.f32.mrb[42].mxu0  ;;  %vm1773_vm3 = vcmp.gt.f32.partialorder %v1623_v51, 0.0  ;;  %v1901_v53 = vmul.f32 0.2, %v1623_v51  ;;  %vm1774_vm10 = vcmp.gt.f32.partialorder %v1626_v57, 0.0 }
 0x159   : > { %vm1695_vm14 = vcmp.gt.f32.partialorder %v1311_v20, 0.0  ;;  %v1823_v28 = vmul.f32 0.2, %v1311_v20  ;;  %v1314_v26 = vadd.f32 %v8366_v25, %v9528_v6  ;;  %v1305_v29 = vpop.f32.mrb[43].mxu0  ;;  %8495 = vmatprep.mubr.msk.bf16.mxu1 %vm2140_vm6, %v2063_v19  ;;  %vm1776_vm5 = vcmp.gt.f32.partialorder %v1634_v1, 0.0 }
 0x15a   : > { %v1821_v31 = vmul.f32 0.2, %v1303_v23  ;;  %v1306_v32 = vadd.f32 %v9528_v6, %v1305_v29  ;;  %8496 = vmatmul.mubr.msk.bf16.gmra.mrb[60].mxu1 %vm2140_vm6, %v2064_v12  ;;  %vm1693_vm15 = vcmp.gt.f32.partialorder %v1303_v23, 0.0  ;;  %v1903_v12 = vmul.f32 0.2, %v1631_v50 }
 0x15b   : > { %vm1696_vm0 = vcmp.gt.f32.partialorder %v1314_v26, 0.0  ;;  %v1824_v39 = vmul.f32 0.2, %v1314_v26  ;;  %v1951_v42 = vsel %vm1695_vm14, %v1311_v20, %v1823_v28  ;;  %v9685_v0 = vsel %vm1773_vm3, %v1623_v51, %v1901_v53 }
 0x15c   : > { %vm1694_vm1 = vcmp.gt.f32.partialorder %v1306_v32, 0.0  ;;  %v1822_v43 = vmul.f32 0.2, %v1306_v32  ;;  %v1949_v55 = vsel %vm1693_vm15, %v1303_v23, %v1821_v31  ;;  %v9682_v21 = vsel %vm1775_vm2, %v1631_v50, %v1903_v12 }
 0x15d   : > { %v1952_v47 = vsel %vm1696_vm0, %v1314_v26, %v1824_v39  ;;  %v1904_v25 = vmul.f32 0.2, %v1634_v1  ;;  %v1902_v30 = vmul.f32 0.2, %v1626_v57  ;;  %v1647_v31 = vadd.f32 %v8449_v38, %v9528_v6 }
 0x15e   : > { %v2066_v58 = vpack.c.bf16 %v1952_v47, %v1951_v42  ;;  %v1950_v61 = vsel %vm1694_vm1, %v1306_v32, %v1822_v43  ;;  %v8369_v62 = vpop.f32.mrb[44].mxu0 }
 0x15f   : > { %v2065_v5 = vpack.c.bf16 %v1950_v61, %v1949_v55  ;;  %v1327_v7 = vadd.f32 %v8369_v62, %v9528_v6  ;;  %v1318_v11 = vpop.f32.mrb[45].mxu0  ;;  %v9687_v29 = vsel %vm1776_vm5, %v1634_v1, %v1904_v25  ;;  %v1639_v61 = vadd.f32 %v9528_v6, %v1638_v41 }
 0x160   : > { %v1319_v14 = vadd.f32 %v9528_v6, %v1318_v11  ;;  %v8370_v15 = vpop.f32.mrb[46].mxu0  ;;  %v2106_v47 = vpack.c.bf16 %v9687_v29, %v9682_v21  ;;  %vm1779_vm11 = vcmp.gt.f32.partialorder %v1647_v31, 0.0 }
 0x161   : > { %vm1699_vm4 = vcmp.gt.f32.partialorder %v1327_v7, 0.0  ;;  %v1827_v16 = vmul.f32 0.2, %v1327_v7  ;;  %v1330_v18 = vadd.f32 %v8370_v15, %v9528_v6  ;;  %v1321_v19 = vpop.f32.mrb[47].mxu0  ;;  %8499 = vmatprep.mubr.msk.bf16.mxu1 %vm2140_vm6, %v2065_v5  ;;  %v1907_v5 = vmul.f32 0.2, %v1647_v31 }
 0x162   : > { %vm1697_vm7 = vcmp.gt.f32.partialorder %v1319_v14, 0.0  ;;  %v1825_v60 = vmul.f32 0.2, %v1319_v14  ;;  %v1322_v20 = vadd.f32 %v9528_v6, %v1321_v19  ;;  %8500 = vmatmul.mubr.msk.bf16.gmra.mrb[64].mxu1 %vm2140_vm6, %v2066_v58  ;;  %v9694_v58 = vsel %vm1774_vm10, %v1626_v57, %v1902_v30 }
 0x163   : > { %vm1700_vm8 = vcmp.gt.f32.partialorder %v1330_v18, 0.0  ;;  %v1828_v23 = vmul.f32 0.2, %v1330_v18  ;;  %v1955_v27 = vsel %vm1699_vm4, %v1327_v7, %v1827_v16  ;;  %v2105_v38 = vpack.c.bf16 %v9694_v58, %v9685_v0 }
 0x164   : > { %vm1698_vm9 = vcmp.gt.f32.partialorder %v1322_v20, 0.0  ;;  %v1826_v28 = vmul.f32 0.2, %v1322_v20  ;;  %v1953_v32 = vsel %vm1697_vm7, %v1319_v14, %v1825_v60  ;;  %vm1777_vm15 = vcmp.gt.f32.partialorder %v1639_v61, 0.0 }
 0x165   : > { %v1956_v26 = vsel %vm1700_vm8, %v1330_v18, %v1828_v23  ;;  %v1905_v53 = vmul.f32 0.2, %v1639_v61  ;;  %v9704_v16 = vsel %vm1779_vm11, %v1647_v31, %v1907_v5  ;;  %v1650_v18 = vadd.f32 %v9665_v46, %v9528_v6 }
 0x166   : > { %v2068_v39 = vpack.c.bf16 %v1956_v26, %v1955_v27  ;;  %v1954_v42 = vsel %vm1698_vm9, %v1322_v20, %v1826_v28  ;;  %v8373_v43 = vpop.f32.mrb[48].mxu0  ;;  %v1642_v23 = vadd.f32 %v9528_v6, %v9671_v54 }
 0x167   : > { %v2067_v50 = vpack.c.bf16 %v1954_v42, %v1953_v32  ;;  %v1343_v51 = vadd.f32 %v8373_v43, %v9528_v6  ;;  %v1334_v55 = vpop.f32.mrb[49].mxu0  ;;  %vm1780_vm1 = vcmp.gt.f32.partialorder %v1650_v18, 0.0  ;;  %v1908_v26 = vmul.f32 0.2, %v1650_v18 }
 0x168   : > { %v1335_v62 = vadd.f32 %v9528_v6, %v1334_v55  ;;  %v8374_v1 = vpop.f32.mrb[50].mxu0  ;;  %vm1778_vm2 = vcmp.gt.f32.partialorder %v1642_v23, 0.0  ;;  %v1906_v31 = vmul.f32 0.2, %v1642_v23  ;;  %v9713_v43 = vsel %vm1777_vm15, %v1639_v61, %v1905_v53 }
 0x169   : > { %v1831_v7 = vmul.f32 0.2, %v1343_v51  ;;  %v1346_v11 = vadd.f32 %v8374_v1, %v9528_v6  ;;  %v1337_v12 = vpop.f32.mrb[51].mxu0  ;;  %8503 = vmatprep.mubr.msk.bf16.mxu1 %vm2140_vm6, %v2067_v50  ;;  %vm1703_vm12 = vcmp.gt.f32.partialorder %v1343_v51, 0.0  ;;  %v9715_v50 = vsel %vm1780_vm1, %v1650_v18, %v1908_v26 }
 0x16a   : > { %vm1701_vm13 = vcmp.gt.f32.partialorder %v1335_v62, 0.0  ;;  %v1829_v14 = vmul.f32 0.2, %v1335_v62  ;;  %v1338_v15 = vadd.f32 %v9528_v6, %v1337_v12  ;;  %8504 = vmatmul.mubr.msk.bf16.gmra.mrb[68].mxu1 %vm2140_vm6, %v2068_v39 }
 0x16b   : > { %vm1704_vm14 = vcmp.gt.f32.partialorder %v1346_v11, 0.0  ;;  %v1832_v41 = vmul.f32 0.2, %v1346_v11  ;;  %v1959_v19 = vsel %vm1703_vm12, %v1343_v51, %v1831_v7  ;;  %v9723_v7 = vsel %vm1778_vm2, %v1642_v23, %v1906_v31 }
 0x16c   : > { %vm1702_vm0 = vcmp.gt.f32.partialorder %v1338_v15, 0.0  ;;  %v1830_v57 = vmul.f32 0.2, %v1338_v15  ;;  %v1957_v60 = vsel %vm1701_vm13, %v1335_v62, %v1829_v14  ;;  %v2108_v62 = vpack.c.bf16 %v9715_v50, %v9704_v16 }
 0x16d   : > { %v1960_v20 = vsel %vm1704_vm14, %v1346_v11, %v1832_v41  ;;  %v2107_v11 = vpack.c.bf16 %v9723_v7, %v9713_v43 }
 0x16e   : > { %v2070_v25 = vpack.c.bf16 %v1960_v20, %v1959_v19  ;;  %v1958_v27 = vsel %vm1702_vm0, %v1338_v15, %v1830_v57  ;;  %v8377_v28 = vpop.f32.mrb[52].mxu0 }
 0x16f   : > { %v2069_v30 = vpack.c.bf16 %v1958_v27, %v1957_v60  ;;  %v1359_v32 = vadd.f32 %v8377_v28, %v9528_v6  ;;  %v1350_v39 = vpop.f32.mrb[53].mxu0 }
 0x170   : > { %v1351_v42 = vadd.f32 %v9528_v6, %v1350_v39  ;;  %v8378_v46 = vpop.f32.mrb[54].mxu0 }
 0x171   : > { %v1835_v54 = vmul.f32 0.2, %v1359_v32  ;;  %v1362_v51 = vadd.f32 %v8378_v46, %v9528_v6  ;;  %v1353_v55 = vpop.f32.mrb[55].mxu0  ;;  %8507 = vmatprep.mubr.msk.bf16.mxu1 %vm2140_vm6, %v2069_v30  ;;  %vm1707_vm3 = vcmp.gt.f32.partialorder %v1359_v32, 0.0 }
 0x172   : > { %v1833_v1 = vmul.f32 0.2, %v1351_v42  ;;  %v1354_v5 = vadd.f32 %v9528_v6, %v1353_v55  ;;  %8508 = vmatmul.mubr.msk.bf16.gmra.mrb[72].mxu1 %vm2140_vm6, %v2070_v25  ;;  %vm1705_vm4 = vcmp.gt.f32.partialorder %v1351_v42, 0.0 }
 0x173   : > { %vm1708_vm5 = vcmp.gt.f32.partialorder %v1362_v51, 0.0  ;;  %v1836_v61 = vmul.f32 0.2, %v1362_v51  ;;  %v1963_v14 = vsel %vm1707_vm3, %v1359_v32, %v1835_v54 }
 0x174   : > { %vm1706_vm7 = vcmp.gt.f32.partialorder %v1354_v5, 0.0  ;;  %v1834_v12 = vmul.f32 0.2, %v1354_v5  ;;  %v1961_v41 = vsel %vm1705_vm4, %v1351_v42, %v1833_v1 }
 0x175   : > { %v1964_v15 = vsel %vm1708_vm5, %v1362_v51, %v1836_v61 }
 0x176   : > { %v2072_v53 = vpack.c.bf16 %v1964_v15, %v1963_v14  ;;  %v1962_v57 = vsel %vm1706_vm7, %v1354_v5, %v1834_v12  ;;  %v8381_v18 = vpop.f32.mrb[56].mxu0 }
 0x177   : > { %v2071_v19 = vpack.c.bf16 %v1962_v57, %v1961_v41  ;;  %v1375_v60 = vadd.f32 %v8381_v18, %v9528_v6  ;;  %v1366_v20 = vpop.f32.mrb[57].mxu0 }
 0x178   : > { %v1367_v23 = vadd.f32 %v9528_v6, %v1366_v20  ;;  %v8382_v25 = vpop.f32.mrb[58].mxu0 }
 0x179   : > { %v1839_v27 = vmul.f32 0.2, %v1375_v60  ;;  %v1378_v28 = vadd.f32 %v8382_v25, %v9528_v6  ;;  %v1369_v26 = vpop.f32.mrb[59].mxu0  ;;  %8511 = vmatprep.mubr.msk.bf16.mxu1 %vm2140_vm6, %v2071_v19  ;;  %vm1711_vm8 = vcmp.gt.f32.partialorder %v1375_v60, 0.0 }
 0x17a   : > { %v1837_v30 = vmul.f32 0.2, %v1367_v23  ;;  %v1370_v32 = vadd.f32 %v9528_v6, %v1369_v26  ;;  %8512 = vmatmul.mubr.msk.bf16.gmra.mrb[76].mxu1 %vm2140_vm6, %v2072_v53  ;;  %vm1709_vm9 = vcmp.gt.f32.partialorder %v1367_v23, 0.0  ;;  %v3378_v26 = vld [vmem:[%s11752_s5 + $0x20] sm:$0xff] }
 0x17b   : > { %vm1712_vm10 = vcmp.gt.f32.partialorder %v1378_v28, 0.0  ;;  %v1840_v39 = vmul.f32 0.2, %v1378_v28  ;;  %v1967_v42 = vsel %vm1711_vm8, %v1375_v60, %v1839_v27 }
 0x17c   : > { %vm1710_vm11 = vcmp.gt.f32.partialorder %v1370_v32, 0.0  ;;  %v1838_v31 = vmul.f32 0.2, %v1370_v32  ;;  %v1965_v54 = vsel %vm1709_vm9, %v1367_v23, %v1837_v30 }
 0x17d   : > { %v1968_v46 = vsel %vm1712_vm10, %v1378_v28, %v1840_v39  ;;  %v3374_v28 = vld [vmem:[%s11752_s5] sm:$0xff] }
 0x17e   : > { %v2074_v51 = vpack.c.bf16 %v1968_v46, %v1967_v42  ;;  %v1966_v55 = vsel %vm1710_vm11, %v1370_v32, %v1838_v31  ;;  %v8385_v1 = vpop.f32.mrb[60].mxu0  ;;  %v7762_v39 = vcombine.low %v3374_v28, %v3378_v26  ;;  %v7763_v31 = vcombine.high %v3374_v28, %v3378_v26  ;;  %v9748_v46 = vld [vmem:[%s11749_s2] ss:$0 sm:$0xff] }
 0x17f   : > { %v2073_v5 = vpack.c.bf16 %v1966_v55, %v1965_v54  ;;  %v1391_v61 = vadd.f32 %v8385_v1, %v9528_v6  ;;  %v1382_v12 = vpop.f32.mrb[61].mxu0 }
 0x180   : > { %v1383_v14 = vadd.f32 %v9528_v6, %v1382_v12  ;;  %v8386_v15 = vpop.f32.mrb[62].mxu0  ;;  %3808 = vmatprep.subr.bf16.mxu0 %v7763_v31 }
 0x181   : > { %v1843_v41 = vmul.f32 0.2, %v1391_v61  ;;  %v1394_v53 = vadd.f32 %v8386_v15, %v9528_v6  ;;  %v1385_v57 = vpop.f32.mrb[63].mxu0  ;;  %8515 = vmatprep.mubr.msk.bf16.mxu1 %vm2140_vm6, %v2073_v5  ;;  %vm1715_vm12 = vcmp.gt.f32.partialorder %v1391_v61, 0.0  ;;  %3809 = vmatpush1.bf16.msra.mxu0 %v7762_v39 }
 0x182   : > { %vm1713_vm13 = vcmp.gt.f32.partialorder %v1383_v14, 0.0  ;;  %v1841_v18 = vmul.f32 0.2, %v1383_v14  ;;  %v1386_v19 = vadd.f32 %v9528_v6, %v1385_v57  ;;  %8516 = vmatmul.mubr.msk.bf16.gmra.mrb[80].mxu1 %vm2140_vm6, %v2074_v51 }
 0x183   : > { %vm1716_vm14 = vcmp.gt.f32.partialorder %v1394_v53, 0.0  ;;  %v1844_v60 = vmul.f32 0.2, %v1394_v53  ;;  %v1971_v23 = vsel %vm1715_vm12, %v1391_v61, %v1843_v41 }
 0x184   : > { %vm1714_vm15 = vcmp.gt.f32.partialorder %v1386_v19, 0.0  ;;  %v1842_v20 = vmul.f32 0.2, %v1386_v19  ;;  %v1969_v25 = vsel %vm1713_vm13, %v1383_v14, %v1841_v18 }
 0x185   : > { %v1972_v27 = vsel %vm1716_vm14, %v1394_v53, %v1844_v60 }
 0x186   : > { %v2076_v30 = vpack.c.bf16 %v1972_v27, %v1971_v23  ;;  %v1970_v32 = vsel %vm1714_vm15, %v1386_v19, %v1842_v20  ;;  %v8389_v6 = vpop.f32.mrb[64].mxu0 }
 0x187   : > { %v2075_v42 = vpack.c.bf16 %v1970_v32, %v1969_v25  ;;  %v1407_v54 = vadd.f32 %v9748_v46, %v8389_v6  ;;  %v1398_v51 = vpop.f32.mrb[65].mxu0 }
 0x188   : > { %v1399_v55 = vadd.f32 %v9748_v46, %v1398_v51  ;;  %v8390_v1 = vpop.f32.mrb[66].mxu0 }
 0x189   : > { %v1847_v5 = vmul.f32 0.2, %v1407_v54  ;;  %v1410_v61 = vadd.f32 %v9748_v46, %v8390_v1  ;;  %v1401_v12 = vpop.f32.mrb[67].mxu0  ;;  %8519 = vmatprep.mubr.msk.bf16.mxu1 %vm2140_vm6, %v2075_v42  ;;  %vm1719_vm0 = vcmp.gt.f32.partialorder %v1407_v54, 0.0 }
 0x18a   : > { %v1845_v14 = vmul.f32 0.2, %v1399_v55  ;;  %v1402_v15 = vadd.f32 %v9748_v46, %v1401_v12  ;;  %8520 = vmatmul.mubr.msk.bf16.gmra.mrb[84].mxu1 %vm2140_vm6, %v2076_v30  ;;  %vm1717_vm1 = vcmp.gt.f32.partialorder %v1399_v55, 0.0 }
 0x18b   : > { %vm1720_vm2 = vcmp.gt.f32.partialorder %v1410_v61, 0.0  ;;  %v1848_v41 = vmul.f32 0.2, %v1410_v61  ;;  %v1975_v57 = vsel %vm1719_vm0, %v1407_v54, %v1847_v5 }
 0x18c   : > { %vm1718_vm3 = vcmp.gt.f32.partialorder %v1402_v15, 0.0  ;;  %v1846_v53 = vmul.f32 0.2, %v1402_v15  ;;  %v1973_v19 = vsel %vm1717_vm1, %v1399_v55, %v1845_v14 }
 0x18d   : > { %v1976_v18 = vsel %vm1720_vm2, %v1410_v61, %v1848_v41  ;;  %v3379_v41 = vld [vmem:[%s11752_s5 + $0x28] sm:$0xff] }
 0x18e   : > { %v2078_v60 = vpack.c.bf16 %v1976_v18, %v1975_v57  ;;  %v1974_v20 = vsel %vm1718_vm3, %v1402_v15, %v1846_v53  ;;  %v8393_v23 = vpop.f32.mrb[68].mxu0  ;;  %v3375_v15 = vld [vmem:[%s11752_s5 + $0x8] sm:$0xff] }
 0x18f   : > { %v2077_v25 = vpack.c.bf16 %v1974_v20, %v1973_v19  ;;  %v1423_v27 = vadd.f32 %v9748_v46, %v8393_v23  ;;  %v1414_v28 = vpop.f32.mrb[69].mxu0  ;;  %v7764_v19 = vcombine.low %v3375_v15, %v3379_v41 }
 0x190   : > { %v1415_v26 = vadd.f32 %v9748_v46, %v1414_v28  ;;  %v8394_v32 = vpop.f32.mrb[70].mxu0 }
 0x191   : > { %v1851_v6 = vmul.f32 0.2, %v1423_v27  ;;  %v1426_v30 = vadd.f32 %v9748_v46, %v8394_v32  ;;  %v1417_v39 = vpop.f32.mrb[71].mxu0  ;;  %8523 = vmatprep.mubr.msk.bf16.mxu1 %vm2140_vm6, %v2077_v25  ;;  %vm1723_vm4 = vcmp.gt.f32.partialorder %v1423_v27, 0.0 }
 0x192   : > { %v1849_v31 = vmul.f32 0.2, %v1415_v26  ;;  %v1418_v42 = vadd.f32 %v9748_v46, %v1417_v39  ;;  %8524 = vmatmul.mubr.msk.bf16.gmra.mrb[88].mxu1 %vm2140_vm6, %v2078_v60  ;;  %vm1721_vm5 = vcmp.gt.f32.partialorder %v1415_v26, 0.0  ;;  %v7765_v60 = vcombine.high %v3375_v15, %v3379_v41 }
 0x193   : > { %vm1724_vm7 = vcmp.gt.f32.partialorder %v1426_v30, 0.0  ;;  %v1852_v54 = vmul.f32 0.2, %v1426_v30  ;;  %v1979_v55 = vsel %vm1723_vm4, %v1423_v27, %v1851_v6 }
 0x194   : > { %vm1722_vm8 = vcmp.gt.f32.partialorder %v1418_v42, 0.0  ;;  %v1850_v51 = vmul.f32 0.2, %v1418_v42  ;;  %v1977_v5 = vsel %vm1721_vm5, %v1415_v26, %v1849_v31  ;;  %3921 = vmatprep.subr.bf16.mxu1 %v7765_v60 }
 0x195   : > { %v1980_v1 = vsel %vm1724_vm7, %v1426_v30, %v1852_v54  ;;  %3922 = vmatpush1.bf16.msra.mxu1 %v7764_v19 }
 0x196   : > { %v2080_v61 = vpack.c.bf16 %v1980_v1, %v1979_v55  ;;  %v1978_v12 = vsel %vm1722_vm8, %v1418_v42, %v1850_v51  ;;  %v8397_v14 = vpop.f32.mrb[72].mxu0  ;;  %v3382_v1 = vld [vmem:[%s11752_s5 + $0x40] sm:$0xff] }
 0x197   : > { %v2079_v53 = vpack.c.bf16 %v1978_v12, %v1977_v5  ;;  %v1439_v57 = vadd.f32 %v9748_v46, %v8397_v14  ;;  %v1430_v18 = vpop.f32.mrb[73].mxu0  ;;  %v3386_v5 = vld [vmem:[%s11752_s5 + $0x60] sm:$0xff] }
 0x198   : > { %v1431_v20 = vadd.f32 %v9748_v46, %v1430_v18  ;;  %v8398_v23 = vpop.f32.mrb[74].mxu0  ;;  %v7770_v15 = vcombine.low %v3382_v1, %v3386_v5  ;;  %v7771_v41 = vcombine.high %v3382_v1, %v3386_v5 }
 0x199   : > { %v1855_v25 = vmul.f32 0.2, %v1439_v57  ;;  %v1442_v27 = vadd.f32 %v9748_v46, %v8398_v23  ;;  %v1433_v28 = vpop.f32.mrb[75].mxu0  ;;  %8527 = vmatprep.mubr.msk.bf16.mxu1 %vm2140_vm6, %v2079_v53  ;;  %vm1727_vm9 = vcmp.gt.f32.partialorder %v1439_v57, 0.0 }
 0x19a   : > { %v1853_v26 = vmul.f32 0.2, %v1431_v20  ;;  %v1434_v32 = vadd.f32 %v9748_v46, %v1433_v28  ;;  %8528 = vmatmul.mubr.msk.bf16.gmra.mrb[92].mxu1 %vm2140_vm6, %v2080_v61  ;;  %vm1725_vm10 = vcmp.gt.f32.partialorder %v1431_v20, 0.0  ;;  %3810 = vmatprep.subr.bf16.mxu0 %v7771_v41 }
 0x19b   : > { %vm1728_vm11 = vcmp.gt.f32.partialorder %v1442_v27, 0.0  ;;  %v1856_v6 = vmul.f32 0.2, %v1442_v27  ;;  %v1983_v39 = vsel %vm1727_vm9, %v1439_v57, %v1855_v25  ;;  %3811 = vmatpush1.bf16.msra.mxu0 %v7770_v15 }
 0x19c   : > { %vm1726_vm12 = vcmp.gt.f32.partialorder %v1434_v32, 0.0  ;;  %v1854_v30 = vmul.f32 0.2, %v1434_v32  ;;  %v1981_v42 = vsel %vm1725_vm10, %v1431_v20, %v1853_v26 }
 0x19d   : > { %v1984_v31 = vsel %vm1728_vm11, %v1442_v27, %v1856_v6 }
 0x19e   : > { %v2082_v54 = vpack.c.bf16 %v1984_v31, %v1983_v39  ;;  %v1982_v51 = vsel %vm1726_vm12, %v1434_v32, %v1854_v30  ;;  %v8401_v55 = vpop.f32.mrb[76].mxu0 }
 0x19f   : > { %v2081_v61 = vpack.c.bf16 %v1982_v51, %v1981_v42  ;;  %v1455_v12 = vadd.f32 %v9748_v46, %v8401_v55  ;;  %v1446_v14 = vpop.f32.mrb[77].mxu0 }
 0x1a0   : > { %v1447_v53 = vadd.f32 %v9748_v46, %v1446_v14  ;;  %v8402_v57 = vpop.f32.mrb[78].mxu0 }
 0x1a1   : > { %v1859_v18 = vmul.f32 0.2, %v1455_v12  ;;  %v1458_v19 = vadd.f32 %v9748_v46, %v8402_v57  ;;  %v1449_v60 = vpop.f32.mrb[79].mxu0  ;;  %8531 = vmatprep.mubr.msk.bf16.mxu1 %vm2140_vm6, %v2081_v61  ;;  %vm1731_vm13 = vcmp.gt.f32.partialorder %v1455_v12, 0.0 }
 0x1a2   : > { %v1857_v20 = vmul.f32 0.2, %v1447_v53  ;;  %v1450_v23 = vadd.f32 %v9748_v46, %v1449_v60  ;;  %8532 = vmatmul.mubr.msk.bf16.gmra.mrb[96].mxu1 %vm2140_vm6, %v2082_v54  ;;  %vm1729_vm14 = vcmp.gt.f32.partialorder %v1447_v53, 0.0 }
 0x1a3   : > { %vm1732_vm15 = vcmp.gt.f32.partialorder %v1458_v19, 0.0  ;;  %v1860_v25 = vmul.f32 0.2, %v1458_v19  ;;  %v1987_v28 = vsel %vm1731_vm13, %v1455_v12, %v1859_v18 }
 0x1a4   : > { %vm1730_vm0 = vcmp.gt.f32.partialorder %v1450_v23, 0.0  ;;  %v1858_v27 = vmul.f32 0.2, %v1450_v23  ;;  %v1985_v32 = vsel %vm1729_vm14, %v1447_v53, %v1857_v20 }
 0x1a5   : > { %v1988_v26 = vsel %vm1732_vm15, %v1458_v19, %v1860_v25 }
 0x1a6   : > { %v2084_v6 = vpack.c.bf16 %v1988_v26, %v1987_v28  ;;  %v1986_v30 = vsel %vm1730_vm0, %v1450_v23, %v1858_v27  ;;  %v8405_v39 = vpop.f32.mrb[80].mxu0 }
 0x1a7   : > { %v2083_v31 = vpack.c.bf16 %v1986_v30, %v1985_v32  ;;  %v1471_v42 = vadd.f32 %v9748_v46, %v8405_v39  ;;  %v1462_v51 = vpop.f32.mrb[81].mxu0 }
 0x1a8   : > { %v1463_v55 = vadd.f32 %v9748_v46, %v1462_v51  ;;  %v8406_v1 = vpop.f32.mrb[82].mxu0 }
 0x1a9   : > { %v1863_v54 = vmul.f32 0.2, %v1471_v42  ;;  %v1474_v5 = vadd.f32 %v9748_v46, %v8406_v1  ;;  %v1465_v61 = vpop.f32.mrb[83].mxu0  ;;  %8535 = vmatprep.mubr.msk.bf16.mxu1 %vm2140_vm6, %v2083_v31  ;;  %vm1735_vm1 = vcmp.gt.f32.partialorder %v1471_v42, 0.0 }
 0x1aa   : > { %v1861_v12 = vmul.f32 0.2, %v1463_v55  ;;  %v1466_v14 = vadd.f32 %v9748_v46, %v1465_v61  ;;  %8536 = vmatmul.mubr.msk.bf16.gmra.mrb[100].mxu1 %vm2140_vm6, %v2084_v6  ;;  %vm1733_vm2 = vcmp.gt.f32.partialorder %v1463_v55, 0.0 }
 0x1ab   : > { %vm1736_vm3 = vcmp.gt.f32.partialorder %v1474_v5, 0.0  ;;  %v1864_v15 = vmul.f32 0.2, %v1474_v5  ;;  %v1991_v53 = vsel %vm1735_vm1, %v1471_v42, %v1863_v54 }
 0x1ac   : > { %vm1734_vm4 = vcmp.gt.f32.partialorder %v1466_v14, 0.0  ;;  %v1862_v41 = vmul.f32 0.2, %v1466_v14  ;;  %v1989_v18 = vsel %vm1733_vm2, %v1463_v55, %v1861_v12 }
 0x1ad   : > { %v1992_v57 = vsel %vm1736_vm3, %v1474_v5, %v1864_v15  ;;  %v3387_v15 = vld [vmem:[%s11752_s5 + $0x68] sm:$0xff] }
 0x1ae   : > { %v2086_v19 = vpack.c.bf16 %v1992_v57, %v1991_v53  ;;  %v1990_v60 = vsel %vm1734_vm4, %v1466_v14, %v1862_v41  ;;  %v8409_v20 = vpop.f32.mrb[84].mxu0  ;;  %v3383_v14 = vld [vmem:[%s11752_s5 + $0x48] sm:$0xff] }
 0x1af   : > { %v2085_v23 = vpack.c.bf16 %v1990_v60, %v1989_v18  ;;  %v1487_v25 = vadd.f32 %v9748_v46, %v8409_v20  ;;  %v1478_v27 = vpop.f32.mrb[85].mxu0  ;;  %v7772_v18 = vcombine.low %v3383_v14, %v3387_v15 }
 0x1b0   : > { %v1479_v28 = vadd.f32 %v9748_v46, %v1478_v27  ;;  %v8410_v26 = vpop.f32.mrb[86].mxu0 }
 0x1b1   : > { %v1867_v32 = vmul.f32 0.2, %v1487_v25  ;;  %v1490_v6 = vadd.f32 %v9748_v46, %v8410_v26  ;;  %v1481_v30 = vpop.f32.mrb[87].mxu0  ;;  %8539 = vmatprep.mubr.msk.bf16.mxu1 %vm2140_vm6, %v2085_v23  ;;  %vm1739_vm5 = vcmp.gt.f32.partialorder %v1487_v25, 0.0 }
 0x1b2   : > { %v1865_v39 = vmul.f32 0.2, %v1479_v28  ;;  %v1482_v31 = vadd.f32 %v9748_v46, %v1481_v30  ;;  %8540 = vmatmul.mubr.msk.bf16.gmra.mrb[104].mxu1 %vm2140_vm6, %v2086_v19  ;;  %vm1737_vm7 = vcmp.gt.f32.partialorder %v1479_v28, 0.0  ;;  %v7773_v19 = vcombine.high %v3383_v14, %v3387_v15  ;;  %v3394_v30 = vld [vmem:[%s11752_s5 + $0xa0] sm:$0xff] }
 0x1b3   : > { %vm1740_vm8 = vcmp.gt.f32.partialorder %v1490_v6, 0.0  ;;  %v1868_v42 = vmul.f32 0.2, %v1490_v6  ;;  %v1995_v55 = vsel %vm1739_vm5, %v1487_v25, %v1867_v32 }
 0x1b4   : > { %vm1738_vm9 = vcmp.gt.f32.partialorder %v1482_v31, 0.0  ;;  %v1866_v51 = vmul.f32 0.2, %v1482_v31  ;;  %v1993_v54 = vsel %vm1737_vm7, %v1479_v28, %v1865_v39  ;;  %3923 = vmatprep.subr.bf16.mxu1 %v7773_v19 }
 0x1b5   : > { %v1996_v1 = vsel %vm1740_vm8, %v1490_v6, %v1868_v42  ;;  %3924 = vmatpush1.bf16.msra.mxu1 %v7772_v18  ;;  %v3390_v6 = vld [vmem:[%s11752_s5 + $0x80] sm:$0xff] }
 0x1b6   : > { %v2088_v5 = vpack.c.bf16 %v1996_v1, %v1995_v55  ;;  %v1994_v61 = vsel %vm1738_vm9, %v1482_v31, %v1866_v51  ;;  %v8413_v12 = vpop.f32.mrb[88].mxu0  ;;  %v7778_v31 = vcombine.low %v3390_v6, %v3394_v30  ;;  %v7779_v55 = vcombine.high %v3390_v6, %v3394_v30 }
 0x1b7   : > { %v2087_v41 = vpack.c.bf16 %v1994_v61, %v1993_v54  ;;  %v1503_v53 = vadd.f32 %v9748_v46, %v8413_v12  ;;  %v1494_v57 = vpop.f32.mrb[89].mxu0 }
 0x1b8   : > { %v1495_v60 = vadd.f32 %v9748_v46, %v1494_v57  ;;  %v8414_v20 = vpop.f32.mrb[90].mxu0  ;;  %3812 = vmatprep.subr.bf16.mxu0 %v7779_v55 }
 0x1b9   : > { %v1871_v23 = vmul.f32 0.2, %v1503_v53  ;;  %v1506_v25 = vadd.f32 %v9748_v46, %v8414_v20  ;;  %v1497_v27 = vpop.f32.mrb[91].mxu0  ;;  %8543 = vmatprep.mubr.msk.bf16.mxu1 %vm2140_vm6, %v2087_v41  ;;  %vm1743_vm10 = vcmp.gt.f32.partialorder %v1503_v53, 0.0  ;;  %3813 = vmatpush1.bf16.msra.mxu0 %v7778_v31 }
 0x1ba   : > { %v1869_v28 = vmul.f32 0.2, %v1495_v60  ;;  %v1498_v26 = vadd.f32 %v9748_v46, %v1497_v27  ;;  %8544 = vmatmul.mubr.msk.bf16.gmra.mrb[108].mxu1 %vm2140_vm6, %v2088_v5  ;;  %vm1741_vm11 = vcmp.gt.f32.partialorder %v1495_v60, 0.0 }
 0x1bb   : > { %vm1744_vm12 = vcmp.gt.f32.partialorder %v1506_v25, 0.0  ;;  %v1872_v32 = vmul.f32 0.2, %v1506_v25  ;;  %v1999_v42 = vsel %vm1743_vm10, %v1503_v53, %v1871_v23 }
 0x1bc   : > { %vm1742_vm13 = vcmp.gt.f32.partialorder %v1498_v26, 0.0  ;;  %v1870_v39 = vmul.f32 0.2, %v1498_v26  ;;  %v1997_v1 = vsel %vm1741_vm11, %v1495_v60, %v1869_v28 }
 0x1bd   : > { %v2000_v51 = vsel %vm1744_vm12, %v1506_v25, %v1872_v32 }
 0x1be   : > { %v2090_v54 = vpack.c.bf16 %v2000_v51, %v1999_v42  ;;  %v1998_v5 = vsel %vm1742_vm13, %v1498_v26, %v1870_v39  ;;  %v8417_v61 = vpop.f32.mrb[92].mxu0 }
 0x1bf   : > { %v2089_v12 = vpack.c.bf16 %v1998_v5, %v1997_v1  ;;  %v1519_v14 = vadd.f32 %v9748_v46, %v8417_v61  ;;  %v1510_v15 = vpop.f32.mrb[93].mxu0 }
 0x1c0   : > { %v1511_v41 = vadd.f32 %v9748_v46, %v1510_v15  ;;  %v8418_v57 = vpop.f32.mrb[94].mxu0 }
 0x1c1   : > { %v1875_v18 = vmul.f32 0.2, %v1519_v14  ;;  %v1522_v19 = vadd.f32 %v9748_v46, %v8418_v57  ;;  %v1513_v20 = vpop.f32.mrb[95].mxu0  ;;  %8547 = vmatprep.mubr.msk.bf16.mxu1 %vm2140_vm6, %v2089_v12  ;;  %vm1747_vm14 = vcmp.gt.f32.partialorder %v1519_v14, 0.0 }
 0x1c2   : > { %v1873_v53 = vmul.f32 0.2, %v1511_v41  ;;  %v1514_v60 = vadd.f32 %v9748_v46, %v1513_v20  ;;  %8548 = vmatmul.mubr.msk.bf16.gmra.mrb[112].mxu1 %vm2140_vm6, %v2090_v54  ;;  %vm1745_vm15 = vcmp.gt.f32.partialorder %v1511_v41, 0.0 }
 0x1c3   : > { %vm1748_vm0 = vcmp.gt.f32.partialorder %v1522_v19, 0.0  ;;  %v1876_v23 = vmul.f32 0.2, %v1522_v19  ;;  %v2003_v27 = vsel %vm1747_vm14, %v1519_v14, %v1875_v18 }
 0x1c4   : > { %vm1746_vm1 = vcmp.gt.f32.partialorder %v1514_v60, 0.0  ;;  %v1874_v25 = vmul.f32 0.2, %v1514_v60  ;;  %v2001_v26 = vsel %vm1745_vm15, %v1511_v41, %v1873_v53 }
 0x1c5   : > { %v2004_v28 = vsel %vm1748_vm0, %v1522_v19, %v1876_v23 }
 0x1c6   : > { %v2092_v32 = vpack.c.bf16 %v2004_v28, %v2003_v27  ;;  %v2002_v6 = vsel %vm1746_vm1, %v1514_v60, %v1874_v25  ;;  %v8421_v30 = vpop.f32.mrb[96].mxu0 }
 0x1c7   : > { %v2091_v39 = vpack.c.bf16 %v2002_v6, %v2001_v26  ;;  %v1535_v31 = vadd.f32 %v9748_v46, %v8421_v30  ;;  %v1526_v42 = vpop.f32.mrb[97].mxu0 }
 0x1c8   : > { %v1527_v51 = vadd.f32 %v9748_v46, %v1526_v42  ;;  %v8422_v55 = vpop.f32.mrb[98].mxu0 }
 0x1c9   : > { %v1879_v1 = vmul.f32 0.2, %v1535_v31  ;;  %v1538_v54 = vadd.f32 %v9748_v46, %v8422_v55  ;;  %v1529_v5 = vpop.f32.mrb[99].mxu0  ;;  %8551 = vmatprep.mubr.msk.bf16.mxu1 %vm2140_vm6, %v2091_v39  ;;  %vm1751_vm2 = vcmp.gt.f32.partialorder %v1535_v31, 0.0 }
 0x1ca   : > { %v1877_v61 = vmul.f32 0.2, %v1527_v51  ;;  %v1530_v12 = vadd.f32 %v9748_v46, %v1529_v5  ;;  %8552 = vmatmul.mubr.msk.bf16.gmra.mrb[116].mxu1 %vm2140_vm6, %v2092_v32  ;;  %vm1749_vm3 = vcmp.gt.f32.partialorder %v1527_v51, 0.0  ;;  %v3402_v5 = vld [vmem:[%s11752_s5 + $0xe0] sm:$0xff] }
 0x1cb   : > { %vm1752_vm4 = vcmp.gt.f32.partialorder %v1538_v54, 0.0  ;;  %v1880_v14 = vmul.f32 0.2, %v1538_v54  ;;  %v2007_v41 = vsel %vm1751_vm2, %v1535_v31, %v1879_v1 }
 0x1cc   : > { %vm1750_vm5 = vcmp.gt.f32.partialorder %v1530_v12, 0.0  ;;  %v1878_v15 = vmul.f32 0.2, %v1530_v12  ;;  %v2005_v18 = vsel %vm1749_vm3, %v1527_v51, %v1877_v61 }
 0x1cd   : > { %v2008_v57 = vsel %vm1752_vm4, %v1538_v54, %v1880_v14  ;;  %v3398_v54 = vld [vmem:[%s11752_s5 + $0xc0] sm:$0xff] }
 0x1ce   : > { %v2094_v19 = vpack.c.bf16 %v2008_v57, %v2007_v41  ;;  %v2006_v20 = vsel %vm1750_vm5, %v1530_v12, %v1878_v15  ;;  %v8425_v53 = vpop.f32.mrb[100].mxu0  ;;  %v7787_v14 = vcombine.high %v3398_v54, %v3402_v5  ;;  %v3391_v15 = vld [vmem:[%s11752_s5 + $0x88] sm:$0xff] }
 0x1cf   : > { %v2093_v60 = vpack.c.bf16 %v2006_v20, %v2005_v18  ;;  %v1551_v23 = vadd.f32 %v9748_v46, %v8425_v53  ;;  %v1542_v25 = vpop.f32.mrb[101].mxu0  ;;  %v3395_v41 = vld [vmem:[%s11752_s5 + $0xa8] sm:$0xff] }
 0x1d0   : > { %v1543_v27 = vadd.f32 %v9748_v46, %v1542_v25  ;;  %v8426_v28 = vpop.f32.mrb[102].mxu0  ;;  %v7780_v18 = vcombine.low %v3391_v15, %v3395_v41  ;;  %3814 = vmatprep.subr.bf16.mxu0 %v7787_v14 }
 0x1d1   : > { %v1883_v26 = vmul.f32 0.2, %v1551_v23  ;;  %v1554_v32 = vadd.f32 %v9748_v46, %v8426_v28  ;;  %v1545_v6 = vpop.f32.mrb[103].mxu0  ;;  %8555 = vmatprep.mubr.msk.bf16.mxu1 %vm2140_vm6, %v2093_v60  ;;  %vm1755_vm7 = vcmp.gt.f32.partialorder %v1551_v23, 0.0 }
 0x1d2   : > { %vm1753_vm8 = vcmp.gt.f32.partialorder %v1543_v27, 0.0  ;;  %v1881_v30 = vmul.f32 0.2, %v1543_v27  ;;  %v1546_v39 = vadd.f32 %v9748_v46, %v1545_v6  ;;  %8556 = vmatmul.mubr.msk.bf16.gmra.mrb[120].mxu1 %vm2140_vm6, %v2094_v19  ;;  %v7786_v46 = vcombine.low %v3398_v54, %v3402_v5 }
 0x1d3   : > { %vm1756_vm9 = vcmp.gt.f32.partialorder %v1554_v32, 0.0  ;;  %v1884_v31 = vmul.f32 0.2, %v1554_v32  ;;  %v2011_v51 = vsel %vm1755_vm7, %v1551_v23, %v1883_v26  ;;  %v7781_v19 = vcombine.high %v3391_v15, %v3395_v41 }
 0x1d4   : > { %vm1754_vm10 = vcmp.gt.f32.partialorder %v1546_v39, 0.0  ;;  %v1882_v42 = vmul.f32 0.2, %v1546_v39  ;;  %v2009_v55 = vsel %vm1753_vm8, %v1543_v27, %v1881_v30  ;;  %3815 = vmatpush1.bf16.msra.mxu0 %v7786_v46 }
 0x1d5   : > { %v2012_v1 = vsel %vm1756_vm9, %v1554_v32, %v1884_v31  ;;  %3925 = vmatprep.subr.bf16.mxu1 %v7781_v19 }
 0x1d6   : > { %v2096_v61 = vpack.c.bf16 %v2012_v1, %v2011_v51  ;;  %v2010_v12 = vsel %vm1754_vm10, %v1546_v39, %v1882_v42  ;;  %3926 = vmatpush1.bf16.msra.mxu1 %v7780_v18  ;;  %v3418_v1 = vld [vmem:[%s11752_s5 + $0x160] sm:$0xff] }
 0x1d7   : > { %v2095_v57 = vpack.c.bf16 %v2010_v12, %v2009_v55 }
 0x1d9   : > { %8559 = vmatprep.mubr.msk.bf16.mxu1 %vm2140_vm6, %v2095_v57 }
 0x1da   : > { %8560 = vmatmul.mubr.msk.bf16.gmra.mrb[124].mxu1 %vm2140_vm6, %v2096_v61 }
 0x1db   : > { %8563 = vmatprep.mubr.msk.bf16.mxu1 %vm2140_vm6, %v2097_v37 }
 0x1e2   : > { %8564 = vmatmul.mubr.msk.bf16.gmra.mrb[128].mxu1 %vm2140_vm6, %v2098_v17  ;;  %v3410_v17 = vld [vmem:[%s11752_s5 + $0x120] sm:$0xff] }
 0x1e3   : > { %8567 = vmatprep.mubr.msk.bf16.mxu1 %vm2140_vm6, %v2099_v10  ;;  %v7794_v37 = vcombine.low %v3406_v13, %v3410_v17  ;;  %v7795_v45 = vcombine.high %v3406_v13, %v3410_v17  ;;  %v3403_v10 = vld [vmem:[%s11752_s5 + $0xe8] sm:$0xff] }
 0x1e5   : > { %v8461_v20 = vpop.f32.mrb[24].mxu1  ;;  %3816 = vmatprep.subr.bf16.mxu0 %v7795_v45 }
 0x1e6   : > { %v2367_v53 = vpop.f32.mrb[25].mxu1  ;;  %3817 = vmatpush1.bf16.msra.mxu0 %v7794_v37 }
 0x1e7   : > { %v8462_v60 = vpop.f32.mrb[26].mxu1  ;;  %v2368_v33 = vadd.f32 %v9897_v59, %v2367_v53 }
 0x1e8   : > { %v2370_v23 = vpop.f32.mrb[27].mxu1  ;;  %v2379_v44 = vadd.f32 %v8462_v60, %v9897_v59 }
 0x1e9   : > { %v3006_v58 = vmul.f32 0.2, %v2368_v33  ;;  %vm2878_vm12 = vcmp.gt.f32.partialorder %v2368_v33, 0.0 }
 0x1ea   : > { %8568 = vmatmul.mubr.msk.bf16.gmra.mrb[132].mxu1 %vm2140_vm6, %v2100_v8  ;;  %v3399_v8 = vld [vmem:[%s11752_s5 + $0xc8] sm:$0xff]  ;;  %v3009_v27 = vmul.f32 0.2, %v2379_v44  ;;  %vm2881_vm13 = vcmp.gt.f32.partialorder %v2379_v44, 0.0 }
 0x1eb   : > { %8571 = vmatprep.mubr.msk.bf16.mxu1 %vm2140_vm6, %v2101_v63  ;;  %v7788_v36 = vcombine.low %v3399_v8, %v3403_v10  ;;  %v7789_v52 = vcombine.high %v3399_v8, %v3403_v10  ;;  %v2376_v63 = vadd.f32 %v8461_v20, %v9897_v59  ;;  %v9934_v31 = vsel %vm2878_vm12, %v2368_v33, %v3006_v58 }
 0x1ec   : > { %v9936_v42 = vsel %vm2881_vm13, %v2379_v44, %v3009_v27 }
 0x1ed   : > { %v8465_v3 = vpop.f32.mrb[28].mxu1  ;;  %3927 = vmatprep.subr.bf16.mxu1 %v7789_v52  ;;  %vm2880_vm11 = vcmp.gt.f32.partialorder %v2376_v63, 0.0  ;;  %v3008_v0 = vmul.f32 0.2, %v2376_v63 }
 0x1ee   : > { %v2383_v9 = vpop.f32.mrb[29].mxu1  ;;  %3928 = vmatpush1.bf16.msra.mxu1 %v7788_v36  ;;  %v2392_v22 = vadd.f32 %v8465_v3, %v9897_v59 }
 0x1ef   : > { %v8466_v34 = vpop.f32.mrb[30].mxu1  ;;  %v2384_v26 = vadd.f32 %v9897_v59, %v2383_v9  ;;  %v9932_v39 = vsel %vm2880_vm11, %v2376_v63, %v3008_v0 }
 0x1f0   : > { %v2386_v49 = vpop.f32.mrb[31].mxu1  ;;  %v3012_v32 = vmul.f32 0.2, %v2392_v22  ;;  %v2395_v6 = vadd.f32 %v8466_v34, %v9897_v59  ;;  %vm2884_vm15 = vcmp.gt.f32.partialorder %v2392_v22, 0.0 }
 0x1f1   : > { %v2387_v30 = vadd.f32 %v9897_v59, %v2386_v49  ;;  %vm2882_vm0 = vcmp.gt.f32.partialorder %v2384_v26, 0.0  ;;  %v3010_v21 = vmul.f32 0.2, %v2384_v26 }
 0x1f2   : > { %8572 = vmatmul.mubr.msk.bf16.gmra.mrb[136].mxu1 %vm2140_vm6, %v2102_v56  ;;  %vm2885_vm1 = vcmp.gt.f32.partialorder %v2395_v6, 0.0  ;;  %v3013_v55 = vmul.f32 0.2, %v2395_v6 }
 0x1f3   : > { %8575 = vmatprep.mubr.msk.bf16.mxu1 %vm2140_vm6, %v2103_v48  ;;  %v2371_v48 = vadd.f32 %v9897_v59, %v2370_v23  ;;  %vm2883_vm2 = vcmp.gt.f32.partialorder %v2387_v30, 0.0  ;;  %v3011_v46 = vmul.f32 0.2, %v2387_v30  ;;  %v9966_v13 = vsel %vm2882_vm0, %v2384_v26, %v3010_v21 }
 0x1f4   : > { %v9975_v50 = vsel %vm2885_vm1, %v2395_v6, %v3013_v55 }
 0x1f5   : > { %v8469_v2 = vpop.f32.mrb[32].mxu1  ;;  %v3007_v28 = vmul.f32 0.2, %v2371_v48  ;;  %vm2879_vm14 = vcmp.gt.f32.partialorder %v2371_v48, 0.0 }
 0x1f6   : > { %v9882_v4 = vpop.f32.mrb[33].mxu1  ;;  %v2408_v57 = vadd.f32 %v8469_v2, %v9897_v59 }
 0x1f7   : > { %v9890_v24 = vpop.f32.mrb[34].mxu1  ;;  %v9938_v51 = vsel %vm2879_vm14, %v2371_v48, %v3007_v28  ;;  %v2400_v20 = vadd.f32 %v9897_v59, %v9882_v4 }
 0x1f8   : > { %v9892_v56 = vpop.f32.mrb[35].mxu1  ;;  %v2411_v17 = vadd.f32 %v9890_v24, %v9897_v59  ;;  %v3016_v2 = vmul.f32 0.2, %v2408_v57 }
 0x1f9   : > { %vm2886_vm8 = vcmp.gt.f32.partialorder %v2400_v20, 0.0  ;;  %v3014_v24 = vmul.f32 0.2, %v2400_v20  ;;  %v9989_v36 = vadd.f32 %v9897_v59, %v9892_v56 }
 0x1fa   : > { %8576 = vmatmul.mubr.msk.bf16.gmra.mrb[140].mxu1 %vm2140_vm6, %v2104_v40  ;;  %vm2889_vm9 = vcmp.gt.f32.partialorder %v2411_v17, 0.0 }
 0x1fb   : > { %8579 = vmatprep.mubr.msk.bf16.mxu1 %vm2140_vm6, %v2105_v38  ;;  %v10006_v21 = vsel %vm2886_vm8, %v2400_v20, %v3014_v24  ;;  %vm2887_vm14 = vcmp.gt.f32.partialorder %v9989_v36, 0.0  ;;  %v3015_v55 = vmul.f32 0.2, %v9989_v36 }
 0x1fd   : > { %v9911_v25 = vpop.f32.mrb[36].mxu1 }
 0x1fe   : > { %v9914_v35 = vpop.f32.mrb[37].mxu1  ;;  %v2424_v27 = vadd.f32 %v9911_v25, %v9897_v59 }
 0x1ff   : > { %v9916_v40 = vpop.f32.mrb[38].mxu1 }
 0x200   : > { %v9918_v38 = vpop.f32.mrb[39].mxu1 }
 0x202   : > { %8580 = vmatmul.mubr.msk.bf16.gmra.mrb[144].mxu1 %vm2140_vm6, %v2106_v47  ;;  %v9940_v47 = vsel %vm2884_vm15, %v2392_v22, %v3012_v32  ;;  %v3017_v22 = vmul.f32 0.2, %v2411_v17  ;;  %vm2892_vm15 = vcmp.gt.f32.partialorder %v2424_v27, 0.0 }
 0x203   : > { %8583 = vmatprep.mubr.msk.bf16.mxu1 %vm2140_vm6, %v2107_v11  ;;  %v3414_v11 = vld [vmem:[%s11752_s5 + $0x140] sm:$0xff] }
 0x204   : > { %v7802_v61 = vcombine.low %v3414_v11, %v3418_v1  ;;  %v7803_v12 = vcombine.high %v3414_v11, %v3418_v1  ;;  %v10019_v1 = vsel %vm2889_vm9, %v2411_v17, %v3017_v22 }
 0x205   : > { %v8477_v29 = vpop.f32.mrb[40].mxu1 }
 0x206   : > { %v2440_v43 = vadd.f32 %v8477_v29, %v9897_v59  ;;  %v2431_v7 = vpop.f32.mrb[41].mxu1  ;;  %3818 = vmatprep.subr.bf16.mxu0 %v7803_v12 }
 0x207   : > { %v2432_v54 = vadd.f32 %v9897_v59, %v2431_v7  ;;  %v8478_v5 = vpop.f32.mrb[42].mxu1  ;;  %3819 = vmatpush1.bf16.msra.mxu0 %v7802_v61 }
 0x208   : > { %vm2896_vm3 = vcmp.gt.f32.partialorder %v2440_v43, 0.0  ;;  %v3024_v14 = vmul.f32 0.2, %v2440_v43  ;;  %v2443_v15 = vadd.f32 %v8478_v5, %v9897_v59  ;;  %v2434_v41 = vpop.f32.mrb[43].mxu1 }
 0x209   : > { %vm2894_vm4 = vcmp.gt.f32.partialorder %v2432_v54, 0.0  ;;  %v3022_v18 = vmul.f32 0.2, %v2432_v54  ;;  %v2435_v19 = vadd.f32 %v9897_v59, %v2434_v41 }
 0x20a   : > { %v9955_v53 = vsel %vm2896_vm3, %v2440_v43, %v3024_v14  ;;  %vm2897_vm5 = vcmp.gt.f32.partialorder %v2443_v15, 0.0  ;;  %v3025_v60 = vmul.f32 0.2, %v2443_v15  ;;  %8584 = vmatmul.mubr.msk.bf16.gmra.mrb[148].mxu1 %vm2140_vm6, %v2108_v62  ;;  %v9978_v62 = vsel %vm2883_vm2, %v2387_v30, %v3011_v46  ;;  %v3407_v46 = vld [vmem:[%s11752_s5 + $0x108] sm:$0xff] }
 0x20b   : > { %v3276_v23 = vmax.f32 %v9932_v39, %v9955_v53  ;;  %v9963_v3 = vsel %vm2894_vm4, %v2432_v54, %v3022_v18  ;;  %vm2895_vm7 = vcmp.gt.f32.partialorder %v2435_v19, 0.0  ;;  %v3023_v9 = vmul.f32 0.2, %v2435_v19  ;;  %v3411_v14 = vld [vmem:[%s11752_s5 + $0x128] sm:$0xff] }
 0x20c   : > { %v3262_v34 = vmax.f32 %v9934_v31, %v9963_v3  ;;  %v9972_v16 = vsel %vm2897_vm5, %v2443_v15, %v3025_v60  ;;  %vm2888_vm6 = vcmp.gt.f32.partialorder %v2408_v57, 0.0  ;;  %v2416_v54 = vadd.f32 %v9897_v59, %v9914_v35 }
 0x20d   : > { %v3283_v37 = vmax.f32 %v9936_v42, %v9972_v16  ;;  %v9982_v45 = vsel %vm2895_vm7, %v2435_v19, %v3023_v9  ;;  %v8481_v49 = vpop.f32.mrb[44].mxu1  ;;  %v10003_v30 = vsel %vm2888_vm6, %v2408_v57, %v3016_v2  ;;  %v7796_v57 = vcombine.low %v3407_v46, %v3411_v14 }
 0x20e   : > { %v3269_v4 = vmax.f32 %v9938_v51, %v9982_v45  ;;  %v2456_v8 = vadd.f32 %v8481_v49, %v9897_v59  ;;  %v2447_v10 = vpop.f32.mrb[45].mxu1  ;;  %v7797_v35 = vcombine.high %v3407_v46, %v3411_v14  ;;  %v3020_v18 = vmul.f32 0.2, %v2424_v27 }
 0x20f   : > { %v2448_v52 = vadd.f32 %v9897_v59, %v2447_v10  ;;  %v8482_v63 = vpop.f32.mrb[46].mxu1  ;;  %v2427_v9 = vadd.f32 %v9916_v40, %v9897_v59  ;;  %v3018_v2 = vmul.f32 0.2, %v2416_v54  ;;  %vm2890_vm4 = vcmp.gt.f32.partialorder %v2416_v54, 0.0 }
 0x210   : > { %vm2900_vm10 = vcmp.gt.f32.partialorder %v2456_v8, 0.0  ;;  %v3028_v33 = vmul.f32 0.2, %v2456_v8  ;;  %v2459_v44 = vadd.f32 %v8482_v63, %v9897_v59  ;;  %v2450_v48 = vpop.f32.mrb[47].mxu1  ;;  %3929 = vmatprep.subr.bf16.mxu1 %v7797_v35  ;;  %v2419_v40 = vadd.f32 %v9897_v59, %v9918_v38 }
 0x211   : > { %vm2898_vm11 = vcmp.gt.f32.partialorder %v2448_v52, 0.0  ;;  %v3026_v0 = vmul.f32 0.2, %v2448_v52  ;;  %v2451_v58 = vadd.f32 %v9897_v59, %v2450_v48  ;;  %3930 = vmatpush1.bf16.msra.mxu1 %v7796_v57  ;;  %v10052_v48 = vsel %vm2887_vm14, %v9989_v36, %v3015_v55 }
 0x212   : > { %v9996_v28 = vsel %vm2900_vm10, %v2456_v8, %v3028_v33  ;;  %vm2901_vm12 = vcmp.gt.f32.partialorder %v2459_v44, 0.0  ;;  %v3029_v56 = vmul.f32 0.2, %v2459_v44  ;;  %vm2893_vm5 = vcmp.gt.f32.partialorder %v2427_v9, 0.0 }
 0x213   : > { %v3304_v26 = vmax.f32 %v9940_v47, %v9996_v28  ;;  %v10000_v32 = vsel %vm2898_vm11, %v2448_v52, %v3026_v0  ;;  %vm2899_vm13 = vcmp.gt.f32.partialorder %v2451_v58, 0.0  ;;  %v3027_v6 = vmul.f32 0.2, %v2451_v58 }
 0x214   : > { %v3290_v25 = vmax.f32 %v9966_v13, %v10000_v32  ;;  %v10010_v29 = vsel %vm2901_vm12, %v2459_v44, %v3029_v56  ;;  %v3021_v56 = vmul.f32 0.2, %v2427_v9  ;;  %vm2891_vm7 = vcmp.gt.f32.partialorder %v2419_v40, 0.0  ;;  %v3415_v13 = vld [vmem:[%s11752_s5 + $0x148] sm:$0xff] }
 0x215   : > { %v3311_v43 = vmax.f32 %v9975_v50, %v10010_v29  ;;  %v10016_v7 = vsel %vm2899_vm13, %v2451_v58, %v3027_v6  ;;  %v8485_v11 = vpop.f32.mrb[48].mxu1  ;;  %v3419_v50 = vld [vmem:[%s11752_s5 + $0x168] sm:$0xff] }
 0x216   : > { %v3297_v5 = vmax.f32 %v9978_v62, %v10016_v7  ;;  %v2472_v61 = vadd.f32 %v8485_v11, %v9897_v59  ;;  %v2463_v12 = vpop.f32.mrb[49].mxu1  ;;  %v7804_v29 = vcombine.low %v3415_v13, %v3419_v50 }
 0x217   : > { %v2464_v15 = vadd.f32 %v9897_v59, %v2463_v12  ;;  %v8486_v41 = vpop.f32.mrb[50].mxu1  ;;  %v10064_v12 = vsel %vm2890_vm4, %v2416_v54, %v3018_v2 }
 0x218   : > { %vm2904_vm0 = vcmp.gt.f32.partialorder %v2472_v61, 0.0  ;;  %v3032_v19 = vmul.f32 0.2, %v2472_v61  ;;  %v2475_v20 = vadd.f32 %v8486_v41, %v9897_v59  ;;  %v2466_v60 = vpop.f32.mrb[51].mxu1  ;;  %v3019_v41 = vmul.f32 0.2, %v2419_v40 }
 0x219   : > { %vm2902_vm1 = vcmp.gt.f32.partialorder %v2464_v15, 0.0  ;;  %v3030_v17 = vmul.f32 0.2, %v2464_v15  ;;  %v2467_v49 = vadd.f32 %v9897_v59, %v2466_v60 }
 0x21a   : > { %v10037_v8 = vsel %vm2904_vm0, %v2472_v61, %v3032_v19  ;;  %vm2905_vm2 = vcmp.gt.f32.partialorder %v2475_v20, 0.0  ;;  %v3033_v10 = vmul.f32 0.2, %v2475_v20  ;;  %v10062_v61 = vsel %vm2892_vm15, %v2424_v27, %v3020_v18 }
 0x21b   : > { %v3332_v24 = vmax.f32 %v10003_v30, %v10037_v8  ;;  %v10041_v52 = vsel %vm2902_vm1, %v2464_v15, %v3030_v17  ;;  %vm2903_vm3 = vcmp.gt.f32.partialorder %v2467_v49, 0.0  ;;  %v3031_v63 = vmul.f32 0.2, %v2467_v49  ;;  %v3422_v17 = vld [vmem:[%s11752_s5 + $0x180] sm:$0xff] }
 0x21c   : > { %v3318_v33 = vmax.f32 %v10006_v21, %v10041_v52  ;;  %v10047_v44 = vsel %vm2905_vm2, %v2475_v20, %v3033_v10  ;;  %v10069_v19 = vsel %vm2893_vm5, %v2427_v9, %v3021_v56  ;;  %v3426_v9 = vld [vmem:[%s11752_s5 + $0x1a0] sm:$0xff] }
 0x21d   : > { %v3339_v22 = vmax.f32 %v10019_v1, %v10047_v44  ;;  %v10056_v0 = vsel %vm2903_vm3, %v2467_v49, %v3031_v63  ;;  %v8489_v58 = vpop.f32.mrb[52].mxu1  ;;  %v7810_v10 = vcombine.low %v3422_v17, %v3426_v9  ;;  %v7811_v63 = vcombine.high %v3422_v17, %v3426_v9  ;;  %v3430_v30 = vld [vmem:[%s11752_s5 + $0x1c0] sm:$0xff] }
 0x21e   : > { %v3325_v38 = vmax.f32 %v10052_v48, %v10056_v0  ;;  %v2488_v6 = vadd.f32 %v8489_v58, %v9897_v59  ;;  %v2479_v11 = vpop.f32.mrb[53].mxu1  ;;  %v10088_v58 = vsel %vm2891_vm7, %v2419_v40, %v3019_v41  ;;  %v3434_v8 = vld [vmem:[%s11752_s5 + $0x1e0] sm:$0xff] }
 0x21f   : > { %v2480_v36 = vadd.f32 %v9897_v59, %v2479_v11  ;;  %v8490_v55 = vpop.f32.mrb[54].mxu1  ;;  %3820 = vmatprep.subr.bf16.mxu0 %v7811_v63  ;;  %v7818_v52 = vcombine.low %v3430_v30, %v3434_v8 }
 0x220   : > { %vm2908_vm6 = vcmp.gt.f32.partialorder %v2488_v6, 0.0  ;;  %v3036_v46 = vmul.f32 0.2, %v2488_v6  ;;  %v2491_v14 = vadd.f32 %v8490_v55, %v9897_v59  ;;  %v2482_v15 = vpop.f32.mrb[55].mxu1  ;;  %3821 = vmatpush1.bf16.msra.mxu0 %v7810_v10 }
 0x221   : > { %vm2906_vm8 = vcmp.gt.f32.partialorder %v2480_v36, 0.0  ;;  %v3034_v57 = vmul.f32 0.2, %v2480_v36  ;;  %v2483_v35 = vadd.f32 %v9897_v59, %v2482_v15 }
 0x222   : > { %v10071_v27 = vsel %vm2908_vm6, %v2488_v6, %v3036_v46  ;;  %vm2909_vm9 = vcmp.gt.f32.partialorder %v2491_v14, 0.0  ;;  %v3037_v54 = vmul.f32 0.2, %v2491_v14 }
 0x223   : > { %v3360_v18 = vmax.f32 %v10062_v61, %v10071_v27  ;;  %v10075_v20 = vsel %vm2906_vm8, %v2480_v36, %v3034_v57  ;;  %vm2907_vm10 = vcmp.gt.f32.partialorder %v2483_v35, 0.0  ;;  %v3035_v60 = vmul.f32 0.2, %v2483_v35 }
 0x224   : > { %v3346_v49 = vmax.f32 %v10064_v12, %v10075_v20  ;;  %v10085_v2 = vsel %vm2909_vm9, %v2491_v14, %v3037_v54 }
 0x225   : > { %v3367_v56 = vmax.f32 %v10069_v19, %v10085_v2  ;;  %v10092_v6 = vsel %vm2907_vm10, %v2483_v35, %v3035_v60  ;;  %v8493_v11 = vpop.f32.mrb[56].mxu1  ;;  %v3427_v19 = vld [vmem:[%s11752_s5 + $0x1a8] sm:$0xff] }
 0x226   : > { %v3353_v36 = vmax.f32 %v10088_v58, %v10092_v6  ;;  %v2504_v55 = vadd.f32 %v8493_v11, %v9897_v59  ;;  %v2495_v46 = vpop.f32.mrb[57].mxu1 }
 0x227   : > { %v2496_v14 = vadd.f32 %v9897_v59, %v2495_v46  ;;  %v8494_v15 = vpop.f32.mrb[58].mxu1 }
 0x228   : > { %vm2912_vm11 = vcmp.gt.f32.partialorder %v2504_v55, 0.0  ;;  %v3040_v40 = vmul.f32 0.2, %v2504_v55  ;;  %v2507_v41 = vadd.f32 %v8494_v15, %v9897_v59  ;;  %v2498_v57 = vpop.f32.mrb[59].mxu1 }
 0x229   : > { %vm2910_vm12 = vcmp.gt.f32.partialorder %v2496_v14, 0.0  ;;  %v3038_v35 = vmul.f32 0.2, %v2496_v14  ;;  %v2499_v54 = vadd.f32 %v9897_v59, %v2498_v57 }
 0x22a   : > { %v3168_v60 = vsel %vm2912_vm11, %v2504_v55, %v3040_v40  ;;  %vm2913_vm13 = vcmp.gt.f32.partialorder %v2507_v41, 0.0  ;;  %v3041_v17 = vmul.f32 0.2, %v2507_v41 }
 0x22b   : > { %v10103_v9 = vmax.f32 %v3276_v23, %v3168_v60  ;;  %v3166_v63 = vsel %vm2910_vm12, %v2496_v14, %v3038_v35  ;;  %vm2911_vm14 = vcmp.gt.f32.partialorder %v2499_v54, 0.0  ;;  %v3039_v10 = vmul.f32 0.2, %v2499_v54 }
 0x22c   : > { %v10108_v11 = vmax.f32 %v3262_v34, %v3166_v63  ;;  %v3169_v46 = vsel %vm2913_vm13, %v2507_v41, %v3041_v17 }
 0x22d   : > { %v10113_v55 = vmax.f32 %v3283_v37, %v3169_v46  ;;  %v3167_v15 = vsel %vm2911_vm14, %v2499_v54, %v3039_v10  ;;  %v8497_v40 = vpop.f32.mrb[60].mxu1 }
 0x22e   : > { %v10118_v39 = vmax.f32 %v3269_v4, %v3167_v15  ;;  %v2520_v53 = vadd.f32 %v8497_v40, %v9897_v59  ;;  %v2511_v23 = vpop.f32.mrb[61].mxu1 }
 0x22f   : > { %v2512_v31 = vadd.f32 %v9897_v59, %v2511_v23  ;;  %v8498_v3 = vpop.f32.mrb[62].mxu1 }
 0x230   : > { %vm2916_vm15 = vcmp.gt.f32.partialorder %v2520_v53, 0.0  ;;  %v3044_v34 = vmul.f32 0.2, %v2520_v53  ;;  %v2523_v14 = vadd.f32 %v8498_v3, %v9897_v59  ;;  %v2514_v42 = vpop.f32.mrb[63].mxu1 }
 0x231   : > { %vm2914_vm0 = vcmp.gt.f32.partialorder %v2512_v31, 0.0  ;;  %v3042_v16 = vmul.f32 0.2, %v2512_v31  ;;  %v2515_v37 = vadd.f32 %v9897_v59, %v2514_v42 }
 0x232   : > { %v3172_v41 = vsel %vm2916_vm15, %v2520_v53, %v3044_v34  ;;  %vm2917_vm1 = vcmp.gt.f32.partialorder %v2523_v14, 0.0  ;;  %v3045_v51 = vmul.f32 0.2, %v2523_v14 }
 0x233   : > { %v10127_v45 = vmax.f32 %v3304_v26, %v3172_v41  ;;  %v3170_v4 = vsel %vm2914_vm0, %v2512_v31, %v3042_v16  ;;  %vm2915_vm2 = vcmp.gt.f32.partialorder %v2515_v37, 0.0  ;;  %v3043_v57 = vmul.f32 0.2, %v2515_v37 }
 0x234   : > { %v10132_v35 = vmax.f32 %v3290_v25, %v3170_v4  ;;  %v3173_v54 = vsel %vm2917_vm1, %v2523_v14, %v3045_v51 }
 0x235   : > { %v10137_v60 = vmax.f32 %v3311_v43, %v3173_v54  ;;  %v3171_v17 = vsel %vm2915_vm2, %v2515_v37, %v3043_v57  ;;  %v8501_v63 = vpop.f32.mrb[64].mxu1  ;;  %v7805_v43 = vcombine.high %v3415_v13, %v3419_v50 }
 0x236   : > { %v10142_v47 = vmax.f32 %v3297_v5, %v3171_v17  ;;  %v2536_v28 = vadd.f32 %v8501_v63, %v9897_v59  ;;  %v2527_v26 = vpop.f32.mrb[65].mxu1 }
 0x237   : > { %v2528_v32 = vadd.f32 %v9897_v59, %v2527_v26  ;;  %v8502_v25 = vpop.f32.mrb[66].mxu1  ;;  %3931 = vmatprep.subr.bf16.mxu1 %v7805_v43 }
 0x238   : > { %vm2920_vm3 = vcmp.gt.f32.partialorder %v2536_v28, 0.0  ;;  %v3048_v62 = vmul.f32 0.2, %v2536_v28  ;;  %v2539_v7 = vadd.f32 %v8502_v25, %v9897_v59  ;;  %v2530_v5 = vpop.f32.mrb[67].mxu1  ;;  %3932 = vmatpush1.bf16.msra.mxu1 %v7804_v29 }
 0x239   : > { %vm2918_vm4 = vcmp.gt.f32.partialorder %v2528_v32, 0.0  ;;  %v3046_v10 = vmul.f32 0.2, %v2528_v32  ;;  %v2531_v46 = vadd.f32 %v9897_v59, %v2530_v5 }
 0x23a   : > { %v3176_v15 = vsel %vm2920_vm3, %v2536_v28, %v3048_v62  ;;  %vm2921_vm5 = vcmp.gt.f32.partialorder %v2539_v7, 0.0  ;;  %v3049_v40 = vmul.f32 0.2, %v2539_v7 }
 0x23b   : > { %v10157_v53 = vmax.f32 %v3332_v24, %v3176_v15  ;;  %v3174_v23 = vsel %vm2918_vm4, %v2528_v32, %v3046_v10  ;;  %vm2919_vm7 = vcmp.gt.f32.partialorder %v2531_v46, 0.0  ;;  %v3047_v31 = vmul.f32 0.2, %v2531_v46  ;;  %v3431_v10 = vld [vmem:[%s11752_s5 + $0x1c8] sm:$0xff] }
 0x23c   : > { %v10162_v3 = vmax.f32 %v3318_v33, %v3174_v23  ;;  %v3177_v34 = vsel %vm2921_vm5, %v2539_v7, %v3049_v40  ;;  %v7819_v33 = vcombine.high %v3430_v30, %v3434_v8 }
 0x23d   : > { %v10167_v14 = vmax.f32 %v3339_v22, %v3177_v34  ;;  %v3175_v42 = vsel %vm2919_vm7, %v2531_v46, %v3047_v31  ;;  %v8505_v16 = vpop.f32.mrb[68].mxu1  ;;  %v3435_v46 = vld [vmem:[%s11752_s5 + $0x1e8] sm:$0xff] }
 0x23e   : > { %v10178_v21 = vmax.f32 %v3325_v38, %v3175_v42  ;;  %v2552_v24 = vadd.f32 %v8505_v16, %v9897_v59  ;;  %v2543_v1 = vpop.f32.mrb[69].mxu1  ;;  %3822 = vmatprep.subr.bf16.mxu0 %v7819_v33  ;;  %v7821_v23 = vcombine.high %v3431_v10, %v3435_v46  ;;  %v7820_v16 = vcombine.low %v3431_v10, %v3435_v46 }
 0x23f   : > { %v2544_v44 = vadd.f32 %v9897_v59, %v2543_v1  ;;  %v8506_v22 = vpop.f32.mrb[70].mxu1  ;;  %3823 = vmatpush1.bf16.msra.mxu0 %v7818_v52 }
 0x240   : > { %vm2924_vm6 = vcmp.gt.f32.partialorder %v2552_v24, 0.0  ;;  %v3052_v37 = vmul.f32 0.2, %v2552_v24  ;;  %v2555_v41 = vadd.f32 %v8506_v22, %v9897_v59  ;;  %v2546_v51 = vpop.f32.mrb[71].mxu1 }
 0x241   : > { %vm2922_vm8 = vcmp.gt.f32.partialorder %v2544_v44, 0.0  ;;  %v3050_v4 = vmul.f32 0.2, %v2544_v44  ;;  %v2547_v48 = vadd.f32 %v9897_v59, %v2546_v51  ;;  %v11763_v51 = vmov 0  }
 0x242   : > { %v3180_v0 = vsel %vm2924_vm6, %v2552_v24, %v3052_v37  ;;  %vm2925_vm9 = vcmp.gt.f32.partialorder %v2555_v41, 0.0  ;;  %v3053_v38 = vmul.f32 0.2, %v2555_v41  ;;  %3840 = vmatprep.mubr.bf16.mxu0 %v11763_v51  ;;  %3953 = vmatprep.mubr.bf16.mxu1 %v11763_v51 }
 0x243   : > { %v10187_v57 = vmax.f32 %v3360_v18, %v3180_v0  ;;  %v3178_v54 = vsel %vm2922_vm8, %v2544_v44, %v3050_v4  ;;  %vm2923_vm10 = vcmp.gt.f32.partialorder %v2547_v48, 0.0  ;;  %v3051_v17 = vmul.f32 0.2, %v2547_v48 }
 0x244   : > { %v10192_v63 = vmax.f32 %v3346_v49, %v3178_v54  ;;  %v3181_v28 = vsel %vm2925_vm9, %v2555_v41, %v3053_v38  ;;  %v3423_v49 = vld [vmem:[%s11752_s5 + $0x188] sm:$0xff] }
 0x245   : > { %v10197_v26 = vmax.f32 %v3367_v56, %v3181_v28  ;;  %v3179_v13 = vsel %vm2923_vm10, %v2547_v48, %v3051_v17  ;;  %v8509_v50 = vpop.f32.mrb[72].mxu1  ;;  %v7813_v6 = vcombine.high %v3423_v49, %v3427_v19  ;;  %v7812_v25 = vcombine.low %v3423_v49, %v3427_v19 }
 0x246   : > { %v10202_v61 = vmax.f32 %v3353_v36, %v3179_v13  ;;  %v2568_v27 = vadd.f32 %v8509_v50, %v9897_v59  ;;  %v2559_v18 = vpop.f32.mrb[73].mxu1 }
 0x247   : > { %v2560_v12 = vadd.f32 %v9897_v59, %v2559_v18  ;;  %v8510_v20 = vpop.f32.mrb[74].mxu1  ;;  %3933 = vmatprep.subr.bf16.mxu1 %v7813_v6 }
 0x248   : > { %vm2928_vm11 = vcmp.gt.f32.partialorder %v2568_v27, 0.0  ;;  %v3056_v2 = vmul.f32 0.2, %v2568_v27  ;;  %v2571_v58 = vadd.f32 %v8510_v20, %v9897_v59  ;;  %v2562_v56 = vpop.f32.mrb[75].mxu1  ;;  %3934 = vmatpush1.bf16.msra.mxu1 %v7812_v25 }
 0x249   : > { %vm2926_vm12 = vcmp.gt.f32.partialorder %v2560_v12, 0.0  ;;  %v3054_v36 = vmul.f32 0.2, %v2560_v12  ;;  %v2563_v32 = vadd.f32 %v9897_v59, %v2562_v56  ;;  %3935 = vmatprep.subr.bf16.mxu1 %v7821_v23 }
 0x24a   : > { %v10214_v29 = vsel %vm2928_vm11, %v2568_v27, %v3056_v2  ;;  %vm2929_vm13 = vcmp.gt.f32.partialorder %v2571_v58, 0.0  ;;  %v3057_v43 = vmul.f32 0.2, %v2571_v58 }
 0x24b   : > { %v3278_v62 = vmax.f32 %v10103_v9, %v10214_v29  ;;  %v10218_v7 = vsel %vm2926_vm12, %v2560_v12, %v3054_v36  ;;  %vm2927_vm14 = vcmp.gt.f32.partialorder %v2563_v32, 0.0  ;;  %v3055_v5 = vmul.f32 0.2, %v2563_v32 }
 0x24c   : > { %v3264_v15 = vmax.f32 %v10108_v11, %v10218_v7  ;;  %v10228_v40 = vsel %vm2929_vm13, %v2571_v58, %v3057_v43  ;;  %3936 = vmatpush1.bf16.msra.mxu1 %v7820_v16 }
 0x24d   : > { %v3285_v31 = vmax.f32 %v10113_v55, %v10228_v40  ;;  %v10232_v34 = vsel %vm2927_vm14, %v2563_v32, %v3055_v5  ;;  %v8513_v42 = vpop.f32.mrb[76].mxu1  ;;  %v10332_v55 = vld [vmem:[%s11752_s5 + $0x30] sm:$0xff] }
 0x24e   : > { %v3271_v30 = vmax.f32 %v10118_v39, %v10232_v34  ;;  %v2584_v8 = vadd.f32 %v8513_v42, %v9897_v59  ;;  %v2575_v24 = vpop.f32.mrb[77].mxu1  ;;  %v10337_v39 = vld [vmem:[%s11752_s5 + $0x18] sm:$0xff] }
 0x24f   : > { %v2576_v1 = vadd.f32 %v9897_v59, %v2575_v24  ;;  %v8514_v52 = vpop.f32.mrb[78].mxu1 }
 0x250   : > { %vm2932_vm15 = vcmp.gt.f32.partialorder %v2584_v8, 0.0  ;;  %v3060_v33 = vmul.f32 0.2, %v2584_v8  ;;  %v2587_v44 = vadd.f32 %v8514_v52, %v9897_v59  ;;  %v2578_v22 = vpop.f32.mrb[79].mxu1 }
 0x251   : > { %vm2930_vm0 = vcmp.gt.f32.partialorder %v2576_v1, 0.0  ;;  %v3058_v37 = vmul.f32 0.2, %v2576_v1  ;;  %v2579_v41 = vadd.f32 %v9897_v59, %v2578_v22 }
 0x252   : > { %v10242_v4 = vsel %vm2932_vm15, %v2584_v8, %v3060_v33  ;;  %vm2933_vm1 = vcmp.gt.f32.partialorder %v2587_v44, 0.0  ;;  %v3061_v48 = vmul.f32 0.2, %v2587_v44 }
 0x253   : > { %v3306_v0 = vmax.f32 %v10127_v45, %v10242_v4  ;;  %v10246_v38 = vsel %vm2930_vm0, %v2576_v1, %v3058_v37  ;;  %vm2931_vm2 = vcmp.gt.f32.partialorder %v2579_v41, 0.0  ;;  %v3059_v54 = vmul.f32 0.2, %v2579_v41 }
 0x254   : > { %v3292_v17 = vmax.f32 %v10132_v35, %v10246_v38  ;;  %v10250_v28 = vsel %vm2933_vm1, %v2587_v44, %v3061_v48 }
 0x255   : > { %v3313_v13 = vmax.f32 %v10137_v60, %v10250_v28  ;;  %v10254_v50 = vsel %vm2931_vm2, %v2579_v41, %v3059_v54  ;;  %v8517_v27 = vpop.f32.mrb[80].mxu1 }
 0x256   : > { %v3299_v18 = vmax.f32 %v10142_v47, %v10254_v50  ;;  %v2600_v12 = vadd.f32 %v8517_v27, %v9897_v59  ;;  %v2591_v20 = vpop.f32.mrb[81].mxu1 }
 0x257   : > { %v2592_v49 = vadd.f32 %v9897_v59, %v2591_v20  ;;  %v8518_v19 = vpop.f32.mrb[82].mxu1 }
 0x258   : > { %vm2936_vm3 = vcmp.gt.f32.partialorder %v2600_v12, 0.0  ;;  %v3064_v2 = vmul.f32 0.2, %v2600_v12  ;;  %v2603_v58 = vadd.f32 %v8518_v19, %v9897_v59  ;;  %v2594_v56 = vpop.f32.mrb[83].mxu1 }
 0x259   : > { %vm2934_vm4 = vcmp.gt.f32.partialorder %v2592_v49, 0.0  ;;  %v3062_v6 = vmul.f32 0.2, %v2592_v49  ;;  %v2595_v36 = vadd.f32 %v9897_v59, %v2594_v56 }
 0x25a   : > { %v10262_v32 = vsel %vm2936_vm3, %v2600_v12, %v3064_v2  ;;  %vm2937_vm5 = vcmp.gt.f32.partialorder %v2603_v58, 0.0  ;;  %v3065_v25 = vmul.f32 0.2, %v2603_v58 }
 0x25b   : > { %v3334_v43 = vmax.f32 %v10157_v53, %v10262_v32  ;;  %v10266_v5 = vsel %vm2934_vm4, %v2592_v49, %v3062_v6  ;;  %vm2935_vm7 = vcmp.gt.f32.partialorder %v2595_v36, 0.0  ;;  %v3063_v10 = vmul.f32 0.2, %v2595_v36 }
 0x25c   : > { %v3320_v46 = vmax.f32 %v10162_v3, %v10266_v5  ;;  %v10270_v23 = vsel %vm2937_vm5, %v2603_v58, %v3065_v25 }
 0x25d   : > { %v3341_v42 = vmax.f32 %v10167_v14, %v10270_v23  ;;  %v10274_v16 = vsel %vm2935_vm7, %v2595_v36, %v3063_v10  ;;  %v8521_v8 = vpop.f32.mrb[84].mxu1 }
 0x25e   : > { %v3327_v24 = vmax.f32 %v10178_v21, %v10274_v16  ;;  %v2616_v1 = vadd.f32 %v8521_v8, %v9897_v59  ;;  %v2607_v52 = vpop.f32.mrb[85].mxu1 }
 0x25f   : > { %v2608_v33 = vadd.f32 %v9897_v59, %v2607_v52  ;;  %v8522_v44 = vpop.f32.mrb[86].mxu1 }
 0x260   : > { %vm2940_vm6 = vcmp.gt.f32.partialorder %v2616_v1, 0.0  ;;  %v3068_v22 = vmul.f32 0.2, %v2616_v1  ;;  %v2619_v37 = vadd.f32 %v8522_v44, %v9897_v59  ;;  %v2610_v41 = vpop.f32.mrb[87].mxu1 }
 0x261   : > { %vm2938_vm8 = vcmp.gt.f32.partialorder %v2608_v33, 0.0  ;;  %v3066_v48 = vmul.f32 0.2, %v2608_v33  ;;  %v2611_v54 = vadd.f32 %v9897_v59, %v2610_v41 }
 0x262   : > { %v10282_v27 = vsel %vm2940_vm6, %v2616_v1, %v3068_v22  ;;  %vm2941_vm9 = vcmp.gt.f32.partialorder %v2619_v37, 0.0  ;;  %v3069_v12 = vmul.f32 0.2, %v2619_v37 }
 0x263   : > { %v3362_v20 = vmax.f32 %v10187_v57, %v10282_v27  ;;  %v10286_v49 = vsel %vm2938_vm8, %v2608_v33, %v3066_v48  ;;  %vm2939_vm10 = vcmp.gt.f32.partialorder %v2611_v54, 0.0  ;;  %v3067_v19 = vmul.f32 0.2, %v2611_v54  ;;  %v10425_v27 = vld [vmem:[%s11751_s4] ss:$0 sm:$0xff] }
 0x264   : > { %v3348_v2 = vmax.f32 %v10192_v63, %v10286_v49  ;;  %v10290_v58 = vsel %vm2941_vm9, %v2619_v37, %v3069_v12 }
 0x265   : > { %v3369_v56 = vmax.f32 %v10197_v26, %v10290_v58  ;;  %v10294_v6 = vsel %vm2939_vm10, %v2611_v54, %v3067_v19  ;;  %v8525_v36 = vpop.f32.mrb[88].mxu1 }
 0x266   : > { %v3355_v25 = vmax.f32 %v10202_v61, %v10294_v6  ;;  %v2632_v10 = vadd.f32 %v8525_v36, %v9897_v59  ;;  %v2623_v8 = vpop.f32.mrb[89].mxu1 }
 0x267   : > { %v2624_v1 = vadd.f32 %v9897_v59, %v2623_v8  ;;  %v8526_v52 = vpop.f32.mrb[90].mxu1 }
 0x268   : > { %vm2944_vm11 = vcmp.gt.f32.partialorder %v2632_v10, 0.0  ;;  %v3072_v33 = vmul.f32 0.2, %v2632_v10  ;;  %v2635_v44 = vadd.f32 %v8526_v52, %v9897_v59  ;;  %v2626_v22 = vpop.f32.mrb[91].mxu1 }
 0x269   : > { %vm2942_vm12 = vcmp.gt.f32.partialorder %v2624_v1, 0.0  ;;  %v3070_v37 = vmul.f32 0.2, %v2624_v1  ;;  %v2627_v41 = vadd.f32 %v9897_v59, %v2626_v22 }
 0x26a   : > { %v3200_v48 = vsel %vm2944_vm11, %v2632_v10, %v3072_v33  ;;  %vm2945_vm13 = vcmp.gt.f32.partialorder %v2635_v44, 0.0  ;;  %v3073_v54 = vmul.f32 0.2, %v2635_v44 }
 0x26b   : > { %v10305_v12 = vmax.f32 %v3278_v62, %v3200_v48  ;;  %v3198_v19 = vsel %vm2942_vm12, %v2624_v1, %v3070_v37  ;;  %vm2943_vm14 = vcmp.gt.f32.partialorder %v2627_v41, 0.0  ;;  %v3071_v36 = vmul.f32 0.2, %v2627_v41  ;;  %v10345_v1 = vld [vmem:[%s11752_s5 + $0x38] sm:$0xff] }
 0x26c   : > { %v10310_v8 = vmax.f32 %v3264_v15, %v3198_v19  ;;  %v3201_v52 = vsel %vm2945_vm13, %v2635_v44, %v3073_v54  ;;  %v10327_v15 = vld [vmem:[%s11752_s5 + $0x10] sm:$0xff] }
 0x26d   : > { %v10315_v10 = vmax.f32 %v3285_v31, %v3201_v52  ;;  %v3199_v33 = vsel %vm2943_vm14, %v2627_v41, %v3071_v36  ;;  %v8529_v22 = vpop.f32.mrb[92].mxu1 }
 0x26e   : > { %v10320_v9 = vmax.f32 %v3271_v30, %v3199_v33  ;;  %v2648_v29 = vadd.f32 %v8529_v22, %v9897_v59  ;;  %v2639_v62 = vpop.f32.mrb[93].mxu1  ;;  %v7767_v30 = vcombine.high %v10327_v15, %v10332_v55 }
 0x26f   : > { %v2640_v11 = vadd.f32 %v9897_v59, %v2639_v62  ;;  %v8530_v7 = vpop.f32.mrb[94].mxu1  ;;  %v7769_v62 = vcombine.high %v10337_v39, %v10345_v1 }
 0x270   : > { %vm2948_vm15 = vcmp.gt.f32.partialorder %v2648_v29, 0.0  ;;  %v3076_v40 = vmul.f32 0.2, %v2648_v29  ;;  %v2651_v31 = vadd.f32 %v8530_v7, %v9897_v59  ;;  %v2642_v34 = vpop.f32.mrb[95].mxu1  ;;  %4034 = vmatprep.subr.bf16.mxu0 %v7767_v30 }
 0x271   : > { %vm2946_vm0 = vcmp.gt.f32.partialorder %v2640_v11, 0.0  ;;  %v3074_v44 = vmul.f32 0.2, %v2640_v11  ;;  %v2643_v37 = vadd.f32 %v9897_v59, %v2642_v34  ;;  %4147 = vmatprep.subr.bf16.mxu1 %v7769_v62 }
 0x272   : > { %v3204_v48 = vsel %vm2948_vm15, %v2648_v29, %v3076_v40  ;;  %vm2949_vm1 = vcmp.gt.f32.partialorder %v2651_v31, 0.0  ;;  %v3077_v54 = vmul.f32 0.2, %v2651_v31 }
 0x273   : > { %v10355_v36 = vmax.f32 %v3306_v0, %v3204_v48  ;;  %v3202_v52 = vsel %vm2946_vm0, %v2640_v11, %v3074_v44  ;;  %vm2947_vm2 = vcmp.gt.f32.partialorder %v2643_v37, 0.0  ;;  %v3075_v33 = vmul.f32 0.2, %v2643_v37 }
 0x274   : > { %v10360_v22 = vmax.f32 %v3292_v17, %v3202_v52  ;;  %v3205_v29 = vsel %vm2949_vm1, %v2651_v31, %v3077_v54 }
 0x275   : > { %v10367_v7 = vmax.f32 %v3313_v13, %v3205_v29  ;;  %v3203_v45 = vsel %vm2947_vm2, %v2643_v37, %v3075_v33  ;;  %v8533_v4 = vpop.f32.mrb[96].mxu1 }
 0x276   : > { %v10372_v0 = vmax.f32 %v3299_v18, %v3203_v45  ;;  %v2664_v35 = vadd.f32 %v8533_v4, %v9897_v59  ;;  %v2655_v38 = vpop.f32.mrb[97].mxu1 }
 0x277   : > { %v2656_v17 = vadd.f32 %v9897_v59, %v2655_v38  ;;  %v8534_v11 = vpop.f32.mrb[98].mxu1 }
 0x278   : > { %vm2952_vm3 = vcmp.gt.f32.partialorder %v2664_v35, 0.0  ;;  %v3080_v40 = vmul.f32 0.2, %v2664_v35  ;;  %v2667_v60 = vadd.f32 %v8534_v11, %v9897_v59  ;;  %v2658_v28 = vpop.f32.mrb[99].mxu1 }
 0x279   : > { %vm2950_vm4 = vcmp.gt.f32.partialorder %v2656_v17, 0.0  ;;  %v3078_v13 = vmul.f32 0.2, %v2656_v17  ;;  %v2659_v31 = vadd.f32 %v9897_v59, %v2658_v28 }
 0x27a   : > { %v3208_v34 = vsel %vm2952_vm3, %v2664_v35, %v3080_v40  ;;  %vm2953_vm5 = vcmp.gt.f32.partialorder %v2667_v60, 0.0  ;;  %v3081_v47 = vmul.f32 0.2, %v2667_v60 }
 0x27b   : > { %v10381_v50 = vmax.f32 %v3334_v43, %v3208_v34  ;;  %v3206_v18 = vsel %vm2950_vm4, %v2656_v17, %v3078_v13  ;;  %vm2951_vm7 = vcmp.gt.f32.partialorder %v2659_v31, 0.0  ;;  %v3079_v30 = vmul.f32 0.2, %v2659_v31 }
 0x27c   : > { %v10386_v44 = vmax.f32 %v3320_v46, %v3206_v18  ;;  %v3209_v37 = vsel %vm2953_vm5, %v2667_v60, %v3081_v47 }
 0x27d   : > { %v10391_v48 = vmax.f32 %v3341_v42, %v3209_v37  ;;  %v3207_v54 = vsel %vm2951_vm7, %v2659_v31, %v3079_v30  ;;  %v8537_v52 = vpop.f32.mrb[100].mxu1 }
 0x27e   : > { %v10396_v53 = vmax.f32 %v3327_v24, %v3207_v54  ;;  %v2680_v32 = vadd.f32 %v8537_v52, %v9897_v59  ;;  %v2671_v43 = vpop.f32.mrb[101].mxu1 }
 0x27f   : > { %v2672_v3 = vadd.f32 %v9897_v59, %v2671_v43  ;;  %v8538_v5 = vpop.f32.mrb[102].mxu1 }
 0x280   : > { %vm2956_vm6 = vcmp.gt.f32.partialorder %v2680_v32, 0.0  ;;  %v3084_v46 = vmul.f32 0.2, %v2680_v32  ;;  %v2683_v33 = vadd.f32 %v8538_v5, %v9897_v59  ;;  %v2674_v14 = vpop.f32.mrb[103].mxu1 }
 0x281   : > { %vm2954_vm8 = vcmp.gt.f32.partialorder %v2672_v3, 0.0  ;;  %v3082_v23 = vmul.f32 0.2, %v2672_v3  ;;  %v2675_v42 = vadd.f32 %v9897_v59, %v2674_v14 }
 0x282   : > { %v3212_v29 = vsel %vm2956_vm6, %v2680_v32, %v3084_v46  ;;  %vm2957_vm9 = vcmp.gt.f32.partialorder %v2683_v33, 0.0  ;;  %v3085_v21 = vmul.f32 0.2, %v2683_v33 }
 0x283   : > { %v10405_v16 = vmax.f32 %v3362_v20, %v3212_v29  ;;  %v3210_v24 = vsel %vm2954_vm8, %v2672_v3, %v3082_v23  ;;  %vm2955_vm10 = vcmp.gt.f32.partialorder %v2675_v42, 0.0  ;;  %v3083_v62 = vmul.f32 0.2, %v2675_v42 }
 0x284   : > { %v10410_v45 = vmax.f32 %v3348_v2, %v3210_v24  ;;  %v3213_v4 = vsel %vm2957_vm9, %v2683_v33, %v3085_v21 }
 0x285   : > { %v10415_v59 = vmax.f32 %v3369_v56, %v3213_v4  ;;  %v3211_v35 = vsel %vm2955_vm10, %v2675_v42, %v3083_v62  ;;  %v8541_v38 = vpop.f32.mrb[104].mxu1 }
 0x286   : > { %v10420_v57 = vmax.f32 %v3355_v25, %v3211_v35  ;;  %v2696_v63 = vadd.f32 %v10425_v27, %v8541_v38  ;;  %v2687_v20 = vpop.f32.mrb[105].mxu1 }
 0x287   : > { %v2688_v49 = vadd.f32 %v10425_v27, %v2687_v20  ;;  %v8542_v26 = vpop.f32.mrb[106].mxu1 }
 0x288   : > { %vm2960_vm11 = vcmp.gt.f32.partialorder %v2696_v63, 0.0  ;;  %v3088_v2 = vmul.f32 0.2, %v2696_v63  ;;  %v2699_v58 = vadd.f32 %v10425_v27, %v8542_v26  ;;  %v2690_v56 = vpop.f32.mrb[107].mxu1 }
 0x289   : > { %vm2958_vm12 = vcmp.gt.f32.partialorder %v2688_v49, 0.0  ;;  %v3086_v61 = vmul.f32 0.2, %v2688_v49  ;;  %v2691_v6 = vadd.f32 %v10425_v27, %v2690_v56 }
 0x28a   : > { %v10431_v25 = vsel %vm2960_vm11, %v2696_v63, %v3088_v2  ;;  %vm2961_vm13 = vcmp.gt.f32.partialorder %v2699_v58, 0.0  ;;  %v3089_v17 = vmul.f32 0.2, %v2699_v58 }
 0x28b   : > { %v3280_v11 = vmax.f32 %v10305_v12, %v10431_v25  ;;  %v10435_v40 = vsel %vm2958_vm12, %v2688_v49, %v3086_v61  ;;  %vm2959_vm14 = vcmp.gt.f32.partialorder %v2691_v6, 0.0  ;;  %v3087_v60 = vmul.f32 0.2, %v2691_v6 }
 0x28c   : > { %v3266_v28 = vmax.f32 %v10310_v8, %v10435_v40  ;;  %v10439_v13 = vsel %vm2961_vm13, %v2699_v58, %v3089_v17 }
 0x28d   : > { %v3287_v31 = vmax.f32 %v10315_v10, %v10439_v13  ;;  %v10443_v34 = vsel %vm2959_vm14, %v2691_v6, %v3087_v60  ;;  %v8545_v47 = vpop.f32.mrb[108].mxu1 }
 0x28e   : > { %v3273_v18 = vmax.f32 %v10320_v9, %v10443_v34  ;;  %v2712_v30 = vadd.f32 %v10425_v27, %v8545_v47  ;;  %v2703_v37 = vpop.f32.mrb[109].mxu1 }
 0x28f   : > { %v2704_v54 = vadd.f32 %v10425_v27, %v2703_v37  ;;  %v8546_v52 = vpop.f32.mrb[110].mxu1 }
 0x290   : > { %vm2964_vm15 = vcmp.gt.f32.partialorder %v2712_v30, 0.0  ;;  %v3092_v32 = vmul.f32 0.2, %v2712_v30  ;;  %v2715_v43 = vadd.f32 %v10425_v27, %v8546_v52  ;;  %v2706_v3 = vpop.f32.mrb[111].mxu1 }
 0x291   : > { %vm2962_vm0 = vcmp.gt.f32.partialorder %v2704_v54, 0.0  ;;  %v3090_v5 = vmul.f32 0.2, %v2704_v54  ;;  %v2707_v46 = vadd.f32 %v10425_v27, %v2706_v3 }
 0x292   : > { %v10451_v33 = vsel %vm2964_vm15, %v2712_v30, %v3092_v32  ;;  %vm2965_vm1 = vcmp.gt.f32.partialorder %v2715_v43, 0.0  ;;  %v3093_v14 = vmul.f32 0.2, %v2715_v43 }
 0x293   : > { %v3308_v23 = vmax.f32 %v10355_v36, %v10451_v33  ;;  %v10455_v42 = vsel %vm2962_vm0, %v2704_v54, %v3090_v5  ;;  %vm2963_vm2 = vcmp.gt.f32.partialorder %v2707_v46, 0.0  ;;  %v3091_v29 = vmul.f32 0.2, %v2707_v46 }
 0x294   : > { %v3294_v21 = vmax.f32 %v10360_v22, %v10455_v42  ;;  %v10459_v24 = vsel %vm2965_vm1, %v2715_v43, %v3093_v14 }
 0x295   : > { %v3315_v62 = vmax.f32 %v10367_v7, %v10459_v24  ;;  %v10463_v4 = vsel %vm2963_vm2, %v2707_v46, %v3091_v29  ;;  %v8549_v35 = vpop.f32.mrb[112].mxu1 }
 0x296   : > { %v3301_v38 = vmax.f32 %v10372_v0, %v10463_v4  ;;  %v2728_v63 = vadd.f32 %v10425_v27, %v8549_v35  ;;  %v2719_v20 = vpop.f32.mrb[113].mxu1 }
 0x297   : > { %v2720_v49 = vadd.f32 %v10425_v27, %v2719_v20  ;;  %v8550_v26 = vpop.f32.mrb[114].mxu1 }
 0x298   : > { %vm2968_vm3 = vcmp.gt.f32.partialorder %v2728_v63, 0.0  ;;  %v3096_v2 = vmul.f32 0.2, %v2728_v63  ;;  %v2731_v58 = vadd.f32 %v10425_v27, %v8550_v26  ;;  %v2722_v56 = vpop.f32.mrb[115].mxu1 }
 0x299   : > { %vm2966_vm4 = vcmp.gt.f32.partialorder %v2720_v49, 0.0  ;;  %v3094_v61 = vmul.f32 0.2, %v2720_v49  ;;  %v2723_v6 = vadd.f32 %v10425_v27, %v2722_v56 }
 0x29a   : > { %v10471_v17 = vsel %vm2968_vm3, %v2728_v63, %v3096_v2  ;;  %vm2969_vm5 = vcmp.gt.f32.partialorder %v2731_v58, 0.0  ;;  %v3097_v60 = vmul.f32 0.2, %v2731_v58 }
 0x29b   : > { %v3336_v47 = vmax.f32 %v10381_v50, %v10471_v17  ;;  %v10475_v30 = vsel %vm2966_vm4, %v2720_v49, %v3094_v61  ;;  %vm2967_vm7 = vcmp.gt.f32.partialorder %v2723_v6, 0.0  ;;  %v3095_v37 = vmul.f32 0.2, %v2723_v6 }
 0x29c   : > { %v3322_v54 = vmax.f32 %v10386_v44, %v10475_v30  ;;  %v10479_v52 = vsel %vm2969_vm5, %v2731_v58, %v3097_v60 }
 0x29d   : > { %v3343_v32 = vmax.f32 %v10391_v48, %v10479_v52  ;;  %v10483_v43 = vsel %vm2967_vm7, %v2723_v6, %v3095_v37  ;;  %v8553_v3 = vpop.f32.mrb[116].mxu1 }
 0x29e   : > { %v3329_v5 = vmax.f32 %v10396_v53, %v10483_v43  ;;  %v2744_v46 = vadd.f32 %v10425_v27, %v8553_v3  ;;  %v2735_v14 = vpop.f32.mrb[117].mxu1 }
 0x29f   : > { %v2736_v29 = vadd.f32 %v10425_v27, %v2735_v14  ;;  %v8554_v35 = vpop.f32.mrb[118].mxu1 }
 0x2a0   : > { %vm2972_vm6 = vcmp.gt.f32.partialorder %v2744_v46, 0.0  ;;  %v3100_v63 = vmul.f32 0.2, %v2744_v46  ;;  %v2747_v20 = vadd.f32 %v10425_v27, %v8554_v35  ;;  %v2738_v49 = vpop.f32.mrb[119].mxu1 }
 0x2a1   : > { %vm2970_vm8 = vcmp.gt.f32.partialorder %v2736_v29, 0.0  ;;  %v3098_v26 = vmul.f32 0.2, %v2736_v29  ;;  %v2739_v2 = vadd.f32 %v10425_v27, %v2738_v49 }
 0x2a2   : > { %v10491_v58 = vsel %vm2972_vm6, %v2744_v46, %v3100_v63  ;;  %vm2973_vm9 = vcmp.gt.f32.partialorder %v2747_v20, 0.0  ;;  %v3101_v56 = vmul.f32 0.2, %v2747_v20 }
 0x2a3   : > { %v3364_v61 = vmax.f32 %v10405_v16, %v10491_v58  ;;  %v10495_v6 = vsel %vm2970_vm8, %v2736_v29, %v3098_v26  ;;  %vm2971_vm10 = vcmp.gt.f32.partialorder %v2739_v2, 0.0  ;;  %v3099_v60 = vmul.f32 0.2, %v2739_v2 }
 0x2a4   : > { %v10499_v3 = vsel %vm2973_vm9, %v2747_v20, %v3101_v56 }
 0x2a5   : > { %v10503_v35 = vsel %vm2971_vm10, %v2739_v2, %v3099_v60  ;;  %v8557_v46 = vpop.f32.mrb[120].mxu1 }
 0x2a6   : > { %v2760_v49 = vadd.f32 %v10425_v27, %v8557_v46  ;;  %v2751_v29 = vpop.f32.mrb[121].mxu1  ;;  %v11780_v16 = vmax.f32 %v10420_v57, %v10503_v35 }
 0x2a7   : > { %v2752_v26 = vadd.f32 %v10425_v27, %v2751_v29  ;;  %v8558_v19 = vpop.f32.mrb[122].mxu1 }
 0x2a8   : > { %vm2976_vm11 = vcmp.gt.f32.partialorder %v2760_v49, 0.0  ;;  %v3104_v41 = vmul.f32 0.2, %v2760_v49  ;;  %v2763_v20 = vadd.f32 %v10425_v27, %v8558_v19  ;;  %v2754_v56 = vpop.f32.mrb[123].mxu1 }
 0x2a9   : > { %vm2974_vm12 = vcmp.gt.f32.partialorder %v2752_v26, 0.0  ;;  %v3102_v51 = vmul.f32 0.2, %v2752_v26  ;;  %v2755_v2 = vadd.f32 %v10425_v27, %v2754_v56 }
 0x2aa   : > { %v3232_v60 = vsel %vm2976_vm11, %v2760_v49, %v3104_v41  ;;  %vm2977_vm13 = vcmp.gt.f32.partialorder %v2763_v20, 0.0  ;;  %v3105_v14 = vmul.f32 0.2, %v2763_v20 }
 0x2ab   : > { %v10514_v46 = vmax.f32 %v3280_v11, %v3232_v60  ;;  %v3230_v63 = vsel %vm2974_vm12, %v2752_v26, %v3102_v51  ;;  %vm2975_vm14 = vcmp.gt.f32.partialorder %v2755_v2, 0.0  ;;  %v3103_v29 = vmul.f32 0.2, %v2755_v2 }
 0x2ac   : > { %v10519_v19 = vmax.f32 %v3266_v28, %v3230_v63  ;;  %v3233_v37 = vsel %vm2977_vm13, %v2763_v20, %v3105_v14 }
 0x2ad   : > { %v10524_v41 = vmax.f32 %v3287_v31, %v3233_v37  ;;  %v3231_v49 = vsel %vm2975_vm14, %v2755_v2, %v3103_v29  ;;  %v8561_v56 = vpop.f32.mrb[124].mxu1 }
 0x2ae   : > { %v10529_v12 = vmax.f32 %v3273_v18, %v3231_v49  ;;  %v2776_v51 = vadd.f32 %v10425_v27, %v8561_v56  ;;  %v2767_v25 = vpop.f32.mrb[125].mxu1 }
 0x2af   : > { %v2768_v8 = vadd.f32 %v10425_v27, %v2767_v25  ;;  %v8562_v11 = vpop.f32.mrb[126].mxu1 }
 0x2b0   : > { %vm2980_vm15 = vcmp.gt.f32.partialorder %v2776_v51, 0.0  ;;  %v3108_v40 = vmul.f32 0.2, %v2776_v51  ;;  %v2779_v28 = vadd.f32 %v10425_v27, %v8562_v11  ;;  %v2770_v10 = vpop.f32.mrb[127].mxu1 }
 0x2b1   : > { %vm2978_vm0 = vcmp.gt.f32.partialorder %v2768_v8, 0.0  ;;  %v3106_v13 = vmul.f32 0.2, %v2768_v8  ;;  %v2771_v31 = vadd.f32 %v10425_v27, %v2770_v10 }
 0x2b2   : > { %v3236_v37 = vsel %vm2980_vm15, %v2776_v51, %v3108_v40  ;;  %vm2981_vm1 = vcmp.gt.f32.partialorder %v2779_v28, 0.0  ;;  %v3109_v9 = vmul.f32 0.2, %v2779_v28 }
 0x2b3   : > { %v10538_v34 = vmax.f32 %v3308_v23, %v3236_v37  ;;  %v3234_v18 = vsel %vm2978_vm0, %v2768_v8, %v3106_v13  ;;  %vm2979_vm2 = vcmp.gt.f32.partialorder %v2771_v31, 0.0  ;;  %v3107_v14 = vmul.f32 0.2, %v2771_v31 }
 0x2b4   : > { %v10543_v63 = vmax.f32 %v3294_v21, %v3234_v18  ;;  %v3237_v26 = vsel %vm2981_vm1, %v2779_v28, %v3109_v9  ;;  %v11779_v18 = vmax.f32 %v10415_v59, %v10499_v3 }
 0x2b5   : > { %v10548_v20 = vmax.f32 %v3315_v62, %v3237_v26  ;;  %v3235_v2 = vsel %vm2979_vm2, %v2771_v31, %v3107_v14  ;;  %v8565_v60 = vpop.f32.mrb[128].mxu1  ;;  %v11778_v31 = vmax.f32 %v10410_v45, %v10495_v6 }
 0x2b6   : > { %v10553_v36 = vmax.f32 %v3301_v38, %v3235_v2  ;;  %v2792_v33 = vadd.f32 %v10425_v27, %v8565_v60  ;;  %v2783_v23 = vpop.f32.mrb[129].mxu1 }
 0x2b7   : > { %v2784_v22 = vadd.f32 %v10425_v27, %v2783_v23  ;;  %v8566_v42 = vpop.f32.mrb[130].mxu1 }
 0x2b8   : > { %vm2984_vm3 = vcmp.gt.f32.partialorder %v2792_v33, 0.0  ;;  %v3112_v21 = vmul.f32 0.2, %v2792_v33  ;;  %v2795_v29 = vadd.f32 %v10425_v27, %v8566_v42  ;;  %v2786_v7 = vpop.f32.mrb[131].mxu1 }
 0x2b9   : > { %vm2982_vm4 = vcmp.gt.f32.partialorder %v2784_v22, 0.0  ;;  %v3110_v24 = vmul.f32 0.2, %v2784_v22  ;;  %v2787_v62 = vadd.f32 %v10425_v27, %v2786_v7 }
 0x2ba   : > { %v3240_v49 = vsel %vm2984_vm3, %v2792_v33, %v3112_v21  ;;  %vm2985_vm5 = vcmp.gt.f32.partialorder %v2795_v29, 0.0  ;;  %v3113_v0 = vmul.f32 0.2, %v2795_v29 }
 0x2bb   : > { %v10562_v4 = vmax.f32 %v3336_v47, %v3240_v49  ;;  %v3238_v38 = vsel %vm2982_vm4, %v2784_v22, %v3110_v24  ;;  %vm2983_vm7 = vcmp.gt.f32.partialorder %v2787_v62, 0.0  ;;  %v3111_v56 = vmul.f32 0.2, %v2787_v62  ;;  %v10617_v49 = vld [vmem:[%s11752_s5 + $0x70] sm:$0xff] }
 0x2bc   : > { %v10567_v51 = vmax.f32 %v3322_v54, %v3238_v38  ;;  %v3241_v25 = vsel %vm2985_vm5, %v2795_v29, %v3113_v0 }
 0x2bd   : > { %v10572_v8 = vmax.f32 %v3343_v32, %v3241_v25  ;;  %v3239_v11 = vsel %vm2983_vm7, %v2787_v62, %v3111_v56  ;;  %v8569_v40 = vpop.f32.mrb[132].mxu1  ;;  %v10612_v62 = vld [vmem:[%s11752_s5 + $0x50] sm:$0xff] }
 0x2be   : > { %v10577_v50 = vmax.f32 %v3329_v5, %v3239_v11  ;;  %v2808_v17 = vadd.f32 %v10425_v27, %v8569_v40  ;;  %v2799_v47 = vpop.f32.mrb[133].mxu1  ;;  %v10625_v11 = vld [vmem:[%s11752_s5 + $0x58] sm:$0xff] }
 0x2bf   : > { %v2800_v44 = vadd.f32 %v10425_v27, %v2799_v47  ;;  %v8570_v30 = vpop.f32.mrb[134].mxu1  ;;  %v3389_v40 = vld [vmem:[%s11752_s5 + $0x78] sm:$0xff] }
 0x2c0   : > { %vm2988_vm6 = vcmp.gt.f32.partialorder %v2808_v17, 0.0  ;;  %v3116_v54 = vmul.f32 0.2, %v2808_v17  ;;  %v2811_v28 = vadd.f32 %v10425_v27, %v8570_v30  ;;  %v2802_v48 = vpop.f32.mrb[135].mxu1 }
 0x2c1   : > { %vm2986_vm8 = vcmp.gt.f32.partialorder %v2800_v44, 0.0  ;;  %v3114_v52 = vmul.f32 0.2, %v2800_v44  ;;  %v2803_v32 = vadd.f32 %v10425_v27, %v2802_v48 }
 0x2c2   : > { %v3244_v10 = vsel %vm2988_vm6, %v2808_v17, %v3116_v54  ;;  %vm2989_vm9 = vcmp.gt.f32.partialorder %v2811_v28, 0.0  ;;  %v3117_v53 = vmul.f32 0.2, %v2811_v28 }
 0x2c3   : > { %v10586_v43 = vmax.f32 %v3364_v61, %v3244_v10  ;;  %v3242_v5 = vsel %vm2986_vm8, %v2800_v44, %v3114_v52  ;;  %vm2987_vm10 = vcmp.gt.f32.partialorder %v2803_v32, 0.0  ;;  %v3115_v13 = vmul.f32 0.2, %v2803_v32 }
 0x2c4   : > { %v10591_v37 = vmax.f32 %v11778_v31, %v3242_v5  ;;  %v3245_v9 = vsel %vm2989_vm9, %v2811_v28, %v3117_v53  ;;  %v7775_v44 = vcombine.high %v10612_v62, %v10617_v49  ;;  %v7777_v10 = vcombine.high %v10625_v11, %v3389_v40  ;;  %v10645_v53 = vld [vmem:[%s11752_s5 + $0x90] sm:$0xff] }
 0x2c5   : > { %v10596_v14 = vmax.f32 %v11779_v18, %v3245_v9  ;;  %v3243_v26 = vsel %vm2987_vm10, %v2803_v32, %v3115_v13  ;;  %v8573_v2 = vpop.f32.mrb[136].mxu1  ;;  %v10650_v5 = vld [vmem:[%s11752_s5 + $0xb0] sm:$0xff]  ;;  %v7776_v9 = vcombine.low %v10625_v11, %v3389_v40  ;;  %v10658_v18 = vld [vmem:[%s11752_s5 + $0x98] sm:$0xff] }
 0x2c6   : > { %v10601_v58 = vmax.f32 %v11780_v16, %v3243_v26  ;;  %v2824_v61 = vadd.f32 %v10425_v27, %v8573_v2  ;;  %v2815_v60 = vpop.f32.mrb[137].mxu1  ;;  %v10663_v26 = vld [vmem:[%s11752_s5 + $0xb8] sm:$0xff]  ;;  %v10722_v11 = vld [vmem:[%s11752_s5 + $0x110] sm:$0xff] }
 0x2c7   : > { %v2816_v45 = vadd.f32 %v10425_v27, %v2815_v60  ;;  %v8574_v6 = vpop.f32.mrb[138].mxu1  ;;  %v11781_v60 = vmov 0   ;;  %v10727_v40 = vld [vmem:[%s11752_s5 + $0x130] sm:$0xff] }
 0x2c8   : > { %vm2992_vm11 = vcmp.gt.f32.partialorder %v2824_v61, 0.0  ;;  %v3120_v33 = vmul.f32 0.2, %v2824_v61  ;;  %v2827_v23 = vadd.f32 %v10425_v27, %v8574_v6  ;;  %v2818_v59 = vpop.f32.mrb[139].mxu1 }
 0x2c9   : > { %vm2990_vm12 = vcmp.gt.f32.partialorder %v2816_v45, 0.0  ;;  %v3118_v3 = vmul.f32 0.2, %v2816_v45  ;;  %v2819_v22 = vadd.f32 %v10425_v27, %v2818_v59  ;;  %v10680_v59 = vld [vmem:[%s11752_s5 + $0xd0] sm:$0xff] }
 0x2ca   : > { %v3248_v42 = vsel %vm2992_vm11, %v2824_v61, %v3120_v33  ;;  %vm2993_vm13 = vcmp.gt.f32.partialorder %v2827_v23, 0.0  ;;  %v3121_v57 = vmul.f32 0.2, %v2827_v23  ;;  %v11782_v33 = vcombine.low %v10327_v15, %v10332_v55 }
 0x2cb   : > { %v3282_v35 = vmax.f32 %v10514_v46, %v3248_v42  ;;  %v3246_v21 = vsel %vm2990_vm12, %v2816_v45, %v3118_v3  ;;  %vm2991_vm14 = vcmp.gt.f32.partialorder %v2819_v22, 0.0  ;;  %v3119_v29 = vmul.f32 0.2, %v2819_v22 }
 0x2cc   : > { %v3268_v7 = vmax.f32 %v10519_v19, %v3246_v21  ;;  %v3249_v24 = vsel %vm2993_vm13, %v2827_v23, %v3121_v57  ;;  %v11783_v23 = vcombine.low %v10337_v39, %v10345_v1  ;;  %v7785_v39 = vcombine.high %v10658_v18, %v10663_v26  ;;  %v10704_v21 = vld [vmem:[%s11752_s5 + $0xf8] sm:$0xff] }
 0x2cd   : > { %v3289_v0 = vmax.f32 %v10524_v41, %v3249_v24  ;;  %v3247_v38 = vsel %vm2991_vm14, %v2819_v22, %v3119_v29  ;;  %v8577_v46 = vpop.f32.mrb[140].mxu1  ;;  %v7782_v57 = vcombine.low %v10645_v53, %v10650_v5 }
 0x2ce   : > { %v3275_v56 = vmax.f32 %v10529_v12, %v3247_v38  ;;  %v2840_v25 = vadd.f32 %v10425_v27, %v8577_v46  ;;  %v2831_v19 = vpop.f32.mrb[141].mxu1  ;;  %v7774_v12 = vcombine.low %v10612_v62, %v10617_v49 }
 0x2cf   : > { %v2832_v17 = vadd.f32 %v10425_v27, %v2831_v19  ;;  %v8578_v47 = vpop.f32.mrb[142].mxu1  ;;  %v10631_v41 = vpack.c.bf16 %v3289_v0, %v3282_v35  ;;  %v7784_v35 = vcombine.low %v10658_v18, %v10663_v26 }
 0x2d0   : > { %v10637_v30 = vpack.c.bf16 %v3275_v56, %v3268_v7  ;;  %vm2996_vm15 = vcmp.gt.f32.partialorder %v2840_v25, 0.0  ;;  %v3124_v54 = vmul.f32 0.2, %v2840_v25  ;;  %v2843_v28 = vadd.f32 %v10425_v27, %v8578_v47  ;;  %v2834_v48 = vpop.f32.mrb[143].mxu1 }
 0x2d1   : > { %vm2994_vm0 = vcmp.gt.f32.partialorder %v2832_v17, 0.0  ;;  %v3122_v52 = vmul.f32 0.2, %v2832_v17  ;;  %v2835_v32 = vadd.f32 %v10425_v27, %v2834_v48 }
 0x2d2   : > { %v3252_v13 = vsel %vm2996_vm15, %v2840_v25, %v3124_v54  ;;  %vm2997_vm1 = vcmp.gt.f32.partialorder %v2843_v28, 0.0  ;;  %v3125_v31 = vmul.f32 0.2, %v2843_v28  ;;  %3841 = vmatmul.mubr.bf16.vlgmr.msra.gmra.mrb[104].mxu0 %v10637_v30  ;;  %3954 = vmatmul.mubr.bf16.vlgmr.msra.gmra.mrb[152].mxu1 %v10637_v30  ;;  %v10741_v54 = vld [vmem:[%s11752_s5 + $0x138] sm:$0xff] }
 0x2d3   : > { %v3310_v2 = vmax.f32 %v10538_v34, %v3252_v13  ;;  %v3250_v16 = vsel %vm2994_vm0, %v2832_v17, %v3122_v52  ;;  %vm2995_vm2 = vcmp.gt.f32.partialorder %v2835_v32, 0.0  ;;  %v3123_v61 = vmul.f32 0.2, %v2835_v32  ;;  %3850 = vmatprep.mubr.bf16.mxu0 %v11781_v60  ;;  %3963 = vmatprep.mubr.bf16.mxu1 %v11781_v60 }
 0x2d4   : > { %v3296_v45 = vmax.f32 %v10543_v63, %v3250_v16  ;;  %v3253_v6 = vsel %vm2997_vm1, %v2843_v28, %v3125_v31  ;;  %4035 = vmatpush1.bf16.msra.mxu0 %v11782_v33  ;;  %4148 = vmatpush1.bf16.msra.mxu1 %v11783_v23  ;;  %v7783_v34 = vcombine.high %v10645_v53, %v10650_v5  ;;  %v10685_v63 = vld [vmem:[%s11752_s5 + $0xf0] sm:$0xff] }
 0x2d5   : > { %v3317_v15 = vmax.f32 %v10548_v20, %v3253_v6  ;;  %v3251_v55 = vsel %vm2995_vm2, %v2835_v32, %v3123_v61  ;;  %v8581_v3 = vpop.f32.mrb[144].mxu1  ;;  %4036 = vmatprep.subr.bf16.mxu0 %v7775_v44  ;;  %4149 = vmatprep.subr.bf16.mxu1 %v7777_v10  ;;  %v10699_v20 = vld [vmem:[%s11752_s5 + $0xd8] sm:$0xff]  ;;  %v7790_v24 = vcombine.low %v10680_v59, %v10685_v63  ;;  %v10758_v5 = vld [vmem:[%s11752_s5 + $0x170] sm:$0xff] }
 0x2d6   : > { %v3303_v1 = vmax.f32 %v10553_v36, %v3251_v55  ;;  %v2856_v22 = vadd.f32 %v10425_v27, %v8581_v3  ;;  %v2847_v42 = vpop.f32.mrb[145].mxu1  ;;  %v7791_v62 = vcombine.high %v10680_v59, %v10685_v63  ;;  %v7793_v19 = vcombine.high %v10699_v20, %v10704_v21  ;;  %v10736_v44 = vld [vmem:[%s11752_s5 + $0x118] sm:$0xff] }
 0x2d7   : > { %v2848_v36 = vadd.f32 %v10425_v27, %v2847_v42  ;;  %v8582_v29 = vpop.f32.mrb[146].mxu1  ;;  %v10707_v7 = vpack.c.bf16 %v3317_v15, %v3310_v2  ;;  %v7799_v53 = vcombine.high %v10722_v11, %v10727_v40  ;;  %v7798_v16 = vcombine.low %v10722_v11, %v10727_v40  ;;  %v3428_v42 = vld [vmem:[%s11752_s5 + $0x1b0] sm:$0xff]  ;;  %v3433_v11 = vld [vmem:[%s11752_s5 + $0x1d8] sm:$0xff] }
 0x2d8   : > { %vm3000_vm3 = vcmp.gt.f32.partialorder %v2856_v22, 0.0  ;;  %v3128_v49 = vmul.f32 0.2, %v2856_v22  ;;  %v2859_v0 = vadd.f32 %v10425_v27, %v8582_v29  ;;  %v2850_v38 = vpop.f32.mrb[147].mxu1  ;;  %v10714_v46 = vpack.c.bf16 %v3303_v1, %v3296_v45  ;;  %4037 = vmatpush1.bf16.msra.mxu0 %v7774_v12  ;;  %4150 = vmatpush1.bf16.msra.mxu1 %v7776_v9  ;;  %v3421_v45 = vld [vmem:[%s11752_s5 + $0x178] sm:$0xff] }
 0x2d9   : > { %vm2998_vm4 = vcmp.gt.f32.partialorder %v2848_v36, 0.0  ;;  %v3126_v56 = vmul.f32 0.2, %v2848_v36  ;;  %v2851_v25 = vadd.f32 %v10425_v27, %v2850_v38  ;;  %4038 = vmatprep.subr.bf16.mxu0 %v7783_v34  ;;  %4151 = vmatprep.subr.bf16.mxu1 %v7785_v39  ;;  %v7792_v12 = vcombine.low %v10699_v20, %v10704_v21  ;;  %v3429_v21 = vld [vmem:[%s11752_s5 + $0x1b8] sm:$0xff] }
 0x2da   : > { %v3256_v17 = vsel %vm3000_vm3, %v2856_v22, %v3128_v49  ;;  %vm3001_vm5 = vcmp.gt.f32.partialorder %v2859_v0, 0.0  ;;  %v3129_v47 = vmul.f32 0.2, %v2859_v0  ;;  %3851 = vmatmul.mubr.bf16.gmra.mrb[108].mxu0 %v10631_v41  ;;  %3964 = vmatmul.mubr.bf16.gmra.mrb[156].mxu1 %v10631_v41  ;;  %v7801_v9 = vcombine.high %v10736_v44, %v10741_v54  ;;  %v3424_v22 = vld [vmem:[%s11752_s5 + $0x190] sm:$0xff] }
 0x2db   : > { %v3338_v28 = vmax.f32 %v10562_v4, %v3256_v17  ;;  %v3254_v48 = vsel %vm2998_vm4, %v2848_v36, %v3126_v56  ;;  %vm2999_vm7 = vcmp.gt.f32.partialorder %v2851_v25, 0.0  ;;  %v3127_v52 = vmul.f32 0.2, %v2851_v25  ;;  %3860 = vmatprep.mubr.bf16.mxu0 %v11781_v60  ;;  %3973 = vmatprep.mubr.bf16.mxu1 %v11781_v60  ;;  %v10753_v4 = vld [vmem:[%s11752_s5 + $0x150] sm:$0xff] }
 0x2dc   : > { %v3324_v32 = vmax.f32 %v10567_v51, %v3254_v48  ;;  %v3257_v10 = vsel %vm3001_vm5, %v2859_v0, %v3129_v47  ;;  %4039 = vmatpush1.bf16.msra.mxu0 %v7782_v57  ;;  %4152 = vmatpush1.bf16.msra.mxu1 %v7784_v35  ;;  %v7800_v61 = vcombine.low %v10736_v44, %v10741_v54  ;;  %v8723_v48 = vld [vmem:[#allocation2 + $0x24] ss:$16 sps:$4 sm:$0xff]  }
 0x2dd   : > { %v3345_v13 = vmax.f32 %v10572_v8, %v3257_v10  ;;  %v3255_v31 = vsel %vm2999_vm7, %v2851_v25, %v3127_v52  ;;  %v8585_v51 = vpop.f32.mrb[148].mxu1  ;;  %4040 = vmatprep.subr.bf16.mxu0 %v7791_v62  ;;  %4153 = vmatprep.subr.bf16.mxu1 %v7793_v19  ;;  %v3417_v8 = vld [vmem:[%s11752_s5 + $0x158] sm:$0xff]  ;;  %v7806_v23 = vcombine.low %v10753_v4, %v10758_v5  ;;  %v3432_v25 = vld [vmem:[%s11752_s5 + $0x1d0] sm:$0xff] }
 0x2de   : > { %v3331_v18 = vmax.f32 %v10577_v50, %v3255_v31  ;;  %v2872_v26 = vadd.f32 %v10425_v27, %v8585_v51  ;;  %v2863_v2 = vpop.f32.mrb[149].mxu1  ;;  %v7807_v34 = vcombine.high %v10753_v4, %v10758_v5  ;;  %v7809_v1 = vcombine.high %v3417_v8, %v3421_v45  ;;  %v8726_v52 = vld [vmem:[#allocation2 + $0x2c] ss:$16 sps:$4 sm:$0xff]   ;;  %v8724_v10 = vld [vmem:[#allocation2 + $0x28] ss:$16 sps:$4 sm:$0xff]  }
 0x2df   : > { %v2864_v6 = vadd.f32 %v10425_v27, %v2863_v2  ;;  %v8586_v50 = vpop.f32.mrb[150].mxu1  ;;  %v10776_v33 = vpack.c.bf16 %v3345_v13, %v3338_v28  ;;  %v7808_v20 = vcombine.low %v3417_v8, %v3421_v45  ;;  %v7815_v0 = vcombine.high %v3424_v22, %v3428_v42  ;;  %v8732_v4 = vld [vmem:[#allocation2 + $0x4c] ss:$16 sps:$4 sm:$0xff]   ;;  %v8727_v5 = vld [vmem:[#allocation2 + $0x40] ss:$16 sps:$4 sm:$0xff]  }
 0x2e0   : > { %vm3004_vm6 = vcmp.gt.f32.partialorder %v2872_v26, 0.0  ;;  %v3132_v59 = vmul.f32 0.2, %v2872_v26  ;;  %v2875_v63 = vadd.f32 %v10425_v27, %v8586_v50  ;;  %v2866_v15 = vpop.f32.mrb[151].mxu1  ;;  %v10783_v55 = vpack.c.bf16 %v3331_v18, %v3324_v32  ;;  %4041 = vmatpush1.bf16.msra.mxu0 %v7790_v24  ;;  %4154 = vmatpush1.bf16.msra.mxu1 %v7792_v12  ;;  %v8721_v32 = vld [vmem:[#allocation2 + $0x20] ss:$16 sps:$4 sm:$0xff]  }
 0x2e1   : > { %vm3002_vm8 = vcmp.gt.f32.partialorder %v2864_v6, 0.0  ;;  %v3130_v3 = vmul.f32 0.2, %v2864_v6  ;;  %v2867_v39 = vadd.f32 %v10425_v27, %v2866_v15  ;;  %4042 = vmatprep.subr.bf16.mxu0 %v7799_v53  ;;  %4155 = vmatprep.subr.bf16.mxu1 %v7801_v9  ;;  %v3425_v27 = vld [vmem:[%s11752_s5 + $0x198] sm:$0xff]  ;;  %v7814_v47 = vcombine.low %v3424_v22, %v3428_v42  ;;  %v8729_v53 = vld [vmem:[#allocation2 + $0x44] ss:$16 sps:$4 sm:$0xff]  }
 0x2e2   : > { %v3260_v57 = vsel %vm3004_vm6, %v2872_v26, %v3132_v59  ;;  %vm3005_vm9 = vcmp.gt.f32.partialorder %v2875_v63, 0.0  ;;  %v3133_v35 = vmul.f32 0.2, %v2875_v63  ;;  %3861 = vmatmul.mubr.bf16.gmra.mrb[112].mxu0 %v10714_v46  ;;  %3974 = vmatmul.mubr.bf16.gmra.mrb[160].mxu1 %v10714_v46  ;;  %v8735_v13 = vld [vmem:[#allocation2 + $0x64] ss:$16 sps:$4 sm:$0xff]  }
 0x2e3   : > { %v3366_v36 = vmax.f32 %v10586_v43, %v3260_v57  ;;  %v3258_v29 = vsel %vm3002_vm8, %v2864_v6, %v3130_v3  ;;  %vm3003_vm10 = vcmp.gt.f32.partialorder %v2867_v39, 0.0  ;;  %v3131_v24 = vmul.f32 0.2, %v2867_v39  ;;  %3870 = vmatprep.mubr.bf16.mxu0 %v11781_v60  ;;  %3983 = vmatprep.mubr.bf16.mxu1 %v11781_v60  ;;  %v8738_v31 = vld [vmem:[#allocation2 + $0x6c] ss:$16 sps:$4 sm:$0xff]  }
 0x2e4   : > { %v3352_v62 = vmax.f32 %v10591_v37, %v3258_v29  ;;  %v3261_v49 = vsel %vm3005_vm9, %v2875_v63, %v3133_v35  ;;  %4043 = vmatpush1.bf16.msra.mxu0 %v7798_v16  ;;  %4156 = vmatpush1.bf16.msra.mxu1 %v7800_v61  ;;  %v7817_v43 = vcombine.high %v3425_v27, %v3429_v21  ;;  %v3436_v37 = vld [vmem:[%s11752_s5 + $0x1f0] sm:$0xff]  ;;  %v8736_v9 = vld [vmem:[#allocation2 + $0x68] ss:$16 sps:$4 sm:$0xff]   ;;  %v8744_v26 = vld [vmem:[#allocation2 + $0x8c] ss:$16 sps:$4 sm:$0xff]  }
 0x2e5   : > { %v3373_v38 = vmax.f32 %v10596_v14, %v3261_v49  ;;  %v3259_v56 = vsel %vm3003_vm10, %v2867_v39, %v3131_v24  ;;  %4044 = vmatprep.subr.bf16.mxu0 %v7807_v34  ;;  %4157 = vmatprep.subr.bf16.mxu1 %v7809_v1  ;;  %v3437_v14 = vld [vmem:[%s11752_s5 + $0x1f8] sm:$0xff]  ;;  %v7823_v12 = vcombine.high %v3432_v25, %v3436_v37  ;;  %v8733_v51 = vld [vmem:[#allocation2 + $0x60] ss:$16 sps:$4 sm:$0xff]   ;;  %v8741_v18 = vld [vmem:[#allocation2 + $0x84] ss:$16 sps:$4 sm:$0xff]  }
 0x2e6   : > { %v3359_v19 = vmax.f32 %v10601_v58, %v3259_v56  ;;  %v7816_v58 = vcombine.low %v3425_v27, %v3429_v21  ;;  %v7825_v44 = vcombine.high %v3433_v11, %v3437_v14  ;;  %v7822_v54 = vcombine.low %v3432_v25, %v3436_v37  ;;  %v8739_v2 = vld [vmem:[#allocation2 + $0x80] ss:$16 sps:$4 sm:$0xff]   ;;  %v8742_v16 = vld [vmem:[#allocation2 + $0x88] ss:$16 sps:$4 sm:$0xff]   ;;  %v8747_v61 = vld [vmem:[#allocation2 + $0xa4] ss:$16 sps:$4 sm:$0xff]  }
 0x2e7   : > { %v10819_v40 = vpack.c.bf16 %v3373_v38, %v3366_v36  ;;  %v7824_v28 = vcombine.low %v3433_v11, %v3437_v14  ;;  %v8750_v8 = vld [vmem:[#allocation2 + $0xac] ss:$16 sps:$4 sm:$0xff]   ;;  %v8745_v45 = vld [vmem:[#allocation2 + $0xa0] ss:$16 sps:$4 sm:$0xff]   ;;  %v8748_v6 = vld [vmem:[#allocation2 + $0xa8] ss:$16 sps:$4 sm:$0xff]  }
 0x2e8   : > { %v10821_v17 = vpack.c.bf16 %v3359_v19, %v3352_v62  ;;  %4045 = vmatpush1.bf16.msra.mxu0 %v7806_v23  ;;  %4158 = vmatpush1.bf16.msra.mxu1 %v7808_v20  ;;  %v8753_v50 = vld [vmem:[#allocation2 + $0xc4] ss:$16 sps:$4 sm:$0xff]   ;;  %v8751_v23 = vld [vmem:[#allocation2 + $0xc0] ss:$16 sps:$4 sm:$0xff]   ;;  %v8754_v34 = vld [vmem:[#allocation2 + $0xc8] ss:$16 sps:$4 sm:$0xff]  }
 0x2e9   : > { %4046 = vmatprep.subr.bf16.mxu0 %v7815_v0  ;;  %4159 = vmatprep.subr.bf16.mxu1 %v7817_v43  ;;  %v8759_v59 = vld [vmem:[#allocation2 + $0xe4] ss:$16 sps:$4 sm:$0xff]   ;;  %v8762_v63 = vld [vmem:[#allocation2 + $0xec] ss:$16 sps:$4 sm:$0xff]   ;;  %v8757_v15 = vld [vmem:[#allocation2 + $0xe0] ss:$16 sps:$4 sm:$0xff]  }
 0x2ea   : > { %3871 = vmatmul.mubr.bf16.gmra.mrb[116].mxu0 %v10707_v7  ;;  %3984 = vmatmul.mubr.bf16.gmra.mrb[164].mxu1 %v10707_v7  ;;  %v8765_v3 = vld [vmem:[#allocation2 + $0x104] ss:$16 sps:$4 sm:$0xff]   ;;  %v8768_v39 = vld [vmem:[#allocation2 + $0x10c] ss:$16 sps:$4 sm:$0xff]   ;;  %v8763_v1 = vld [vmem:[#allocation2 + $0x100] ss:$16 sps:$4 sm:$0xff]  }
 0x2eb   : > { %3880 = vmatprep.mubr.bf16.mxu0 %v11781_v60  ;;  %3993 = vmatprep.mubr.bf16.mxu1 %v11781_v60  ;;  %v8766_v22 = vld [vmem:[#allocation2 + $0x108] ss:$16 sps:$4 sm:$0xff]   ;;  %v8771_v42 = vld [vmem:[#allocation2 + $0x124] ss:$16 sps:$4 sm:$0xff]   ;;  %v8774_v57 = vld [vmem:[#allocation2 + $0x12c] ss:$16 sps:$4 sm:$0xff]  }
 0x2ec   : > { %4047 = vmatpush1.bf16.msra.mxu0 %v7814_v47  ;;  %4160 = vmatpush1.bf16.msra.mxu1 %v7816_v58  ;;  %v8769_v35 = vld [vmem:[#allocation2 + $0x120] ss:$16 sps:$4 sm:$0xff]   ;;  %v8772_v20 = vld [vmem:[#allocation2 + $0x128] ss:$16 sps:$4 sm:$0xff]   ;;  %v8777_v27 = vld [vmem:[#allocation2 + $0x144] ss:$16 sps:$4 sm:$0xff]  }
 0x2ed   : > { %4048 = vmatprep.subr.bf16.mxu0 %v7823_v12  ;;  %4161 = vmatprep.subr.bf16.mxu1 %v7825_v44  ;;  %v8780_v21 = vld [vmem:[#allocation2 + $0x14c] ss:$16 sps:$4 sm:$0xff]   ;;  %v8775_v36 = vld [vmem:[#allocation2 + $0x140] ss:$16 sps:$4 sm:$0xff]   ;;  %v8778_v29 = vld [vmem:[#allocation2 + $0x148] ss:$16 sps:$4 sm:$0xff]  }
 0x2ee   : > { %v8783_v24 = vld [vmem:[#allocation2 + $0x164] ss:$16 sps:$4 sm:$0xff]   ;;  %v8786_v62 = vld [vmem:[#allocation2 + $0x16c] ss:$16 sps:$4 sm:$0xff]   ;;  %v8781_v49 = vld [vmem:[#allocation2 + $0x160] ss:$16 sps:$4 sm:$0xff]  }
 0x2ef   : > { %v8784_v0 = vld [vmem:[#allocation2 + $0x168] ss:$16 sps:$4 sm:$0xff]   ;;  %v8789_v38 = vld [vmem:[#allocation2 + $0x184] ss:$16 sps:$4 sm:$0xff]   ;;  %v8792_v56 = vld [vmem:[#allocation2 + $0x18c] ss:$16 sps:$4 sm:$0xff]  }
 0x2f0   : > { %4049 = vmatpush1.bf16.msra.mxu0 %v7822_v54  ;;  %4162 = vmatpush1.bf16.msra.mxu1 %v7824_v28  ;;  %v8787_v43 = vld [vmem:[#allocation2 + $0x180] ss:$16 sps:$4 sm:$0xff]   ;;  %v8790_v25 = vld [vmem:[#allocation2 + $0x188] ss:$16 sps:$4 sm:$0xff]   ;;  %v8795_v19 = vld [vmem:[#allocation2 + $0x1a4] ss:$16 sps:$4 sm:$0xff]   ;;  %v3448_v54 = vlaneseq }
 0x2f1   : > { %v8798_v37 = vld [vmem:[#allocation2 + $0x1ac] ss:$16 sps:$4 sm:$0xff]   ;;  %v8793_v11 = vld [vmem:[#allocation2 + $0x1a0] ss:$16 sps:$4 sm:$0xff]   ;;  %v8796_v14 = vld [vmem:[#allocation2 + $0x1a8] ss:$16 sps:$4 sm:$0xff]  }
 0x2f2   : > { %3881 = vmatmul.mubr.bf16.gmra.mrb[120].mxu0 %v10783_v55  ;;  %3994 = vmatmul.mubr.bf16.gmra.mrb[168].mxu1 %v10783_v55  ;;  %v8799_v47 = vld [vmem:[#allocation2 + $0x1c0] ss:$16 sps:$4 sm:$0xff]   ;;  %v8802_v58 = vld [vmem:[#allocation2 + $0x1c8] ss:$16 sps:$4 sm:$0xff]   ;;  %v8807_v12 = vld [vmem:[#allocation2 + $0x1e4] ss:$16 sps:$4 sm:$0xff]  }
 0x2f3   : > { %3890 = vmatprep.mubr.bf16.mxu0 %v11781_v60  ;;  %4003 = vmatprep.mubr.bf16.mxu1 %v11781_v60  ;;  %v8810_v44 = vld [vmem:[#allocation2 + $0x1ec] ss:$16 sps:$4 sm:$0xff]   ;;  %v8805_v28 = vld [vmem:[#allocation2 + $0x1e0] ss:$16 sps:$4 sm:$0xff]  }
 0x2fa   : > { %3891 = vmatmul.mubr.bf16.gmra.mrb[124].mxu0 %v10776_v33  ;;  %4004 = vmatmul.mubr.bf16.gmra.mrb[172].mxu1 %v10776_v33 }
 0x2fb   : > { %3900 = vmatprep.mubr.bf16.mxu0 %v11781_v60  ;;  %4013 = vmatprep.mubr.bf16.mxu1 %v11781_v60 }
 0x302   : > { %3901 = vmatmul.mubr.bf16.gmra.mrb[128].mxu0 %v10821_v17  ;;  %4014 = vmatmul.mubr.bf16.gmra.mrb[176].mxu1 %v10821_v17 }
 0x303   : > { %3910 = vmatprep.mubr.bf16.mxu0 %v11781_v60  ;;  %4023 = vmatprep.mubr.bf16.mxu1 %v11781_v60 }
 0x30a   : > { %3911 = vmatmul.mubr.bf16.gmra.mrb[132].mxu0 %v10819_v40  ;;  %4024 = vmatmul.mubr.bf16.gmra.mrb[180].mxu1 %v10819_v40 }
 0x30b   : > { %4066 = vmatprep.mubr.bf16.mxu0 %v11781_v60  ;;  %4179 = vmatprep.mubr.bf16.mxu1 %v11781_v60 }
 0x312   : > { %4067 = vmatmul.mubr.bf16.vlgmr.msra.gmra.mrb[136].mxu0 %v10637_v30  ;;  %4180 = vmatmul.mubr.bf16.vlgmr.msra.gmra.mrb[184].mxu1 %v10637_v30  ;;  %v8720_v30 = vld [vmem:[#allocation2 + $0xc] ss:$16 sps:$4 sm:$0xff]  }
 0x313   : > { %4076 = vmatprep.mubr.bf16.mxu0 %v11781_v60  ;;  %4189 = vmatprep.mubr.bf16.mxu1 %v11781_v60 }
 0x314   : > { %6647 = vmatprep.subr.bf16.mxu1 %v8720_v30  ;;  %v10873_v30 = vshrl.u32 %v3448_v54, 7 }
 0x316   : > { %11784 = vst [vmem:[#allocation5_spill] sm:$0xff] %v10873_v30 }
 0x31a   : > { %4077 = vmatmul.mubr.bf16.gmra.mrb[140].mxu0 %v10631_v41  ;;  %4190 = vmatmul.mubr.bf16.gmra.mrb[188].mxu1 %v10631_v41  ;;  %v8717_v41 = vld [vmem:[#allocation2 + $0x4] ss:$16 sps:$4 sm:$0xff]  }
 0x31b   : > { %4086 = vmatprep.mubr.bf16.mxu0 %v11781_v60  ;;  %4199 = vmatprep.mubr.bf16.mxu1 %v11781_v60 }
 0x31c   : > { %6483 = vmatprep.subr.bf16.mxu0 %v8717_v41  ;;  %v8808_v41 = vld [vmem:[#allocation2 + $0x1e8] ss:$16 sps:$4 sm:$0xff]  }
 0x322   : > { %4087 = vmatmul.mubr.bf16.gmra.mrb[144].mxu0 %v10714_v46  ;;  %4200 = vmatmul.mubr.bf16.gmra.mrb[192].mxu1 %v10714_v46  ;;  %v8718_v46 = vld [vmem:[#allocation2 + $0x8] ss:$16 sps:$4 sm:$0xff]  }
 0x323   : > { %4096 = vmatprep.mubr.bf16.mxu0 %v11781_v60  ;;  %4209 = vmatprep.mubr.bf16.mxu1 %v11781_v60 }
 0x324   : > { %6648 = vmatpush1.bf16.msra.mxu1 %v8718_v46  ;;  %v11765_v46 = vsub.s32 2, %v10873_v30 }
 0x325   : > { %6649 = vmatprep.subr.bf16.mxu1 %v8726_v52  ;;  %v10885_v52 = vsub.s32 1, %v10873_v30 }
 0x327   : > { %11786 = vst [vmem:[#allocation7_spill] sm:$0xff] %v10885_v52 }
 0x328   : > { %6650 = vmatpush1.bf16.msra.mxu1 %v8724_v10 }
 0x329   : > { %6651 = vmatprep.subr.bf16.mxu1 %v8732_v4 }
 0x32a   : > { %4097 = vmatmul.mubr.bf16.gmra.mrb[148].mxu0 %v10707_v7  ;;  %4210 = vmatmul.mubr.bf16.gmra.mrb[196].mxu1 %v10707_v7  ;;  %v8715_v7 = vld [vmem:[#allocation2] ss:$16 sps:$4 sm:$0xff]  }
 0x32b   : > { %4106 = vmatprep.mubr.bf16.mxu0 %v11781_v60  ;;  %4219 = vmatprep.mubr.bf16.mxu1 %v11781_v60 }
 0x32c   : > { %6484 = vmatpush1.bf16.msra.mxu0 %v8715_v7  ;;  %v10876_v7 = vsub.s32 0, %v10873_v30 }
 0x32d   : > { %6485 = vmatprep.subr.bf16.mxu0 %v8723_v48  ;;  %v10882_v48 = vld [vmem:[%s11753_s6] sm:$0xff] }
 0x32e   : > { %11785 = vst [vmem:[#allocation6_spill] sm:$0xff] %v10876_v7  ;;  %v10890_v10 = vrot.slane %v10882_v48, %v10876_v7  ;;  %v10899_v4 = vrot.slane %v10882_v48, %v10885_v52 }
 0x330   : > { %6486 = vmatpush1.bf16.msra.mxu0 %v8721_v32  ;;  %v11766_v32 = vsub.s32 3, %v10873_v30 }
 0x331   : > { %6487 = vmatprep.subr.bf16.mxu0 %v8729_v53  ;;  %v10895_v53 = vrot.slane %v10882_v48, %v11765_v46 }
 0x332   : > { %4107 = vmatmul.mubr.bf16.gmra.mrb[152].mxu0 %v10783_v55  ;;  %4220 = vmatmul.mubr.bf16.gmra.mrb[200].mxu1 %v10783_v55  ;;  %v8760_v55 = vld [vmem:[#allocation2 + $0xe8] ss:$16 sps:$4 sm:$0xff]  }
 0x333   : > { %4116 = vmatprep.mubr.bf16.mxu0 %v11781_v60  ;;  %4229 = vmatprep.mubr.bf16.mxu1 %v11781_v60 }
 0x334   : > { %6488 = vmatpush1.bf16.msra.mxu0 %v8727_v5  ;;  %v10904_v5 = vrot.slane %v10882_v48, %v11766_v32 }
 0x335   : > { %6489 = vmatprep.subr.bf16.mxu0 %v8735_v13 }
 0x338   : > { %6490 = vmatpush1.bf16.msra.mxu0 %v8733_v51 }
 0x339   : > { %6491 = vmatprep.subr.bf16.mxu0 %v8741_v18 }
 0x33a   : > { %4117 = vmatmul.mubr.bf16.gmra.mrb[156].mxu0 %v10776_v33  ;;  %4230 = vmatmul.mubr.bf16.gmra.mrb[204].mxu1 %v10776_v33  ;;  %v8756_v33 = vld [vmem:[#allocation2 + $0xcc] ss:$16 sps:$4 sm:$0xff]  }
 0x33b   : > { %4126 = vmatprep.mubr.bf16.mxu0 %v11781_v60  ;;  %4239 = vmatprep.mubr.bf16.mxu1 %v11781_v60 }
 0x33c   : > { %6492 = vmatpush1.bf16.msra.mxu0 %v8739_v2 }
 0x33d   : > { %6493 = vmatprep.subr.bf16.mxu0 %v8747_v61 }
 0x340   : > { %6494 = vmatpush1.bf16.msra.mxu0 %v8745_v45  ;;  %v3474_v45 = vsub.s32 6, %v10873_v30 }
 0x341   : > { %6495 = vmatprep.subr.bf16.mxu0 %v8753_v50  ;;  %v8813_v50 = vld [vmem:[#allocation2 + $0x204] ss:$16 sps:$4 sm:$0xff]  }
 0x342   : > { %4127 = vmatmul.mubr.bf16.gmra.mrb[160].mxu0 %v10821_v17  ;;  %4240 = vmatmul.mubr.bf16.gmra.mrb[208].mxu1 %v10821_v17  ;;  %v8804_v17 = vld [vmem:[#allocation2 + $0x1cc] ss:$16 sps:$4 sm:$0xff]  }
 0x343   : > { %4136 = vmatprep.mubr.bf16.mxu0 %v11781_v60  ;;  %4249 = vmatprep.mubr.bf16.mxu1 %v11781_v60  ;;  %v8730_v60 = vld [vmem:[#allocation2 + $0x48] ss:$16 sps:$4 sm:$0xff]  }
 0x344   : > { %6652 = vmatpush1.bf16.msra.mxu1 %v8730_v60  ;;  %6496 = vmatpush1.bf16.msra.mxu0 %v8751_v23 }
 0x345   : > { %6653 = vmatprep.subr.bf16.mxu1 %v8738_v31  ;;  %6497 = vmatprep.subr.bf16.mxu0 %v8759_v59  ;;  %v3478_v59 = vsub.s32 7, %v10873_v30 }
 0x348   : > { %6654 = vmatpush1.bf16.msra.mxu1 %v8736_v9  ;;  %6498 = vmatpush1.bf16.msra.mxu0 %v8757_v15 }
 0x349   : > { %6655 = vmatprep.subr.bf16.mxu1 %v8744_v26  ;;  %6499 = vmatprep.subr.bf16.mxu0 %v8765_v3  ;;  %v3466_v26 = vsub.s32 4, %v10873_v30 }
 0x34a   : > { %4137 = vmatmul.mubr.bf16.gmra.mrb[164].mxu0 %v10819_v40  ;;  %4250 = vmatmul.mubr.bf16.gmra.mrb[212].mxu1 %v10819_v40  ;;  %v8801_v40 = vld [vmem:[#allocation2 + $0x1c4] ss:$16 sps:$4 sm:$0xff]  }
 0x34c   : > { %6656 = vmatpush1.bf16.msra.mxu1 %v8742_v16  ;;  %6500 = vmatpush1.bf16.msra.mxu0 %v8763_v1  ;;  %v10917_v1 = vrot.slane %v10882_v48, %v3466_v26 }
 0x34d   : > { %6657 = vmatprep.subr.bf16.mxu1 %v8750_v8  ;;  %6501 = vmatprep.subr.bf16.mxu0 %v8771_v42 }
 0x350   : > { %6658 = vmatpush1.bf16.msra.mxu1 %v8748_v6  ;;  %6502 = vmatpush1.bf16.msra.mxu0 %v8769_v35  ;;  %v3470_v6 = vsub.s32 5, %v10873_v30 }
 0x351   : > { %6659 = vmatprep.subr.bf16.mxu1 %v8756_v33  ;;  %6503 = vmatprep.subr.bf16.mxu0 %v8777_v27 }
 0x354   : > { %6660 = vmatpush1.bf16.msra.mxu1 %v8754_v34  ;;  %6504 = vmatpush1.bf16.msra.mxu0 %v8775_v36 }
 0x355   : > { %6661 = vmatprep.subr.bf16.mxu1 %v8762_v63  ;;  %6505 = vmatprep.subr.bf16.mxu0 %v8783_v24 }
 0x358   : > { %6662 = vmatpush1.bf16.msra.mxu1 %v8760_v55  ;;  %6506 = vmatpush1.bf16.msra.mxu0 %v8781_v49 }
 0x359   : > { %6663 = vmatprep.subr.bf16.mxu1 %v8768_v39  ;;  %6507 = vmatprep.subr.bf16.mxu0 %v8789_v38 }
 0x35c   : > { %6664 = vmatpush1.bf16.msra.mxu1 %v8766_v22  ;;  %6508 = vmatpush1.bf16.msra.mxu0 %v8787_v43  ;;  %v8816_v22 = vld [vmem:[#allocation2 + $0x20c] ss:$16 sps:$4 sm:$0xff]  }
 0x35d   : > { %6665 = vmatprep.subr.bf16.mxu1 %v8774_v57  ;;  %6509 = vmatprep.subr.bf16.mxu0 %v8795_v19 }
 0x360   : > { %6666 = vmatpush1.bf16.msra.mxu1 %v8772_v20  ;;  %6510 = vmatpush1.bf16.msra.mxu0 %v8793_v11 }
 0x361   : > { %6667 = vmatprep.subr.bf16.mxu1 %v8780_v21  ;;  %6511 = vmatprep.subr.bf16.mxu0 %v8801_v40 }
 0x364   : > { %6668 = vmatpush1.bf16.msra.mxu1 %v8778_v29  ;;  %6512 = vmatpush1.bf16.msra.mxu0 %v8799_v47 }
 0x365   : > { %6669 = vmatprep.subr.bf16.mxu1 %v8786_v62  ;;  %6513 = vmatprep.subr.bf16.mxu0 %v8807_v12 }
 0x368   : > { %6670 = vmatpush1.bf16.msra.mxu1 %v8784_v0  ;;  %6514 = vmatpush1.bf16.msra.mxu0 %v8805_v28 }
 0x369   : > { %6671 = vmatprep.subr.bf16.mxu1 %v8792_v56  ;;  %6524 = vmatprep.subr.bf16.mxu0 %v8813_v50 }
 0x36c   : > { %6672 = vmatpush1.bf16.msra.mxu1 %v8790_v25 }
 0x36d   : > { %6673 = vmatprep.subr.bf16.mxu1 %v8798_v37 }
 0x370   : > { %6674 = vmatpush1.bf16.msra.mxu1 %v8796_v14 }
 0x371   : > { %6675 = vmatprep.subr.bf16.mxu1 %v8804_v17 }
 0x374   : > { %6676 = vmatpush1.bf16.msra.mxu1 %v8802_v58 }
 0x375   : > { %6677 = vmatprep.subr.bf16.mxu1 %v8810_v44 }
 0x378   : > { %6678 = vmatpush1.bf16.msra.mxu1 %v8808_v41 }
 0x379   : > { %6688 = vmatprep.subr.bf16.mxu1 %v8816_v22 }
 0x3a5   : > { %v3842_v60 = vpop.f32.mrb[104].mxu0  ;;  %v3955_v13 = vpop.f32.mrb[152].mxu1 }
 0x3a6   : > { %v3843_v31 = vadd.f32 %v3842_v60, %v10890_v10  ;;  %v3956_v51 = vadd.f32 %v3955_v13, %v10895_v53  ;;  %v3844_v9 = vpop.f32.mrb[105].mxu0  ;;  %v3957_v18 = vpop.f32.mrb[153].mxu1 }
 0x3a7   : > { %v3845_v2 = vadd.f32 %v3844_v9, %v10899_v4  ;;  %v3958_v16 = vadd.f32 %v3957_v18, %v10904_v5  ;;  %v3846_v61 = vpop.f32.mrb[106].mxu0  ;;  %v3959_v8 = vpop.f32.mrb[154].mxu1 }
 0x3a8   : > { %vm4260_vm11 = vcmp.gt.f32.partialorder %v3843_v31, 0.0  ;;  %v4388_v33 = vmul.f32 0.2, %v3843_v31  ;;  %vm4262_vm12 = vcmp.gt.f32.partialorder %v3956_v51, 0.0  ;;  %v4390_v23 = vmul.f32 0.2, %v3956_v51 }
 0x3a9   : > { %vm4261_vm13 = vcmp.gt.f32.partialorder %v3845_v2, 0.0  ;;  %v4389_v34 = vmul.f32 0.2, %v3845_v2  ;;  %vm4263_vm14 = vcmp.gt.f32.partialorder %v3958_v16, 0.0  ;;  %v4391_v63 = vmul.f32 0.2, %v3958_v16 }
 0x3aa   : > { %v3847_v15 = vadd.f32 %v3846_v61, %v10890_v10  ;;  %v3960_v55 = vadd.f32 %v3959_v8, %v10895_v53  ;;  %v3848_v3 = vpop.f32.mrb[107].mxu0  ;;  %v3961_v39 = vpop.f32.mrb[155].mxu1  ;;  %v4516_v42 = vsel %vm4260_vm11, %v3843_v31, %v4388_v33  ;;  %v4518_v57 = vsel %vm4262_vm12, %v3956_v51, %v4390_v23 }
 0x3ab   : > { %v3849_v35 = vadd.f32 %v3848_v3, %v10899_v4  ;;  %v3962_v20 = vadd.f32 %v3961_v39, %v10904_v5  ;;  %v4517_v24 = vsel %vm4261_vm13, %v3845_v2, %v4389_v34  ;;  %v4519_v62 = vsel %vm4263_vm14, %v3958_v16, %v4391_v63 }
 0x3ac   : > { %vm4268_vm15 = vcmp.gt.f32.partialorder %v3847_v15, 0.0  ;;  %v4396_v27 = vmul.f32 0.2, %v3847_v15  ;;  %vm4270_vm0 = vcmp.gt.f32.partialorder %v3960_v55, 0.0  ;;  %v4398_v21 = vmul.f32 0.2, %v3960_v55 }
 0x3ad   : > { %vm4269_vm1 = vcmp.gt.f32.partialorder %v3849_v35, 0.0  ;;  %v4397_v36 = vmul.f32 0.2, %v3849_v35  ;;  %vm4271_vm2 = vcmp.gt.f32.partialorder %v3962_v20, 0.0  ;;  %v4399_v29 = vmul.f32 0.2, %v3962_v20 }
 0x3ae   : > { %v4524_v49 = vsel %vm4268_vm15, %v3847_v15, %v4396_v27  ;;  %v4526_v0 = vsel %vm4270_vm0, %v3960_v55, %v4398_v21  ;;  %v3852_v38 = vpop.f32.mrb[108].mxu0  ;;  %v3965_v56 = vpop.f32.mrb[156].mxu1 }
 0x3af   : > { %v4644_v43 = vmax.f32 %v4516_v42, %v4524_v49  ;;  %v4670_v25 = vmax.f32 %v4518_v57, %v4526_v0  ;;  %v4525_v19 = vsel %vm4269_vm1, %v3849_v35, %v4397_v36  ;;  %v4527_v37 = vsel %vm4271_vm2, %v3962_v20, %v4399_v29  ;;  %v3854_v11 = vpop.f32.mrb[109].mxu0  ;;  %v3967_v14 = vpop.f32.mrb[157].mxu1 }
 0x3b0   : > { %v4657_v40 = vmax.f32 %v4517_v24, %v4525_v19  ;;  %v4683_v17 = vmax.f32 %v4519_v62, %v4527_v37  ;;  %v3853_v47 = vadd.f32 %v3852_v38, %v10890_v10  ;;  %v3966_v58 = vadd.f32 %v3965_v56, %v10895_v53  ;;  %v3856_v12 = vpop.f32.mrb[110].mxu0  ;;  %v3969_v44 = vpop.f32.mrb[158].mxu1 }
 0x3b1   : > { %v3855_v54 = vadd.f32 %v3854_v11, %v10899_v4  ;;  %v3968_v28 = vadd.f32 %v3967_v14, %v10904_v5  ;;  %v3857_v41 = vadd.f32 %v3856_v12, %v10890_v10  ;;  %v3970_v60 = vadd.f32 %v3969_v44, %v10895_v53  ;;  %v3858_v13 = vpop.f32.mrb[111].mxu0  ;;  %v3971_v31 = vpop.f32.mrb[159].mxu1 }
 0x3b2   : > { %vm4276_vm3 = vcmp.gt.f32.partialorder %v3853_v47, 0.0  ;;  %v4404_v51 = vmul.f32 0.2, %v3853_v47  ;;  %vm4278_vm4 = vcmp.gt.f32.partialorder %v3966_v58, 0.0  ;;  %v4406_v9 = vmul.f32 0.2, %v3966_v58 }
 0x3b3   : > { %vm4277_vm5 = vcmp.gt.f32.partialorder %v3855_v54, 0.0  ;;  %v4405_v18 = vmul.f32 0.2, %v3855_v54  ;;  %vm4279_vm7 = vcmp.gt.f32.partialorder %v3968_v28, 0.0  ;;  %v4407_v26 = vmul.f32 0.2, %v3968_v28 }
 0x3b4   : > { %v4532_v2 = vsel %vm4276_vm3, %v3853_v47, %v4404_v51  ;;  %v4534_v16 = vsel %vm4278_vm4, %v3966_v58, %v4406_v9  ;;  %vm4284_vm6 = vcmp.gt.f32.partialorder %v3857_v41, 0.0  ;;  %v4412_v61 = vmul.f32 0.2, %v3857_v41 }
 0x3b5   : > { %v4645_v8 = vmax.f32 %v4644_v43, %v4532_v2  ;;  %v4671_v50 = vmax.f32 %v4670_v25, %v4534_v16  ;;  %v4533_v33 = vsel %vm4277_vm5, %v3855_v54, %v4405_v18  ;;  %v4535_v23 = vsel %vm4279_vm7, %v3968_v28, %v4407_v26  ;;  %v3862_v34 = vpop.f32.mrb[112].mxu0  ;;  %v3975_v63 = vpop.f32.mrb[160].mxu1 }
 0x3b6   : > { %v4658_v15 = vmax.f32 %v4657_v40, %v4533_v33  ;;  %v4684_v55 = vmax.f32 %v4683_v17, %v4535_v23  ;;  %v4540_v3 = vsel %vm4284_vm6, %v3857_v41, %v4412_v61  ;;  %vm4286_vm8 = vcmp.gt.f32.partialorder %v3970_v60, 0.0  ;;  %v3864_v39 = vpop.f32.mrb[113].mxu0  ;;  %v3977_v22 = vpop.f32.mrb[161].mxu1 }
 0x3b7   : > { %v4646_v42 = vmax.f32 %v4645_v8, %v4540_v3  ;;  %v4414_v57 = vmul.f32 0.2, %v3970_v60  ;;  %v3859_v35 = vadd.f32 %v3858_v13, %v10899_v4  ;;  %v3972_v20 = vadd.f32 %v3971_v31, %v10904_v5  ;;  %v3866_v27 = vpop.f32.mrb[114].mxu0  ;;  %v3979_v21 = vpop.f32.mrb[162].mxu1 }
 0x3b8   : > { %v3863_v36 = vadd.f32 %v3862_v34, %v10890_v10  ;;  %v3976_v29 = vadd.f32 %v3975_v63, %v10895_v53  ;;  %v3865_v24 = vadd.f32 %v3864_v39, %v10899_v4  ;;  %v3978_v62 = vadd.f32 %v3977_v22, %v10904_v5  ;;  %v3868_v49 = vpop.f32.mrb[115].mxu0  ;;  %v3981_v0 = vpop.f32.mrb[163].mxu1 }
 0x3b9   : > { %v4542_v38 = vsel %vm4286_vm8, %v3970_v60, %v4414_v57  ;;  %vm4285_vm9 = vcmp.gt.f32.partialorder %v3859_v35, 0.0  ;;  %v4413_v56 = vmul.f32 0.2, %v3859_v35  ;;  %vm4287_vm10 = vcmp.gt.f32.partialorder %v3972_v20, 0.0 }
 0x3ba   : > { %v4672_v43 = vmax.f32 %v4671_v50, %v4542_v38  ;;  %v4415_v25 = vmul.f32 0.2, %v3972_v20  ;;  %vm4292_vm11 = vcmp.gt.f32.partialorder %v3863_v36, 0.0  ;;  %v4420_v19 = vmul.f32 0.2, %v3863_v36 }
 0x3bb   : > { %v4541_v37 = vsel %vm4285_vm9, %v3859_v35, %v4413_v56  ;;  %vm4294_vm12 = vcmp.gt.f32.partialorder %v3976_v29, 0.0  ;;  %v4422_v11 = vmul.f32 0.2, %v3976_v29  ;;  %vm4293_vm13 = vcmp.gt.f32.partialorder %v3865_v24, 0.0 }
 0x3bc   : > { %v4659_v14 = vmax.f32 %v4658_v15, %v4541_v37  ;;  %v4543_v40 = vsel %vm4287_vm10, %v3972_v20, %v4415_v25  ;;  %v4548_v17 = vsel %vm4292_vm11, %v3863_v36, %v4420_v19  ;;  %v4421_v47 = vmul.f32 0.2, %v3865_v24 }
 0x3bd   : > { %v4685_v58 = vmax.f32 %v4684_v55, %v4543_v40  ;;  %v4647_v12 = vmax.f32 %v4646_v42, %v4548_v17  ;;  %v4550_v44 = vsel %vm4294_vm12, %v3976_v29, %v4422_v11  ;;  %vm4295_vm14 = vcmp.gt.f32.partialorder %v3978_v62, 0.0  ;;  %v3872_v54 = vpop.f32.mrb[116].mxu0  ;;  %v3985_v28 = vpop.f32.mrb[164].mxu1 }
 0x3be   : > { %v4673_v41 = vmax.f32 %v4672_v43, %v4550_v44  ;;  %v4549_v60 = vsel %vm4293_vm13, %v3865_v24, %v4421_v47  ;;  %v4423_v13 = vmul.f32 0.2, %v3978_v62  ;;  %v3867_v31 = vadd.f32 %v3866_v27, %v10890_v10  ;;  %v3874_v51 = vpop.f32.mrb[117].mxu0  ;;  %v3987_v9 = vpop.f32.mrb[165].mxu1 }
 0x3bf   : > { %v4660_v18 = vmax.f32 %v4659_v14, %v4549_v60  ;;  %v3980_v26 = vadd.f32 %v3979_v21, %v10895_v53  ;;  %v3869_v2 = vadd.f32 %v3868_v49, %v10899_v4  ;;  %v3982_v16 = vadd.f32 %v3981_v0, %v10904_v5  ;;  %v3876_v61 = vpop.f32.mrb[118].mxu0  ;;  %v3989_v8 = vpop.f32.mrb[166].mxu1 }
 0x3c0   : > { %v4551_v50 = vsel %vm4295_vm14, %v3978_v62, %v4423_v13  ;;  %vm4300_vm15 = vcmp.gt.f32.partialorder %v3867_v31, 0.0  ;;  %v4428_v33 = vmul.f32 0.2, %v3867_v31  ;;  %v3873_v23 = vadd.f32 %v3872_v54, %v10890_v10  ;;  %v3878_v34 = vpop.f32.mrb[119].mxu0  ;;  %v3991_v63 = vpop.f32.mrb[167].mxu1 }
 0x3c1   : > { %v4686_v15 = vmax.f32 %v4685_v58, %v4551_v50  ;;  %vm4302_vm0 = vcmp.gt.f32.partialorder %v3980_v26, 0.0  ;;  %v4430_v55 = vmul.f32 0.2, %v3980_v26  ;;  %vm4301_vm1 = vcmp.gt.f32.partialorder %v3869_v2, 0.0 }
 0x3c2   : > { %v4556_v3 = vsel %vm4300_vm15, %v3867_v31, %v4428_v33  ;;  %v4429_v39 = vmul.f32 0.2, %v3869_v2  ;;  %vm4303_vm2 = vcmp.gt.f32.partialorder %v3982_v16, 0.0  ;;  %v4431_v22 = vmul.f32 0.2, %v3982_v16 }
 0x3c3   : > { %v4648_v42 = vmax.f32 %v4647_v12, %v4556_v3  ;;  %v4558_v57 = vsel %vm4302_vm0, %v3980_v26, %v4430_v55  ;;  %vm4308_vm3 = vcmp.gt.f32.partialorder %v3873_v23, 0.0  ;;  %v4436_v35 = vmul.f32 0.2, %v3873_v23 }
 0x3c4   : > { %v4674_v20 = vmax.f32 %v4673_v41, %v4558_v57  ;;  %v4557_v27 = vsel %vm4301_vm1, %v3869_v2, %v4429_v39  ;;  %v4559_v21 = vsel %vm4303_vm2, %v3982_v16, %v4431_v22  ;;  %v3986_v36 = vadd.f32 %v3985_v28, %v10895_v53 }
 0x3c5   : > { %v4661_v29 = vmax.f32 %v4660_v18, %v4557_v27  ;;  %v4687_v24 = vmax.f32 %v4686_v15, %v4559_v21  ;;  %v4564_v62 = vsel %vm4308_vm3, %v3873_v23, %v4436_v35  ;;  %v3875_v49 = vadd.f32 %v3874_v51, %v10899_v4  ;;  %v3882_v0 = vpop.f32.mrb[120].mxu0  ;;  %v3995_v38 = vpop.f32.mrb[168].mxu1 }
 0x3c6   : > { %v4649_v56 = vmax.f32 %v4648_v42, %v4564_v62  ;;  %vm4310_vm4 = vcmp.gt.f32.partialorder %v3986_v36, 0.0  ;;  %v4438_v43 = vmul.f32 0.2, %v3986_v36  ;;  %v3988_v25 = vadd.f32 %v3987_v9, %v10904_v5  ;;  %v3884_v19 = vpop.f32.mrb[121].mxu0  ;;  %v10944_v37 = vpop.f32.mrb[169].mxu1 }
 0x3c7   : > { %vm4309_vm5 = vcmp.gt.f32.partialorder %v3875_v49, 0.0  ;;  %v4437_v11 = vmul.f32 0.2, %v3875_v49  ;;  %v3877_v14 = vadd.f32 %v3876_v61, %v10890_v10  ;;  %v3990_v40 = vadd.f32 %v3989_v8, %v10895_v53  ;;  %v3886_v17 = vpop.f32.mrb[122].mxu0  ;;  %v3999_v47 = vpop.f32.mrb[170].mxu1 }
 0x3c8   : > { %v4566_v58 = vsel %vm4310_vm4, %v3986_v36, %v4438_v43  ;;  %vm4311_vm7 = vcmp.gt.f32.partialorder %v3988_v25, 0.0  ;;  %v4439_v12 = vmul.f32 0.2, %v3988_v25  ;;  %v3879_v44 = vadd.f32 %v3878_v34, %v10899_v4  ;;  %v10949_v54 = vpop.f32.mrb[123].mxu0  ;;  %v10951_v28 = vpop.f32.mrb[171].mxu1 }
 0x3c9   : > { %v4675_v41 = vmax.f32 %v4674_v20, %v4566_v58  ;;  %v4565_v60 = vsel %vm4309_vm5, %v3875_v49, %v4437_v11  ;;  %vm4316_vm6 = vcmp.gt.f32.partialorder %v3877_v14, 0.0  ;;  %v4444_v13 = vmul.f32 0.2, %v3877_v14 }
 0x3ca   : > { %v4662_v31 = vmax.f32 %v4661_v29, %v4565_v60  ;;  %v4567_v51 = vsel %vm4311_vm7, %v3988_v25, %v4439_v12  ;;  %vm4318_vm8 = vcmp.gt.f32.partialorder %v3990_v40, 0.0  ;;  %v4446_v9 = vmul.f32 0.2, %v3990_v40 }
 0x3cb   : > { %v4688_v18 = vmax.f32 %v4687_v24, %v4567_v51  ;;  %v4572_v26 = vsel %vm4316_vm6, %v3877_v14, %v4444_v13  ;;  %vm4317_vm9 = vcmp.gt.f32.partialorder %v3879_v44, 0.0  ;;  %v4445_v2 = vmul.f32 0.2, %v3879_v44 }
 0x3cc   : > { %v4650_v16 = vmax.f32 %v4649_v56, %v4572_v26  ;;  %v4574_v61 = vsel %vm4318_vm8, %v3990_v40, %v4446_v9  ;;  %v3992_v8 = vadd.f32 %v3991_v63, %v10904_v5  ;;  %v3883_v50 = vadd.f32 %v3882_v0, %v10890_v10 }
 0x3cd   : > { %v4676_v33 = vmax.f32 %v4675_v41, %v4574_v61  ;;  %v4573_v23 = vsel %vm4317_vm9, %v3879_v44, %v4445_v2  ;;  %v3996_v34 = vadd.f32 %v3995_v38, %v10895_v53  ;;  %v3885_v15 = vadd.f32 %v3884_v19, %v10899_v4  ;;  %v10957_v55 = vpop.f32.mrb[124].mxu0  ;;  %v10959_v3 = vpop.f32.mrb[172].mxu1 }
 0x3ce   : > { %v4651_v39 = vrot.slane %v4650_v16, 4  ;;  %v4663_v22 = vmax.f32 %v4662_v31, %v4573_v23  ;;  %vm4319_vm10 = vcmp.gt.f32.partialorder %v3992_v8, 0.0  ;;  %v4447_v42 = vmul.f32 0.2, %v3992_v8  ;;  %v10961_v57 = vpop.f32.mrb[125].mxu0  ;;  %v10963_v35 = vpop.f32.mrb[173].mxu1 }
 0x3cf   : > { %v4677_v63 = vrot.slane %v4676_v33, 4  ;;  %v10965_v20 = vpop.f32.mrb[126].mxu0  ;;  %v10970_v27 = vrot.slane %v10882_v48, %v3474_v45  ;;  %v10975_v21 = vrot.slane %v10882_v48, %v3470_v6  ;;  %v10980_v36 = vrot.slane %v10882_v48, %v3478_v59  ;;  %v10982_v0 = vpop.f32.mrb[174].mxu1 }
 0x3d0   : > { %v4652_v29 = vmax.f32 %v4650_v16, %v4651_v39  ;;  %v4664_v24 = vrot.slane %v4663_v22, 4  ;;  %v4575_v62 = vsel %vm4319_vm10, %v3992_v8, %v4447_v42  ;;  %v4452_v49 = vmul.f32 0.2, %v3883_v50  ;;  %v10984_v38 = vpop.f32.mrb[127].mxu0  ;;  %v10986_v43 = vpop.f32.mrb[175].mxu1 }
 0x3d1   : > { %v4678_v45 = vmax.f32 %v4676_v33, %v4677_v63  ;;  %v4689_v56 = vmax.f32 %v4688_v18, %v4575_v62  ;;  %vm4324_vm11 = vcmp.gt.f32.partialorder %v3883_v50, 0.0  ;;  %vm4326_vm12 = vcmp.gt.f32.partialorder %v3996_v34, 0.0 }
 0x3d2   : > { %v4653_v6 = vrot.slane %v4652_v29, 2  ;;  %v4665_v25 = vmax.f32 %v4663_v22, %v4664_v24  ;;  %v4454_v19 = vmul.f32 0.2, %v3996_v34  ;;  %v4453_v11 = vmul.f32 0.2, %v3885_v15 }
 0x3d3   : > { %v4679_v48 = vrot.slane %v4678_v45, 2  ;;  %v4690_v59 = vrot.slane %v4689_v56, 4  ;;  %v3998_v14 = vadd.f32 %v10944_v37, %v10904_v5  ;;  %v3887_v40 = vadd.f32 %v3886_v17, %v10890_v10 }
 0x3d4   : > { %v4654_v58 = vmax.f32 %v4652_v29, %v4653_v6  ;;  %v10991_v12 = vsel %vm4324_vm11, %v3883_v50, %v4452_v49  ;;  %vm4325_vm13 = vcmp.gt.f32.partialorder %v3885_v15, 0.0  ;;  %v4000_v44 = vadd.f32 %v3999_v47, %v10895_v53 }
 0x3d5   : > { %v4680_v41 = vmax.f32 %v4678_v45, %v4679_v48  ;;  %v4666_v60 = vrot.slane %v4665_v25, 2  ;;  %v10994_v13 = vmax.f32 %v4689_v56, %v4690_v59  ;;  %v4455_v31 = vmul.f32 0.2, %v3998_v14  ;;  %v10996_v51 = vpop.f32.mrb[128].mxu0  ;;  %v10998_v9 = vpop.f32.mrb[176].mxu1 }
 0x3d6   : > { %v4655_v18 = vrot.slane %v4654_v58, 1  ;;  %v4582_v37 = vsel %vm4326_vm12, %v3996_v34, %v4454_v19  ;;  %vm4332_vm14 = vcmp.gt.f32.partialorder %v3887_v40, 0.0  ;;  %v4460_v17 = vmul.f32 0.2, %v3887_v40  ;;  %v11001_v26 = vpop.f32.mrb[129].mxu0  ;;  %v11003_v2 = vpop.f32.mrb[177].mxu1 }
 0x3d7   : > { %v4681_v16 = vrot.slane %v4680_v41, 1  ;;  %v4581_v47 = vsel %vm4325_vm13, %v3885_v15, %v4453_v11  ;;  %vm4327_vm15 = vcmp.gt.f32.partialorder %v3998_v14, 0.0  ;;  %vm4334_vm0 = vcmp.gt.f32.partialorder %v4000_v44, 0.0  ;;  %v11005_v61 = vpop.f32.mrb[130].mxu0  ;;  %v11007_v8 = vpop.f32.mrb[178].mxu1 }
 0x3d8   : > { %v11009_v50 = vmax.f32 %v4654_v58, %v4655_v18  ;;  %v4588_v33 = vsel %vm4332_vm14, %v3887_v40, %v4460_v17  ;;  %v4462_v23 = vmul.f32 0.2, %v4000_v44  ;;  %v3889_v34 = vadd.f32 %v10949_v54, %v10899_v4  ;;  %v11013_v39 = vpop.f32.mrb[131].mxu0  ;;  %v11015_v22 = vpop.f32.mrb[179].mxu1 }
 0x3d9   : > { %v11017_v42 = vmax.f32 %v4665_v25, %v4666_v60  ;;  %v4692_v15 = vrot.slane %v10994_v13, 2  ;;  %v4748_v63 = vmax.f32 %v10991_v12, %v4588_v33  ;;  %v4002_v29 = vadd.f32 %v10951_v28, %v10904_v5 }
 0x3da   : > { %v4583_v24 = vsel %vm4327_vm15, %v3998_v14, %v4455_v31  ;;  %v4590_v62 = vsel %vm4334_vm0, %v4000_v44, %v4462_v23  ;;  %vm4333_vm1 = vcmp.gt.f32.partialorder %v3889_v34, 0.0  ;;  %v4461_v49 = vmul.f32 0.2, %v3889_v34 }
 0x3db   : > { %v11023_v45 = vmax.f32 %v4680_v41, %v4681_v16  ;;  %v4774_v54 = vmax.f32 %v4582_v37, %v4590_v62  ;;  %vm4335_vm2 = vcmp.gt.f32.partialorder %v4002_v29, 0.0  ;;  %v4463_v56 = vmul.f32 0.2, %v4002_v29 }
 0x3dc   : > { %v5108_v6 = vpack.c.bf16 %v11009_v50, %v11009_v50  ;;  %v4589_v25 = vsel %vm4333_vm1, %v3889_v34, %v4461_v49  ;;  %v3893_v19 = vadd.f32 %v10957_v55, %v10890_v10  ;;  %v4006_v11 = vadd.f32 %v10959_v3, %v10895_v53 }
 0x3dd   : > { %v4761_v28 = vmax.f32 %v4581_v47, %v4589_v25  ;;  %v4591_v48 = vsel %vm4335_vm2, %v4002_v29, %v4463_v56  ;;  %v3895_v59 = vadd.f32 %v10961_v57, %v10899_v4  ;;  %v4008_v14 = vadd.f32 %v10963_v35, %v10904_v5  ;;  %v11035_v40 = vpop.f32.mrb[132].mxu0  ;;  %v11037_v58 = vpop.f32.mrb[180].mxu1 }
 0x3de   : > { %v4787_v12 = vmax.f32 %v4583_v24, %v4591_v48  ;;  %vm4340_vm3 = vcmp.gt.f32.partialorder %v3893_v19, 0.0  ;;  %v4468_v44 = vmul.f32 0.2, %v3893_v19  ;;  %vm4342_vm4 = vcmp.gt.f32.partialorder %v4006_v11, 0.0  ;;  %v11039_v55 = vpop.f32.mrb[133].mxu0  ;;  %v11041_v41 = vpop.f32.mrb[181].mxu1 }
 0x3df   : > { %v4470_v3 = vmul.f32 0.2, %v4006_v11  ;;  %vm4341_vm5 = vcmp.gt.f32.partialorder %v3895_v59, 0.0  ;;  %v4469_v60 = vmul.f32 0.2, %v3895_v59  ;;  %vm4343_vm7 = vcmp.gt.f32.partialorder %v4008_v14, 0.0 }
 0x3e0   : > { %v4596_v57 = vsel %vm4340_vm3, %v3893_v19, %v4468_v44  ;;  %v4471_v31 = vmul.f32 0.2, %v4008_v14  ;;  %v3897_v35 = vadd.f32 %v10965_v20, %v10890_v10  ;;  %v4010_v18 = vadd.f32 %v10982_v0, %v10895_v53  ;;  %v11047_v37 = vpop.f32.mrb[134].mxu0  ;;  %v11049_v17 = vpop.f32.mrb[182].mxu1 }
 0x3e1   : > { %v4749_v16 = vmax.f32 %v4748_v63, %v4596_v57  ;;  %v4598_v47 = vsel %vm4342_vm4, %v4006_v11, %v4470_v3  ;;  %v4597_v33 = vsel %vm4341_vm5, %v3895_v59, %v4469_v60  ;;  %v3899_v23 = vadd.f32 %v10984_v38, %v10899_v4  ;;  %v11053_v34 = vpop.f32.mrb[135].mxu0  ;;  %v11055_v29 = vpop.f32.mrb[183].mxu1 }
 0x3e2   : > { %v4775_v24 = vmax.f32 %v4774_v54, %v4598_v47  ;;  %v4762_v62 = vmax.f32 %v4761_v28, %v4597_v33  ;;  %v4599_v20 = vsel %vm4343_vm7, %v4008_v14, %v4471_v31  ;;  %vm4348_vm6 = vcmp.gt.f32.partialorder %v3897_v35, 0.0 }
 0x3e3   : > { %v4788_v49 = vmax.f32 %v4787_v12, %v4599_v20  ;;  %v4476_v0 = vmul.f32 0.2, %v3897_v35  ;;  %vm4350_vm8 = vcmp.gt.f32.partialorder %v4010_v18, 0.0  ;;  %v4478_v56 = vmul.f32 0.2, %v4010_v18 }
 0x3e4   : > { %vm4349_vm9 = vcmp.gt.f32.partialorder %v3899_v23, 0.0  ;;  %v4477_v25 = vmul.f32 0.2, %v3899_v23  ;;  %v4012_v63 = vadd.f32 %v10986_v43, %v10904_v5  ;;  %v3903_v38 = vadd.f32 %v10996_v51, %v10890_v10 }
 0x3e5   : > { %v4604_v19 = vsel %vm4348_vm6, %v3897_v35, %v4476_v0  ;;  %v4606_v11 = vsel %vm4350_vm8, %v4010_v18, %v4478_v56  ;;  %v4016_v54 = vadd.f32 %v10998_v9, %v10895_v53  ;;  %v3905_v28 = vadd.f32 %v11001_v26, %v10899_v4  ;;  %v11065_v48 = vpop.f32.mrb[136].mxu0  ;;  %v11067_v59 = vpop.f32.mrb[184].mxu1 }
 0x3e6   : > { %v4750_v14 = vmax.f32 %v4749_v16, %v4604_v19  ;;  %v4776_v12 = vmax.f32 %v4775_v24, %v4606_v11  ;;  %v4605_v44 = vsel %vm4349_vm9, %v3899_v23, %v4477_v25  ;;  %vm4351_vm10 = vcmp.gt.f32.partialorder %v4012_v63, 0.0  ;;  %v11069_v43 = vpop.f32.mrb[137].mxu0  ;;  %v11071_v3 = vpop.f32.mrb[185].mxu1 }
 0x3e7   : > { %v4763_v51 = vmax.f32 %v4762_v62, %v4605_v44  ;;  %v4479_v60 = vmul.f32 0.2, %v4012_v63  ;;  %vm4356_vm11 = vcmp.gt.f32.partialorder %v3903_v38, 0.0  ;;  %v4484_v57 = vmul.f32 0.2, %v3903_v38  ;;  %v11073_v9 = vpop.f32.mrb[138].mxu0 }
 0x3e8   : > { %vm4358_vm12 = vcmp.gt.f32.partialorder %v4016_v54, 0.0  ;;  %v4486_v26 = vmul.f32 0.2, %v4016_v54  ;;  %vm4357_vm13 = vcmp.gt.f32.partialorder %v3905_v28, 0.0  ;;  %v4485_v31 = vmul.f32 0.2, %v3905_v28 }
 0x3e9   : > { %v4607_v35 = vsel %vm4351_vm10, %v4012_v63, %v4479_v60  ;;  %v4612_v18 = vsel %vm4356_vm11, %v3903_v38, %v4484_v57  ;;  %v4018_v16 = vadd.f32 %v11003_v2, %v10904_v5  ;;  %v3907_v47 = vadd.f32 %v11005_v61, %v10890_v10  ;;  %v11079_v33 = vpop.f32.mrb[186].mxu1  ;;  %v11081_v23 = vpop.f32.mrb[139].mxu0 }
 0x3ea   : > { %v4789_v24 = vmax.f32 %v4788_v49, %v4607_v35  ;;  %v4751_v62 = vmax.f32 %v4750_v14, %v4612_v18  ;;  %v4614_v20 = vsel %vm4358_vm12, %v4016_v54, %v4486_v26  ;;  %v4613_v0 = vsel %vm4357_vm13, %v3905_v28, %v4485_v31  ;;  %v11083_v56 = vpop.f32.mrb[187].mxu1 }
 0x3eb   : > { %v4777_v25 = vmax.f32 %v4776_v12, %v4614_v20  ;;  %v4764_v19 = vmax.f32 %v4763_v51, %v4613_v0  ;;  %vm4359_vm14 = vcmp.gt.f32.partialorder %v4018_v16, 0.0  ;;  %v4487_v63 = vmul.f32 0.2, %v4018_v16 }
 0x3ec   : > { %vm4364_vm15 = vcmp.gt.f32.partialorder %v3907_v47, 0.0  ;;  %v4492_v38 = vmul.f32 0.2, %v3907_v47  ;;  %v4020_v2 = vadd.f32 %v11007_v8, %v10895_v53  ;;  %v3909_v61 = vadd.f32 %v11013_v39, %v10899_v4 }
 0x3ed   : > { %v4615_v11 = vsel %vm4359_vm14, %v4018_v16, %v4487_v63  ;;  %v4022_v49 = vadd.f32 %v11015_v22, %v10904_v5  ;;  %v3913_v54 = vadd.f32 %v11035_v40, %v10890_v10  ;;  %v4026_v28 = vadd.f32 %v11037_v58, %v10895_v53  ;;  %v11095_v14 = vpop.f32.mrb[140].mxu0  ;;  %v11097_v12 = vpop.f32.mrb[188].mxu1 }
 0x3ee   : > { %v4790_v44 = vmax.f32 %v4789_v24, %v4615_v11  ;;  %v4620_v51 = vsel %vm4364_vm15, %v3907_v47, %v4492_v38  ;;  %vm4366_vm0 = vcmp.gt.f32.partialorder %v4020_v2, 0.0  ;;  %v4494_v8 = vmul.f32 0.2, %v4020_v2  ;;  %v11099_v60 = vpop.f32.mrb[141].mxu0  ;;  %v11101_v39 = vpop.f32.mrb[189].mxu1 }
 0x3ef   : > { %v4752_v57 = vmax.f32 %v4751_v62, %v4620_v51  ;;  %vm4365_vm1 = vcmp.gt.f32.partialorder %v3909_v61, 0.0  ;;  %v4493_v22 = vmul.f32 0.2, %v3909_v61  ;;  %vm4367_vm2 = vcmp.gt.f32.partialorder %v4022_v49, 0.0  ;;  %v11103_v40 = vpop.f32.mrb[142].mxu0  ;;  %v11105_v26 = vpop.f32.mrb[190].mxu1 }
 0x3f0   : > { %v4622_v58 = vsel %vm4366_vm0, %v4020_v2, %v4494_v8  ;;  %v4495_v31 = vmul.f32 0.2, %v4022_v49  ;;  %vm4372_vm3 = vcmp.gt.f32.partialorder %v3913_v54, 0.0  ;;  %v4500_v35 = vmul.f32 0.2, %v3913_v54  ;;  %v11107_v18 = vpop.f32.mrb[143].mxu0 }
 0x3f1   : > { %v4778_v16 = vmax.f32 %v4777_v25, %v4622_v58  ;;  %v4621_v47 = vsel %vm4365_vm1, %v3909_v61, %v4493_v22  ;;  %vm4374_vm4 = vcmp.gt.f32.partialorder %v4026_v28, 0.0  ;;  %v4502_v24 = vmul.f32 0.2, %v4026_v28  ;;  %v11109_v20 = vpop.f32.mrb[191].mxu1 }
 0x3f2   : > { %v4765_v62 = vmax.f32 %v4764_v19, %v4621_v47  ;;  %v4623_v0 = vsel %vm4367_vm2, %v4022_v49, %v4495_v31  ;;  %v4628_v63 = vsel %vm4372_vm3, %v3913_v54, %v4500_v35  ;;  %v3915_v38 = vadd.f32 %v11039_v55, %v10899_v4 }
 0x3f3   : > { %v4791_v11 = vmax.f32 %v4790_v44, %v4623_v0  ;;  %v4753_v51 = vmax.f32 %v4752_v57, %v4628_v63  ;;  %v4630_v2 = vsel %vm4374_vm4, %v4026_v28, %v4502_v24  ;;  %v4028_v8 = vadd.f32 %v11041_v41, %v10904_v5 }
 0x3f4   : > { %v4779_v46 = vmax.f32 %v4778_v16, %v4630_v2  ;;  %vm4373_vm5 = vcmp.gt.f32.partialorder %v3915_v38, 0.0  ;;  %v4501_v25 = vmul.f32 0.2, %v3915_v38  ;;  %v3917_v61 = vadd.f32 %v11047_v37, %v10890_v10 }
 0x3f5   : > { %vm4375_vm7 = vcmp.gt.f32.partialorder %v4028_v8, 0.0  ;;  %v4503_v22 = vmul.f32 0.2, %v4028_v8  ;;  %v4030_v19 = vadd.f32 %v11049_v17, %v10895_v53  ;;  %v3919_v55 = vadd.f32 %v11053_v34, %v10899_v4  ;;  %v11121_v49 = vpop.f32.mrb[144].mxu0  ;;  %v11123_v54 = vpop.f32.mrb[192].mxu1 }
 0x3f6   : > { %v4629_v28 = vsel %vm4373_vm5, %v3915_v38, %v4501_v25  ;;  %vm4380_vm6 = vcmp.gt.f32.partialorder %v3917_v61, 0.0  ;;  %v4508_v41 = vmul.f32 0.2, %v3917_v61  ;;  %v4032_v44 = vadd.f32 %v11055_v29, %v10904_v5  ;;  %v11127_v57 = vpop.f32.mrb[145].mxu0  ;;  %v11129_v10 = vpop.f32.mrb[193].mxu1 }
 0x3f7   : > { %v4766_v37 = vmax.f32 %v4765_v62, %v4629_v28  ;;  %v4631_v58 = vsel %vm4375_vm7, %v4028_v8, %v4503_v22  ;;  %vm4382_vm8 = vcmp.gt.f32.partialorder %v4030_v19, 0.0  ;;  %v4510_v53 = vmul.f32 0.2, %v4030_v19  ;;  %v11131_v17 = vpop.f32.mrb[146].mxu0  ;;  %v11133_v4 = vpop.f32.mrb[194].mxu1 }
 0x3f8   : > { %v4792_v34 = vmax.f32 %v4791_v11, %v4631_v58  ;;  %v4636_v31 = vsel %vm4380_vm6, %v3917_v61, %v4508_v41  ;;  %vm4381_vm9 = vcmp.gt.f32.partialorder %v3919_v55, 0.0  ;;  %v4509_v35 = vmul.f32 0.2, %v3919_v55  ;;  %v11135_v16 = vpop.f32.mrb[147].mxu0  ;;  %v11137_v47 = vpop.f32.mrb[195].mxu1 }
 0x3f9   : > { %v4754_v5 = vmax.f32 %v4753_v51, %v4636_v31  ;;  %v4638_v29 = vsel %vm4382_vm8, %v4030_v19, %v4510_v53  ;;  %vm4383_vm10 = vcmp.gt.f32.partialorder %v4032_v44, 0.0  ;;  %v4511_v24 = vmul.f32 0.2, %v4032_v44 }
 0x3fa   : > { %v4780_v62 = vmax.f32 %v4779_v46, %v4638_v29  ;;  %v4637_v0 = vsel %vm4381_vm9, %v3919_v55, %v4509_v35  ;;  %v4069_v63 = vadd.f32 %v11065_v48, %v10917_v1  ;;  %v4182_v38 = vadd.f32 %v11067_v59, %v10970_v27 }
 0x3fb   : > { %v4755_v11 = vrot.slane %v4754_v5, 4  ;;  %v4767_v2 = vmax.f32 %v4766_v37, %v4637_v0  ;;  %v4639_v8 = vsel %vm4383_vm10, %v4032_v44, %v4511_v24  ;;  %v4071_v25 = vadd.f32 %v11069_v43, %v10975_v21 }
 0x3fc   : > { %v11148_v51 = vunpack.c.l.b16 %v5108_v6  ;;  %v11153_v46 = vmax.f32 %v10994_v13, %v4692_v15  ;;  %v4781_v48 = vrot.slane %v4780_v62, 4  ;;  %v4793_v61 = vmax.f32 %v4792_v34, %v4639_v8 }
 0x3fd   : > { %v4756_v22 = vmax.f32 %v4754_v5, %v4755_v11  ;;  %v4768_v59 = vrot.slane %v4767_v2, 4  ;;  %vm4264_vm11 = vcmp.gt.f32.partialorder %v4069_v63, 0.0  ;;  %v4392_v19 = vmul.f32 0.2, %v4069_v63  ;;  %v11155_v55 = vpop.f32.mrb[148].mxu0  ;;  %v11157_v28 = vpop.f32.mrb[196].mxu1 }
 0x3fe   : > { %v4782_v43 = vmax.f32 %v4780_v62, %v4781_v48  ;;  %v4794_v41 = vrot.slane %v4793_v61, 4  ;;  %vm4266_vm12 = vcmp.gt.f32.partialorder %v4182_v38, 0.0  ;;  %v4394_v50 = vmul.f32 0.2, %v4182_v38  ;;  %v11159_v6 = vpop.f32.mrb[149].mxu0  ;;  %v11161_v44 = vpop.f32.mrb[197].mxu1 }
 0x3ff   : > { %v4757_v13 = vrot.slane %v4756_v22, 2  ;;  %v4769_v15 = vmax.f32 %v4767_v2, %v4768_v59  ;;  %vm4265_vm13 = vcmp.gt.f32.partialorder %v4071_v25, 0.0  ;;  %v4393_v37 = vmul.f32 0.2, %v4071_v25  ;;  %v11163_v58 = vpop.f32.mrb[150].mxu0  ;;  %v11165_v53 = vpop.f32.mrb[198].mxu1 }
 0x400   : > { %v4783_v34 = vrot.slane %v4782_v43, 2  ;;  %v4795_v31 = vmax.f32 %v4793_v61, %v4794_v41  ;;  %v4184_v35 = vadd.f32 %v11071_v3, %v10980_v36  ;;  %v4073_v5 = vadd.f32 %v11073_v9, %v10917_v1  ;;  %v11171_v29 = vpop.f32.mrb[151].mxu0  ;;  %v11173_v24 = vpop.f32.mrb[199].mxu1 }
 0x401   : > { %v4758_v62 = vmax.f32 %v4756_v22, %v4757_v13  ;;  %v4770_v0 = vrot.slane %v4769_v15, 2  ;;  %v4520_v11 = vsel %vm4264_vm11, %v4069_v63, %v4392_v19  ;;  %v4186_v2 = vadd.f32 %v11079_v33, %v10970_v27 }
 0x402   : > { %v11178_v8 = vmax.f32 %v4782_v43, %v4783_v34  ;;  %v4796_v48 = vrot.slane %v4795_v31, 2  ;;  %v4522_v61 = vsel %vm4266_vm12, %v4182_v38, %v4394_v50  ;;  %v11182_v3 = vsel %vm4265_vm13, %v4071_v25, %v4393_v37 }
 0x403   : > { %v4759_v9 = vrot.slane %v4758_v62, 1  ;;  %vm4267_vm14 = vcmp.gt.f32.partialorder %v4184_v35, 0.0  ;;  %vm4272_vm15 = vcmp.gt.f32.partialorder %v4073_v5, 0.0  ;;  %v4400_v59 = vmul.f32 0.2, %v4073_v5 }
 0x404   : > { %v11185_v41 = vmax.f32 %v4769_v15, %v4770_v0  ;;  %v4395_v63 = vmul.f32 0.2, %v4184_v35  ;;  %vm4274_vm0 = vcmp.gt.f32.partialorder %v4186_v2, 0.0  ;;  %v4402_v43 = vmul.f32 0.2, %v4186_v2 }
 0x405   : > { %v4760_v19 = vmax.f32 %v4758_v62, %v4759_v9  ;;  %v4528_v33 = vsel %vm4272_vm15, %v4073_v5, %v4400_v59  ;;  %v4075_v13 = vadd.f32 %v11081_v23, %v10975_v21  ;;  %v11189_v38 = vpop.f32.mrb[152].mxu0  ;;  %v11191_v25 = vpop.f32.mrb[200].mxu1  ;;  %v11193_v50 = vmax.f32 %v4795_v31, %v4796_v48 }
 0x406   : > { %v4696_v37 = vmax.f32 %v4520_v11, %v4528_v33  ;;  %v4188_v34 = vadd.f32 %v11083_v56, %v10980_v36  ;;  %v4079_v15 = vadd.f32 %v11095_v14, %v10917_v1  ;;  %v11199_v0 = vpop.f32.mrb[153].mxu0  ;;  %v11201_v5 = vpop.f32.mrb[201].mxu1  ;;  %v4530_v9 = vsel %vm4274_vm0, %v4186_v2, %v4402_v43 }
 0x407   : > { %v5116_v62 = vpack.c.bf16 %v4760_v19, %v4760_v19  ;;  %vm4273_vm1 = vcmp.gt.f32.partialorder %v4075_v13, 0.0  ;;  %v4401_v23 = vmul.f32 0.2, %v4075_v13  ;;  %v11203_v59 = vpop.f32.mrb[154].mxu0  ;;  %v11205_v32 = vpop.f32.mrb[202].mxu1  ;;  %v4523_v31 = vsel %vm4267_vm14, %v4184_v35, %v4395_v63 }
 0x408   : > { %v4722_v11 = vmax.f32 %v4522_v61, %v4530_v9  ;;  %vm4275_vm2 = vcmp.gt.f32.partialorder %v4188_v34, 0.0  ;;  %v4403_v56 = vmul.f32 0.2, %v4188_v34  ;;  %v11208_v48 = vpop.f32.mrb[155].mxu0  ;;  %v11210_v14 = vpop.f32.mrb[203].mxu1  ;;  %vm4280_vm3 = vcmp.gt.f32.partialorder %v4079_v15, 0.0 }
 0x409   : > { %v11212_v33 = vunpack.c.l.b16 %v5116_v62  ;;  %v4529_v22 = vsel %vm4273_vm1, %v4075_v13, %v4401_v23  ;;  %v4408_v2 = vmul.f32 0.2, %v4079_v15  ;;  %v4192_v30 = vadd.f32 %v11097_v12, %v10970_v27 }
 0x40a   : > { %v4709_v19 = vmax.f32 %v11182_v3, %v4529_v22  ;;  %v4531_v43 = vsel %vm4275_vm2, %v4188_v34, %v4403_v56  ;;  %v4081_v35 = vadd.f32 %v11099_v60, %v10975_v21  ;;  %v4194_v9 = vadd.f32 %v11101_v39, %v10980_v36 }
 0x40b   : > { %v4735_v61 = vmax.f32 %v4523_v31, %v4531_v43  ;;  %v4536_v63 = vsel %vm4280_vm3, %v4079_v15, %v4408_v2  ;;  %v4083_v62 = vadd.f32 %v11103_v40, %v10917_v1  ;;  %vm4282_vm4 = vcmp.gt.f32.partialorder %v4192_v30, 0.0 }
 0x40c   : > { %v4697_v13 = vmax.f32 %v4696_v37, %v4536_v63  ;;  %v4410_v23 = vmul.f32 0.2, %v4192_v30  ;;  %vm4281_vm5 = vcmp.gt.f32.partialorder %v4081_v35, 0.0  ;;  %v4409_v3 = vmul.f32 0.2, %v4081_v35 }
 0x40d   : > { %vm4283_vm7 = vcmp.gt.f32.partialorder %v4194_v9, 0.0  ;;  %v4411_v22 = vmul.f32 0.2, %v4194_v9  ;;  %vm4288_vm6 = vcmp.gt.f32.partialorder %v4083_v62, 0.0  ;;  %v4416_v34 = vmul.f32 0.2, %v4083_v62 }
 0x40e   : > { %v4538_v12 = vsel %vm4282_vm4, %v4192_v30, %v4410_v23  ;;  %v4196_v60 = vadd.f32 %v11105_v26, %v10970_v27  ;;  %v4085_v15 = vadd.f32 %v11107_v18, %v10975_v21  ;;  %v11227_v39 = vpop.f32.mrb[156].mxu0  ;;  %v11229_v31 = vpop.f32.mrb[204].mxu1  ;;  %v4537_v37 = vsel %vm4281_vm5, %v4081_v35, %v4409_v3 }
 0x40f   : > { %v4723_v40 = vmax.f32 %v4722_v11, %v4538_v12  ;;  %v4539_v56 = vsel %vm4283_vm7, %v4194_v9, %v4411_v22  ;;  %v4198_v2 = vadd.f32 %v11109_v20, %v10980_v36  ;;  %v11233_v43 = vpop.f32.mrb[157].mxu0  ;;  %v11235_v30 = vpop.f32.mrb[205].mxu1  ;;  %v4710_v63 = vmax.f32 %v4709_v19, %v4537_v37 }
 0x410   : > { %v4736_v23 = vmax.f32 %v4735_v61, %v4539_v56  ;;  %v4544_v26 = vsel %vm4288_vm6, %v4083_v62, %v4416_v34  ;;  %vm4290_vm8 = vcmp.gt.f32.partialorder %v4196_v60, 0.0  ;;  %vm5178_vm9 = vcmask 1041409   ;;  %v11237_v18 = vpop.f32.mrb[158].mxu0  ;;  %v11239_v52 = vpop.f32.mrb[206].mxu1 }
 0x411   : > { %11787 = vst [vmem:[#allocation8_spill] sm:$0xff] %v11239_v52  ;;  %v4698_v7 = vmax.f32 %v4697_v13, %v4544_v26  ;;  %v4418_v11 = vmul.f32 0.2, %v4196_v60  ;;  %vm4289_vm10 = vcmp.gt.f32.partialorder %v4085_v15, 0.0  ;;  %v4417_v35 = vmul.f32 0.2, %v4085_v15 }
 0x412   : > { %v11241_v9 = vpop.f32.mrb[159].mxu0  ;;  %vm4291_vm11 = vcmp.gt.f32.partialorder %v4198_v2, 0.0  ;;  %v4419_v20 = vmul.f32 0.2, %v4198_v2  ;;  %v4089_v3 = vadd.f32 %v11121_v49, %v10917_v1  ;;  %v4202_v19 = vadd.f32 %v11123_v54, %v10970_v27  ;;  %v11247_v61 = vpop.f32.mrb[207].mxu1 }
 0x413   : > { %11788 = vst [vmem:[#allocation9_spill] sm:$0xff] %v11241_v9  ;;  %v4546_v62 = vsel %vm4290_vm8, %v4196_v60, %v4418_v11  ;;  %v4545_v22 = vsel %vm4289_vm10, %v4085_v15, %v4417_v35  ;;  %v4091_v13 = vadd.f32 %v11127_v57, %v10975_v21  ;;  %v4204_v12 = vadd.f32 %v11129_v10, %v10980_v36 }
 0x414   : > { %v4724_v34 = vmax.f32 %v4723_v40, %v4546_v62  ;;  %v4711_v37 = vmax.f32 %v4710_v63, %v4545_v22  ;;  %v4547_v56 = vsel %vm4291_vm11, %v4198_v2, %v4419_v20  ;;  %vm4296_vm12 = vcmp.gt.f32.partialorder %v4089_v3, 0.0 }
 0x415   : > { %v4737_v26 = vmax.f32 %v4736_v23, %v4547_v56  ;;  %v4424_v9 = vmul.f32 0.2, %v4089_v3  ;;  %vm4298_vm13 = vcmp.gt.f32.partialorder %v4202_v19, 0.0  ;;  %v4426_v49 = vmul.f32 0.2, %v4202_v19  ;;  %v11253_v52 = vpop.f32.mrb[160].mxu0 }
 0x416   : > { %vm4297_vm14 = vcmp.gt.f32.partialorder %v4091_v13, 0.0  ;;  %v4425_v54 = vmul.f32 0.2, %v4091_v13  ;;  %vm4299_vm15 = vcmp.gt.f32.partialorder %v4204_v12, 0.0  ;;  %v4427_v60 = vmul.f32 0.2, %v4204_v12 }
 0x417   : > { %v4552_v15 = vsel %vm4296_vm12, %v4089_v3, %v4424_v9  ;;  %v4554_v11 = vsel %vm4298_vm13, %v4202_v19, %v4426_v49  ;;  %v4093_v57 = vadd.f32 %v11131_v17, %v10917_v1  ;;  %v4206_v10 = vadd.f32 %v11133_v4, %v10970_v27  ;;  %v11259_v40 = vpop.f32.mrb[208].mxu1  ;;  %v11261_v2 = vpop.f32.mrb[161].mxu0 }
 0x418   : > { %v4699_v63 = vmax.f32 %v4698_v7, %v4552_v15  ;;  %v11263_v23 = vmax.f32 %v4724_v34, %v4554_v11  ;;  %v4553_v35 = vsel %vm4297_vm14, %v4091_v13, %v4425_v54  ;;  %v4555_v20 = vsel %vm4299_vm15, %v4204_v12, %v4427_v60  ;;  %v11265_v62 = vpop.f32.mrb[209].mxu1  ;;  %v11267_v22 = vpop.f32.mrb[162].mxu0 }
 0x419   : > { %v11269_v9 = vmax.f32 %v4711_v37, %v4553_v35  ;;  %v11271_v3 = vmax.f32 %v4737_v26, %v4555_v20  ;;  %vm4304_vm0 = vcmp.gt.f32.partialorder %v4093_v57, 0.0  ;;  %v4432_v17 = vmul.f32 0.2, %v4093_v57  ;;  %v11273_v4 = vpop.f32.mrb[210].mxu1  ;;  %v11275_v19 = vpop.f32.mrb[163].mxu0 }
 0x41a   : > { %vm4306_vm1 = vcmp.gt.f32.partialorder %v4206_v10, 0.0  ;;  %v4434_v7 = vmul.f32 0.2, %v4206_v10  ;;  %v4095_v13 = vadd.f32 %v11135_v16, %v10975_v21  ;;  %v4208_v12 = vadd.f32 %v11137_v47, %v10980_v36  ;;  %v11281_v34 = vpop.f32.mrb[211].mxu1 }
 0x41b   : > { %11789 = vst [vmem:[#allocation10_spill] sm:$0xff] %v11281_v34  ;;  %v4560_v37 = vsel %vm4304_vm0, %v4093_v57, %v4432_v17  ;;  %v4668_v56 = vrot.slane %v11017_v42, 1  ;;  %v4772_v26 = vrot.slane %v11185_v41, 1  ;;  %v5179_v49 = vsel %vm5178_vm9, %v11212_v33, %v11148_v51 }
 0x41c   : > { %v4700_v54 = vmax.f32 %v4699_v63, %v4560_v37  ;;  %v4562_v60 = vsel %vm4306_vm1, %v4206_v10, %v4434_v7  ;;  %vm4305_vm2 = vcmp.gt.f32.partialorder %v4095_v13, 0.0  ;;  %v4433_v15 = vmul.f32 0.2, %v4095_v13 }
 0x41d   : > { %v4726_v16 = vmax.f32 %v11263_v23, %v4562_v60  ;;  %vm4307_vm3 = vcmp.gt.f32.partialorder %v4208_v12, 0.0  ;;  %v4435_v11 = vmul.f32 0.2, %v4208_v12  ;;  %v4669_v47 = vmax.f32 %v11017_v42, %v4668_v56  ;;  %v11290_v35 = vpop.f32.mrb[164].mxu0  ;;  %v11292_v57 = vpop.f32.mrb[212].mxu1 }
 0x41e   : > { %v4561_v20 = vsel %vm4305_vm2, %v4095_v13, %v4433_v15  ;;  %v4773_v17 = vmax.f32 %v11185_v41, %v4772_v26  ;;  %v5187_v34 = vpack.c.b16 %v5179_v49, %v5179_v49  ;;  %v4099_v51 = vadd.f32 %v11155_v55, %v10917_v1  ;;  %v11297_v33 = vpop.f32.mrb[165].mxu0  ;;  %v11299_v10 = vpop.f32.mrb[213].mxu1 }
 0x41f   : > { %v4713_v63 = vmax.f32 %v11269_v9, %v4561_v20  ;;  %v4563_v23 = vsel %vm4307_vm3, %v4208_v12, %v4435_v11  ;;  %v5109_v7 = vpack.c.bf16 %v4669_v47, %v4669_v47  ;;  %v4212_v42 = vadd.f32 %v11157_v28, %v10970_v27  ;;  %v11304_v37 = vpop.f32.mrb[166].mxu0  ;;  %v11306_v13 = vpop.f32.mrb[214].mxu1 }
 0x420   : > { %11790 = vst [vmem:[#allocation11_spill] sm:$0xff] %v11304_v37  ;;  %11791 = vst [vmem:[#allocation12_spill] sm:$0xff] %v11306_v13  ;;  %v4739_v41 = vmax.f32 %v11271_v3, %v4563_v23  ;;  %v5117_v56 = vpack.c.bf16 %v4773_v17, %v4773_v17  ;;  %vm4312_vm4 = vcmp.gt.f32.partialorder %v4099_v51, 0.0  ;;  %v4440_v55 = vmul.f32 0.2, %v4099_v51  ;;  %v11309_v26 = vpop.f32.mrb[167].mxu0 }
 0x421   : > { %11792 = vst [vmem:[#allocation13_spill] sm:$0xff] %v11309_v26  ;;  %v11311_v49 = vpop.f32.mrb[215].mxu1  ;;  %v5163_v60 = vunpack.c.l.b16 %v5109_v7  ;;  %vm4314_vm5 = vcmp.gt.f32.partialorder %v4212_v42, 0.0  ;;  %v4442_v9 = vmul.f32 0.2, %v4212_v42  ;;  %v4694_v12 = vrot.slane %v11153_v46, 1 }
 0x422   : > { %11793 = vst [vmem:[#allocation14_spill] sm:$0xff] %v11311_v49  ;;  %v5171_v15 = vunpack.c.l.b16 %v5117_v56  ;;  %v4568_v28 = vsel %vm4312_vm4, %v4099_v51, %v4440_v55  ;;  %v4798_v11 = vrot.slane %v11193_v50, 1  ;;  %v4101_v47 = vadd.f32 %v11159_v6, %v10975_v21  ;;  %v8811_v49 = vld [vmem:[#allocation2 + $0x200] ss:$16 sps:$4 sm:$0xff]   ;;  %v8814_v56 = vld [vmem:[#allocation2 + $0x208] ss:$16 sps:$4 sm:$0xff]  }
 0x423   : > { %v4701_v3 = vmax.f32 %v4700_v54, %v4568_v28  ;;  %v4570_v20 = vsel %vm4314_vm5, %v4212_v42, %v4442_v9  ;;  %v4695_v17 = vmax.f32 %v11153_v46, %v4694_v12  ;;  %v4214_v23 = vadd.f32 %v11161_v44, %v10980_v36  ;;  %v8819_v42 = vld [vmem:[#allocation2 + $0x224] ss:$16 sps:$4 sm:$0xff]  }
 0x424   : > { %v5180_v7 = vsel %vm5178_vm9, %v5171_v15, %v5163_v60  ;;  %v4727_v26 = vmax.f32 %v4726_v16, %v4570_v20  ;;  %v4799_v13 = vmax.f32 %v11193_v50, %v4798_v11  ;;  %vm4313_vm7 = vcmp.gt.f32.partialorder %v4101_v47, 0.0  ;;  %v8822_v60 = vld [vmem:[#allocation2 + $0x22c] ss:$16 sps:$4 sm:$0xff]  }
 0x425   : > { %v5188_v51 = vpack.c.b16 %v5180_v7, %v5180_v7  ;;  %v5111_v55 = vpack.c.bf16 %v4695_v17, %v4695_v17  ;;  %v4441_v37 = vmul.f32 0.2, %v4101_v47  ;;  %vm4315_vm6 = vcmp.gt.f32.partialorder %v4214_v23, 0.0 }
 0x426   : > { %v5119_v6 = vpack.c.bf16 %v4799_v13, %v4799_v13  ;;  %v4443_v54 = vmul.f32 0.2, %v4214_v23  ;;  %v4103_v46 = vadd.f32 %v11163_v58, %v10917_v1  ;;  %v4216_v44 = vadd.f32 %v11165_v53, %v10970_v27  ;;  %v8817_v53 = vld [vmem:[#allocation2 + $0x220] ss:$16 sps:$4 sm:$0xff]  }
 0x427   : > { %6515 = vmatprep.mubr.bf16.mxu0 %v5188_v51  ;;  %6679 = vmatprep.mubr.bf16.mxu1 %v5188_v51  ;;  %v5165_v16 = vunpack.c.l.b16 %v5111_v55  ;;  %v4569_v50 = vsel %vm4313_vm7, %v4101_v47, %v4441_v37  ;;  %v4105_v9 = vadd.f32 %v11171_v29, %v10975_v21  ;;  %v4218_v12 = vadd.f32 %v11173_v24, %v10980_v36  ;;  %v8820_v29 = vld [vmem:[#allocation2 + $0x228] ss:$16 sps:$4 sm:$0xff]  }
 0x428   : > { %6516 = vmatmul.mubr.bf16.vlgmr.msra.gmra.mrb[168].mxu0 %v5187_v34  ;;  %6680 = vmatmul.mubr.bf16.vlgmr.msra.gmra.mrb[216].mxu1 %v5187_v34  ;;  %v5173_v13 = vunpack.c.l.b16 %v5119_v6  ;;  %v4714_v15 = vmax.f32 %v4713_v63, %v4569_v50  ;;  %v4571_v58 = vsel %vm4315_vm6, %v4214_v23, %v4443_v54  ;;  %vm4320_vm8 = vcmp.gt.f32.partialorder %v4103_v46, 0.0  ;;  %v8825_v23 = vld [vmem:[#allocation2 + $0x244] ss:$16 sps:$4 sm:$0xff]   ;;  %v8823_v54 = vld [vmem:[#allocation2 + $0x240] ss:$16 sps:$4 sm:$0xff]  }
 0x429   : > { %6525 = vmatpush1.bf16.msra.mxu0 %v8811_v49  ;;  %6689 = vmatpush1.bf16.msra.mxu1 %v8814_v56  ;;  %v4740_v28 = vmax.f32 %v4739_v41, %v4571_v58  ;;  %v4448_v11 = vmul.f32 0.2, %v4103_v46  ;;  %vm4322_vm10 = vcmp.gt.f32.partialorder %v4216_v44, 0.0  ;;  %v4450_v37 = vmul.f32 0.2, %v4216_v44 }
 0x42a   : > { %v5182_v47 = vsel %vm5178_vm9, %v5173_v13, %v5165_v16  ;;  %6526 = vmatprep.subr.bf16.mxu0 %v8819_v42  ;;  %6690 = vmatprep.subr.bf16.mxu1 %v8822_v60  ;;  %vm4321_vm11 = vcmp.gt.f32.partialorder %v4105_v9, 0.0  ;;  %v4449_v24 = vmul.f32 0.2, %v4105_v9  ;;  %vm4323_vm12 = vcmp.gt.f32.partialorder %v4218_v12, 0.0  ;;  %v8828_v49 = vld [vmem:[#allocation2 + $0x24c] ss:$16 sps:$4 sm:$0xff]  }
 0x42b   : > { %v5190_v34 = vpack.c.b16 %v5182_v47, %v5182_v47  ;;  %v4576_v63 = vsel %vm4320_vm8, %v4103_v46, %v4448_v11  ;;  %v4578_v20 = vsel %vm4322_vm10, %v4216_v44, %v4450_v37  ;;  %v4451_v17 = vmul.f32 0.2, %v4218_v12  ;;  %v8829_v47 = vld [vmem:[#allocation2 + $0x260] ss:$16 sps:$4 sm:$0xff]  }
 0x42c   : > { %v4702_v7 = vmax.f32 %v4701_v3, %v4576_v63  ;;  %v4728_v41 = vmax.f32 %v4727_v26, %v4578_v20  ;;  %v4577_v51 = vsel %vm4321_vm11, %v4105_v9, %v4449_v24  ;;  %v4109_v56 = vadd.f32 %v11189_v38, %v10917_v1  ;;  %v8826_v26 = vld [vmem:[#allocation2 + $0x248] ss:$16 sps:$4 sm:$0xff]   ;;  %v8831_v3 = vld [vmem:[#allocation2 + $0x264] ss:$16 sps:$4 sm:$0xff]   ;;  %v8840_v20 = vld [vmem:[#allocation2 + $0x28c] ss:$16 sps:$4 sm:$0xff]  }
 0x42d   : > { %6556 = vmatprep.mubr.bf16.mxu0 %v5190_v34  ;;  %6720 = vmatprep.mubr.bf16.mxu1 %v5190_v34  ;;  %v4715_v55 = vmax.f32 %v4714_v15, %v4577_v51  ;;  %v4579_v6 = vsel %vm4323_vm12, %v4218_v12, %v4451_v17  ;;  %v4222_v42 = vadd.f32 %v11191_v25, %v10970_v27  ;;  %v11794_v38 = vrot.slane %v11178_v8, 1  ;;  %v8834_v12 = vld [vmem:[#allocation2 + $0x26c] ss:$16 sps:$4 sm:$0xff]   ;;  %v8837_v63 = vld [vmem:[#allocation2 + $0x284] ss:$16 sps:$4 sm:$0xff]  }
 0x42e   : > { %v5110_v46 = vpack.c.bf16 %v11023_v45, %v11023_v45  ;;  %v4703_v44 = vrot.slane %v4702_v7, 4  ;;  %v4729_v60 = vrot.slane %v4728_v41, 4  ;;  %v4741_v16 = vmax.f32 %v4740_v28, %v4579_v6  ;;  %6527 = vmatpush1.bf16.msra.mxu0 %v8817_v53  ;;  %6691 = vmatpush1.bf16.msra.mxu1 %v8820_v29  ;;  %v8832_v29 = vld [vmem:[#allocation2 + $0x268] ss:$16 sps:$4 sm:$0xff]  }
 0x42f   : > { %v11342_v50 = vmax.f32 %v11178_v8, %v11794_v38  ;;  %v4716_v9 = vrot.slane %v4715_v55, 4  ;;  %6528 = vmatprep.subr.bf16.mxu0 %v8825_v23  ;;  %6692 = vmatprep.subr.bf16.mxu1 %v8828_v49  ;;  %vm4328_vm13 = vcmp.gt.f32.partialorder %v4109_v56, 0.0  ;;  %v4456_v25 = vmul.f32 0.2, %v4109_v56 }
 0x430   : > { %v4704_v13 = vmax.f32 %v4702_v7, %v4703_v44  ;;  %v4730_v45 = vmax.f32 %v4728_v41, %v4729_v60  ;;  %v4742_v15 = vrot.slane %v4741_v16, 4  ;;  %v4458_v58 = vmul.f32 0.2, %v4222_v42  ;;  %v8835_v7 = vld [vmem:[#allocation2 + $0x280] ss:$16 sps:$4 sm:$0xff]  }
 0x431   : > { %v4717_v28 = vmax.f32 %v4715_v55, %v4716_v9  ;;  %vm4330_vm14 = vcmp.gt.f32.partialorder %v4222_v42, 0.0  ;;  %v4111_v53 = vadd.f32 %v11199_v0, %v10975_v21  ;;  %v4224_v11 = vadd.f32 %v11201_v5, %v10980_v36 }
 0x432   : > { %v4705_v8 = vrot.slane %v4704_v13, 2  ;;  %v4731_v37 = vrot.slane %v4730_v45, 2  ;;  %6529 = vmatpush1.bf16.msra.mxu0 %v8823_v54  ;;  %6693 = vmatpush1.bf16.msra.mxu1 %v8826_v26  ;;  %v5118_v24 = vpack.c.bf16 %v11342_v50, %v11342_v50  ;;  %v11351_v34 = vsel %vm4328_vm13, %v4109_v56, %v4456_v25  ;;  %v8838_v56 = vld [vmem:[#allocation2 + $0x288] ss:$16 sps:$4 sm:$0xff]  }
 0x433   : > { %6530 = vmatprep.subr.bf16.mxu0 %v8831_v3  ;;  %6694 = vmatprep.subr.bf16.mxu1 %v8834_v12  ;;  %v11353_v0 = vunpack.c.l.b16 %v5110_v46  ;;  %v4718_v17 = vrot.slane %v4717_v28, 2  ;;  %v11355_v5 = vmax.f32 %v4741_v16, %v4742_v15  ;;  %v11358_v23 = vsel %vm4330_vm14, %v4222_v42, %v4458_v58  ;;  %v8843_v42 = vld [vmem:[#allocation2 + $0x2a4] ss:$16 sps:$4 sm:$0xff]   ;;  %v8846_v3 = vld [vmem:[#allocation2 + $0x2ac] ss:$16 sps:$4 sm:$0xff]  }
 0x434   : > { %v4113_v49 = vadd.f32 %v11203_v59, %v10917_v1  ;;  %vm4329_vm15 = vcmp.gt.f32.partialorder %v4111_v53, 0.0  ;;  %v4457_v41 = vmul.f32 0.2, %v4111_v53  ;;  %vm4331_vm0 = vcmp.gt.f32.partialorder %v4224_v11, 0.0  ;;  %v8841_v15 = vld [vmem:[#allocation2 + $0x2a0] ss:$16 sps:$4 sm:$0xff]  }
 0x435   : > { %v4226_v51 = vadd.f32 %v11205_v32, %v10970_v27  ;;  %v11364_v55 = vmax.f32 %v4704_v13, %v4705_v8  ;;  %v11366_v6 = vmax.f32 %v4730_v45, %v4731_v37  ;;  %v4459_v54 = vmul.f32 0.2, %v4224_v11  ;;  %v8844_v58 = vld [vmem:[#allocation2 + $0x2a8] ss:$16 sps:$4 sm:$0xff]  }
 0x436   : > { %vm4336_vm1 = vcmp.gt.f32.partialorder %v4113_v49, 0.0  ;;  %6531 = vmatpush1.bf16.msra.mxu0 %v8829_v47  ;;  %6695 = vmatpush1.bf16.msra.mxu1 %v8832_v29  ;;  %v4464_v46 = vmul.f32 0.2, %v4113_v49  ;;  %v4115_v44 = vadd.f32 %v11208_v48, %v10975_v21  ;;  %v11370_v60 = vmax.f32 %v4717_v28, %v4718_v17  ;;  %v8852_v47 = vld [vmem:[#allocation2 + $0x2cc] ss:$16 sps:$4 sm:$0xff]  }
 0x437   : > { %vm4338_vm2 = vcmp.gt.f32.partialorder %v4226_v51, 0.0  ;;  %v4466_v59 = vmul.f32 0.2, %v4226_v51  ;;  %6532 = vmatprep.subr.bf16.mxu0 %v8837_v63  ;;  %6696 = vmatprep.subr.bf16.mxu1 %v8840_v20  ;;  %v4744_v32 = vrot.slane %v11355_v5, 2  ;;  %v4228_v16 = vadd.f32 %v11210_v14, %v10980_v36  ;;  %v11795_v20 = vld [vmem:[#allocation8_spill] sm:$0xff] }
 0x438   : > { %v4119_v26 = vadd.f32 %v11227_v39, %v10917_v1  ;;  %v4592_v38 = vsel %vm4336_vm1, %v4113_v49, %v4464_v46  ;;  %vm4337_vm3 = vcmp.gt.f32.partialorder %v4115_v44, 0.0  ;;  %v4465_v25 = vmul.f32 0.2, %v4115_v44  ;;  %v8849_v39 = vld [vmem:[#allocation2 + $0x2c4] ss:$16 sps:$4 sm:$0xff]  }
 0x439   : > { %v4594_v9 = vsel %vm4338_vm2, %v4226_v51, %v4466_v59  ;;  %v4585_v12 = vsel %vm4329_vm15, %v4111_v53, %v4457_v41  ;;  %v4587_v48 = vsel %vm4331_vm0, %v4224_v11, %v4459_v54  ;;  %v4800_v13 = vmax.f32 %v11351_v34, %v4592_v38  ;;  %v8850_v49 = vld [vmem:[#allocation2 + $0x2c8] ss:$16 sps:$4 sm:$0xff]   ;;  %v11796_v38 = vld [vmem:[#allocation9_spill] sm:$0xff] }
 0x43a   : > { %v4826_v45 = vmax.f32 %v11358_v23, %v4594_v9  ;;  %6533 = vmatpush1.bf16.msra.mxu0 %v8835_v7  ;;  %v4593_v14 = vsel %vm4337_vm3, %v4115_v44, %v4465_v25  ;;  %vm4339_vm4 = vcmp.gt.f32.partialorder %v4228_v16, 0.0  ;;  %v4467_v28 = vmul.f32 0.2, %v4228_v16  ;;  %6697 = vmatpush1.bf16.msra.mxu1 %v8838_v56  ;;  %v8847_v23 = vld [vmem:[#allocation2 + $0x2c0] ss:$16 sps:$4 sm:$0xff]  }
 0x43b   : > { %vm4344_vm5 = vcmp.gt.f32.partialorder %v4119_v26, 0.0  ;;  %6534 = vmatprep.subr.bf16.mxu0 %v8843_v42  ;;  %v4813_v8 = vmax.f32 %v4585_v12, %v4593_v14  ;;  %v4472_v37 = vmul.f32 0.2, %v4119_v26  ;;  %v4232_v53 = vadd.f32 %v11229_v31, %v10970_v27  ;;  %6698 = vmatprep.subr.bf16.mxu1 %v8846_v3  ;;  %v8853_v25 = vld [vmem:[#allocation2 + $0x2e0] ss:$16 sps:$4 sm:$0xff]  }
 0x43c   : > { %v4121_v11 = vadd.f32 %v11233_v43, %v10975_v21  ;;  %v4595_v29 = vsel %vm4339_vm4, %v4228_v16, %v4467_v28  ;;  %v4234_v34 = vadd.f32 %v11235_v30, %v10980_v36  ;;  %v4123_v63 = vadd.f32 %v11237_v18, %v10917_v1  ;;  %v8855_v43 = vld [vmem:[#allocation2 + $0x2e4] ss:$16 sps:$4 sm:$0xff]   ;;  %v8858_v30 = vld [vmem:[#allocation2 + $0x2ec] ss:$16 sps:$4 sm:$0xff]  }
 0x43d   : > { %v4236_v17 = vadd.f32 %v11795_v20, %v10970_v27  ;;  %v4839_v7 = vmax.f32 %v4587_v48, %v4595_v29  ;;  %v4600_v31 = vsel %vm4344_vm5, %v4119_v26, %v4472_v37  ;;  %vm4346_vm7 = vcmp.gt.f32.partialorder %v4232_v53, 0.0 }
 0x43e   : > { %v4474_v41 = vmul.f32 0.2, %v4232_v53  ;;  %6535 = vmatpush1.bf16.msra.mxu0 %v8841_v15  ;;  %v4801_v51 = vmax.f32 %v4800_v13, %v4600_v31  ;;  %vm4345_vm6 = vcmp.gt.f32.partialorder %v4121_v11, 0.0  ;;  %v4473_v56 = vmul.f32 0.2, %v4121_v11  ;;  %6699 = vmatpush1.bf16.msra.mxu1 %v8844_v58 }
 0x43f   : > { %vm4347_vm8 = vcmp.gt.f32.partialorder %v4234_v34, 0.0  ;;  %6536 = vmatprep.subr.bf16.mxu0 %v8849_v39  ;;  %v4475_v54 = vmul.f32 0.2, %v4234_v34  ;;  %vm4352_vm10 = vcmp.gt.f32.partialorder %v4123_v63, 0.0  ;;  %v4480_v42 = vmul.f32 0.2, %v4123_v63  ;;  %6700 = vmatprep.subr.bf16.mxu1 %v8852_v47 }
 0x440   : > { %v4602_v18 = vsel %vm4346_vm7, %v4232_v53, %v4474_v41  ;;  %v4601_v59 = vsel %vm4345_vm6, %v4121_v11, %v4473_v56  ;;  %vm4354_vm11 = vcmp.gt.f32.partialorder %v4236_v17, 0.0  ;;  %v4482_v44 = vmul.f32 0.2, %v4236_v17  ;;  %v8856_v58 = vld [vmem:[#allocation2 + $0x2e8] ss:$16 sps:$4 sm:$0xff]  }
 0x441   : > { %v4827_v46 = vmax.f32 %v4826_v45, %v4602_v18  ;;  %v4814_v16 = vmax.f32 %v4813_v8, %v4601_v59  ;;  %v4603_v26 = vsel %vm4347_vm8, %v4234_v34, %v4475_v54  ;;  %v4608_v3 = vsel %vm4352_vm10, %v4123_v63, %v4480_v42  ;;  %v8861_v45 = vld [vmem:[#allocation2 + $0x304] ss:$16 sps:$4 sm:$0xff]   ;;  %v8864_v8 = vld [vmem:[#allocation2 + $0x30c] ss:$16 sps:$4 sm:$0xff]   ;;  %v8859_v11 = vld [vmem:[#allocation2 + $0x300] ss:$16 sps:$4 sm:$0xff]  }
 0x442   : > { %v4125_v9 = vadd.f32 %v11796_v38, %v10975_v21  ;;  %6537 = vmatpush1.bf16.msra.mxu0 %v8847_v23  ;;  %v4840_v12 = vmax.f32 %v4839_v7, %v4603_v26  ;;  %v4802_v48 = vmax.f32 %v4801_v51, %v4608_v3  ;;  %v4610_v13 = vsel %vm4354_vm11, %v4236_v17, %v4482_v44  ;;  %v8867_v23 = vld [vmem:[#allocation2 + $0x324] ss:$16 sps:$4 sm:$0xff]   ;;  %v8870_v7 = vld [vmem:[#allocation2 + $0x32c] ss:$16 sps:$4 sm:$0xff]   ;;  %v8865_v18 = vld [vmem:[#allocation2 + $0x320] ss:$16 sps:$4 sm:$0xff]  }
 0x443   : > { %v4238_v15 = vadd.f32 %v11247_v61, %v10980_v36  ;;  %6701 = vmatpush1.bf16.msra.mxu1 %v8850_v49  ;;  %v4828_v14 = vmax.f32 %v4827_v46, %v4610_v13  ;;  %v4129_v39 = vadd.f32 %v11253_v52, %v10917_v1  ;;  %6538 = vmatprep.subr.bf16.mxu0 %v8855_v43  ;;  %v8862_v52 = vld [vmem:[#allocation2 + $0x308] ss:$16 sps:$4 sm:$0xff]   ;;  %v8873_v26 = vld [vmem:[#allocation2 + $0x344] ss:$16 sps:$4 sm:$0xff]   ;;  %v8871_v13 = vld [vmem:[#allocation2 + $0x340] ss:$16 sps:$4 sm:$0xff]  }
 0x444   : > { %vm4353_vm12 = vcmp.gt.f32.partialorder %v4125_v9, 0.0  ;;  %v4481_v28 = vmul.f32 0.2, %v4125_v9  ;;  %6702 = vmatprep.subr.bf16.mxu1 %v8858_v30  ;;  %v4242_v53 = vadd.f32 %v11259_v40, %v10970_v27  ;;  %v4131_v61 = vadd.f32 %v11261_v2, %v10975_v21  ;;  %v11797_v59 = vld [vmem:[#allocation10_spill] sm:$0xff] }
 0x445   : > { %vm4355_vm13 = vcmp.gt.f32.partialorder %v4238_v15, 0.0  ;;  %v4483_v37 = vmul.f32 0.2, %v4238_v15  ;;  %vm4360_vm14 = vcmp.gt.f32.partialorder %v4129_v39, 0.0  ;;  %v4488_v29 = vmul.f32 0.2, %v4129_v39 }
 0x446   : > { %v4609_v47 = vsel %vm4353_vm12, %v4125_v9, %v4481_v28  ;;  %v4244_v34 = vadd.f32 %v11265_v62, %v10980_v36  ;;  %6539 = vmatpush1.bf16.msra.mxu0 %v8853_v25  ;;  %vm4362_vm15 = vcmp.gt.f32.partialorder %v4242_v53, 0.0  ;;  %v4490_v17 = vmul.f32 0.2, %v4242_v53  ;;  %v8874_v28 = vld [vmem:[#allocation2 + $0x348] ss:$16 sps:$4 sm:$0xff]  }
 0x447   : > { %v4815_v63 = vmax.f32 %v4814_v16, %v4609_v47  ;;  %v4611_v20 = vsel %vm4355_vm13, %v4238_v15, %v4483_v37  ;;  %6703 = vmatpush1.bf16.msra.mxu1 %v8856_v58  ;;  %6540 = vmatprep.subr.bf16.mxu0 %v8861_v45  ;;  %v4616_v49 = vsel %vm4360_vm14, %v4129_v39, %v4488_v29  ;;  %vm4361_vm0 = vcmp.gt.f32.partialorder %v4131_v61, 0.0  ;;  %v8868_v16 = vld [vmem:[#allocation2 + $0x328] ss:$16 sps:$4 sm:$0xff]   ;;  %v11798_v29 = vld [vmem:[#allocation11_spill] sm:$0xff] }
 0x448   : > { %v4841_v40 = vmax.f32 %v4840_v12, %v4611_v20  ;;  %v4489_v2 = vmul.f32 0.2, %v4131_v61  ;;  %6704 = vmatprep.subr.bf16.mxu1 %v8864_v8  ;;  %v11404_v31 = vmax.f32 %v4802_v48, %v4616_v49  ;;  %v4618_v41 = vsel %vm4362_vm15, %v4242_v53, %v4490_v17  ;;  %v11799_v17 = vld [vmem:[#allocation12_spill] sm:$0xff] }
 0x449   : > { %vm4363_vm1 = vcmp.gt.f32.partialorder %v4244_v34, 0.0  ;;  %v4491_v62 = vmul.f32 0.2, %v4244_v34  ;;  %v11406_v43 = vmax.f32 %v4828_v14, %v4618_v41  ;;  %v4133_v56 = vadd.f32 %v11267_v22, %v10917_v1 }
 0x44a   : > { %v4617_v51 = vsel %vm4361_vm0, %v4131_v61, %v4489_v2  ;;  %v4246_v30 = vadd.f32 %v11273_v4, %v10970_v27  ;;  %6541 = vmatpush1.bf16.msra.mxu0 %v8859_v11  ;;  %v4135_v46 = vadd.f32 %v11275_v19, %v10975_v21  ;;  %v4248_v44 = vadd.f32 %v11797_v59, %v10980_v36  ;;  %v8876_v4 = vld [vmem:[#allocation2 + $0x34c] ss:$16 sps:$4 sm:$0xff]   ;;  %v8880_v2 = vld [vmem:[#allocation2 + $0x368] ss:$16 sps:$4 sm:$0xff]   ;;  %v8891_v59 = vld [vmem:[#allocation2 + $0x3a4] ss:$16 sps:$4 sm:$0xff]  }
 0x44b   : > { %v11412_v54 = vmax.f32 %v4815_v63, %v4617_v51  ;;  %v4619_v42 = vsel %vm4363_vm1, %v4244_v34, %v4491_v62  ;;  %6705 = vmatpush1.bf16.msra.mxu1 %v8862_v52  ;;  %vm4368_vm2 = vcmp.gt.f32.partialorder %v4133_v56, 0.0  ;;  %v4496_v22 = vmul.f32 0.2, %v4133_v56  ;;  %6542 = vmatprep.subr.bf16.mxu0 %v8867_v23  ;;  %v8877_v52 = vld [vmem:[#allocation2 + $0x360] ss:$16 sps:$4 sm:$0xff]  }
 0x44c   : > { %v11418_v3 = vmax.f32 %v4841_v40, %v4619_v42  ;;  %vm4370_vm3 = vcmp.gt.f32.partialorder %v4246_v30, 0.0  ;;  %6706 = vmatprep.subr.bf16.mxu1 %v8870_v7  ;;  %v4498_v38 = vmul.f32 0.2, %v4246_v30  ;;  %vm4369_vm4 = vcmp.gt.f32.partialorder %v4135_v46, 0.0  ;;  %v11800_v40 = vld [vmem:[#allocation13_spill] sm:$0xff] }
 0x44d   : > { %v4497_v9 = vmul.f32 0.2, %v4135_v46  ;;  %vm4371_vm5 = vcmp.gt.f32.partialorder %v4248_v44, 0.0  ;;  %v4624_v25 = vsel %vm4368_vm2, %v4133_v56, %v4496_v22  ;;  %v4499_v19 = vmul.f32 0.2, %v4248_v44 }
 0x44e   : > { %v4139_v12 = vadd.f32 %v11290_v35, %v10917_v1  ;;  %v4252_v48 = vadd.f32 %v11292_v57, %v10970_v27  ;;  %6543 = vmatpush1.bf16.msra.mxu0 %v8865_v18  ;;  %v4804_v15 = vmax.f32 %v11404_v31, %v4624_v25  ;;  %v4626_v58 = vsel %vm4370_vm3, %v4246_v30, %v4498_v38  ;;  %v8879_v35 = vld [vmem:[#allocation2 + $0x364] ss:$16 sps:$4 sm:$0xff]   ;;  %v8882_v57 = vld [vmem:[#allocation2 + $0x36c] ss:$16 sps:$4 sm:$0xff]  }
 0x44f   : > { %v4625_v45 = vsel %vm4369_vm4, %v4135_v46, %v4497_v9  ;;  %v4141_v14 = vadd.f32 %v11297_v33, %v10975_v21  ;;  %6707 = vmatpush1.bf16.msra.mxu1 %v8868_v16  ;;  %v4830_v39 = vmax.f32 %v11406_v43, %v4626_v58  ;;  %v4627_v37 = vsel %vm4371_vm5, %v4248_v44, %v4499_v19  ;;  %v8885_v7 = vld [vmem:[#allocation2 + $0x384] ss:$16 sps:$4 sm:$0xff]   ;;  %v8886_v46 = vld [vmem:[#allocation2 + $0x388] ss:$16 sps:$4 sm:$0xff]  }
 0x450   : > { %v4817_v8 = vmax.f32 %v11412_v54, %v4625_v45  ;;  %vm4376_vm7 = vcmp.gt.f32.partialorder %v4139_v12, 0.0  ;;  %6544 = vmatprep.subr.bf16.mxu0 %v8873_v26  ;;  %6708 = vmatprep.subr.bf16.mxu1 %v8876_v4  ;;  %v4843_v53 = vmax.f32 %v11418_v3, %v4627_v37  ;;  %v4504_v61 = vmul.f32 0.2, %v4139_v12  ;;  %v11801_v54 = vld [vmem:[#allocation14_spill] sm:$0xff] }
 0x451   : > { %vm4378_vm6 = vcmp.gt.f32.partialorder %v4252_v48, 0.0  ;;  %v4506_v11 = vmul.f32 0.2, %v4252_v48  ;;  %vm4377_vm8 = vcmp.gt.f32.partialorder %v4141_v14, 0.0  ;;  %v4505_v47 = vmul.f32 0.2, %v4141_v14 }
 0x452   : > { %v4254_v33 = vadd.f32 %v11299_v10, %v10980_v36  ;;  %v4143_v34 = vadd.f32 %v11798_v29, %v10917_v1  ;;  %6545 = vmatpush1.bf16.msra.mxu0 %v8871_v13  ;;  %v4632_v63 = vsel %vm4376_vm7, %v4139_v12, %v4504_v61  ;;  %v4256_v23 = vadd.f32 %v11799_v17, %v10970_v27  ;;  %v8883_v1 = vld [vmem:[#allocation2 + $0x380] ss:$16 sps:$4 sm:$0xff]   ;;  %v8888_v10 = vld [vmem:[#allocation2 + $0x38c] ss:$16 sps:$4 sm:$0xff]   ;;  %v8892_v13 = vld [vmem:[#allocation2 + $0x3a8] ss:$16 sps:$4 sm:$0xff]  }
 0x453   : > { %v4634_v20 = vsel %vm4378_vm6, %v4252_v48, %v4506_v11  ;;  %v4145_v49 = vadd.f32 %v11800_v40, %v10975_v21  ;;  %6709 = vmatpush1.bf16.msra.mxu1 %v8874_v28  ;;  %v4805_v31 = vmax.f32 %v4804_v15, %v4632_v63  ;;  %v4633_v62 = vsel %vm4377_vm8, %v4141_v14, %v4505_v47  ;;  %v8894_v4 = vld [vmem:[#allocation2 + $0x3ac] ss:$16 sps:$4 sm:$0xff]   ;;  %v8897_v15 = vld [vmem:[#allocation2 + $0x3c4] ss:$16 sps:$4 sm:$0xff]   ;;  %v8895_v61 = vld [vmem:[#allocation2 + $0x3c0] ss:$16 sps:$4 sm:$0xff]  }
 0x454   : > { %v4831_v41 = vmax.f32 %v4830_v39, %v4634_v20  ;;  %vm4379_vm10 = vcmp.gt.f32.partialorder %v4254_v33, 0.0  ;;  %6546 = vmatprep.subr.bf16.mxu0 %v8879_v35  ;;  %6710 = vmatprep.subr.bf16.mxu1 %v8882_v57  ;;  %v4818_v43 = vmax.f32 %v4817_v8, %v4633_v62  ;;  %v4507_v51 = vmul.f32 0.2, %v4254_v33  ;;  %v8900_v39 = vld [vmem:[#allocation2 + $0x3cc] ss:$16 sps:$4 sm:$0xff]  }
 0x455   : > { %vm4384_vm11 = vcmp.gt.f32.partialorder %v4143_v34, 0.0  ;;  %v4512_v56 = vmul.f32 0.2, %v4143_v34  ;;  %vm4386_vm12 = vcmp.gt.f32.partialorder %v4256_v23, 0.0  ;;  %v4514_v27 = vmul.f32 0.2, %v4256_v23 }
 0x456   : > { %vm4385_vm13 = vcmp.gt.f32.partialorder %v4145_v49, 0.0  ;;  %v4513_v30 = vmul.f32 0.2, %v4145_v49  ;;  %6547 = vmatpush1.bf16.msra.mxu0 %v8877_v52  ;;  %v4635_v21 = vsel %vm4379_vm10, %v4254_v33, %v4507_v51  ;;  %v4258_v42 = vadd.f32 %v11801_v54, %v10980_v36  ;;  %v8889_v36 = vld [vmem:[#allocation2 + $0x3a0] ss:$16 sps:$4 sm:$0xff]  }
 0x457   : > { %v4640_v18 = vsel %vm4384_vm11, %v4143_v34, %v4512_v56  ;;  %6711 = vmatpush1.bf16.msra.mxu1 %v8880_v2  ;;  %6548 = vmatprep.subr.bf16.mxu0 %v8885_v7  ;;  %v5172_v44 = vunpack.c.l.b16 %v5118_v24  ;;  %v4844_v16 = vmax.f32 %v4843_v53, %v4635_v21  ;;  %v4642_v3 = vsel %vm4386_vm12, %v4256_v23, %v4514_v27  ;;  %v8898_v33 = vld [vmem:[#allocation2 + $0x3c8] ss:$16 sps:$4 sm:$0xff]   ;;  %v8906_v52 = vld [vmem:[#allocation2 + $0x3ec] ss:$16 sps:$4 sm:$0xff]   ;;  %v8901_v7 = vld [vmem:[#allocation2 + $0x3e0] ss:$16 sps:$4 sm:$0xff]  }
 0x458   : > { %v4806_v26 = vmax.f32 %v4805_v31, %v4640_v18  ;;  %v4641_v22 = vsel %vm4385_vm13, %v4145_v49, %v4513_v30  ;;  %6712 = vmatprep.subr.bf16.mxu1 %v8888_v10  ;;  %v4832_v38 = vmax.f32 %v4831_v41, %v4642_v3  ;;  %vm4387_vm14 = vcmp.gt.f32.partialorder %v4258_v42, 0.0  ;;  %v8904_v41 = vld [vmem:[#allocation2 + $0x3e8] ss:$16 sps:$4 sm:$0xff]   ;;  %v8912_v51 = vld [vmem:[#allocation2 + $0x40c] ss:$16 sps:$4 sm:$0xff]  }
 0x459   : > { %v4819_v9 = vmax.f32 %v4818_v43, %v4641_v22  ;;  %v4515_v25 = vmul.f32 0.2, %v4258_v42  ;;  %v11445_v12 = vsel %vm5178_vm9, %v5172_v44, %v11353_v0  ;;  %v4707_v58 = vrot.slane %v11364_v55, 1  ;;  %v8907_v18 = vld [vmem:[#allocation2 + $0x400] ss:$16 sps:$4 sm:$0xff]  }
 0x45a   : > { %v4807_v19 = vrot.slane %v4806_v26, 4  ;;  %6549 = vmatpush1.bf16.msra.mxu0 %v8883_v1  ;;  %v4833_v48 = vrot.slane %v4832_v38, 4  ;;  %v4745_v45 = vmax.f32 %v11355_v5, %v4744_v32  ;;  %v4733_v0 = vrot.slane %v11366_v6, 1  ;;  %v8903_v5 = vld [vmem:[#allocation2 + $0x3e4] ss:$16 sps:$4 sm:$0xff]  }
 0x45b   : > { %v4820_v50 = vrot.slane %v4819_v9, 4  ;;  %v4643_v24 = vsel %vm4387_vm14, %v4258_v42, %v4515_v25  ;;  %6713 = vmatpush1.bf16.msra.mxu1 %v8886_v46  ;;  %6550 = vmatprep.subr.bf16.mxu0 %v8891_v59  ;;  %v4720_v35 = vrot.slane %v11370_v60, 1  ;;  %v4708_v32 = vmax.f32 %v11364_v55, %v4707_v58  ;;  %v8909_v55 = vld [vmem:[#allocation2 + $0x404] ss:$16 sps:$4 sm:$0xff]   ;;  %v8910_v59 = vld [vmem:[#allocation2 + $0x408] ss:$16 sps:$4 sm:$0xff]  }
 0x45c   : > { %v4808_v14 = vmax.f32 %v4806_v26, %v4807_v19  ;;  %v4845_v28 = vmax.f32 %v4844_v16, %v4643_v24  ;;  %6714 = vmatprep.subr.bf16.mxu1 %v8894_v4  ;;  %v4834_v8 = vmax.f32 %v4832_v38, %v4833_v48  ;;  %v4746_v63 = vrot.slane %v4745_v45, 1  ;;  %v8915_v16 = vld [vmem:[#allocation2 + $0x424] ss:$16 sps:$4 sm:$0xff]   ;;  %v8918_v26 = vld [vmem:[#allocation2 + $0x42c] ss:$16 sps:$4 sm:$0xff]  }
 0x45d   : > { %v4821_v37 = vmax.f32 %v4819_v9, %v4820_v50  ;;  %v4734_v20 = vmax.f32 %v11366_v6, %v4733_v0  ;;  %v4721_v40 = vmax.f32 %v11370_v60, %v4720_v35  ;;  %v5112_v1 = vpack.c.bf16 %v4708_v32, %v4708_v32  ;;  %v8913_v24 = vld [vmem:[#allocation2 + $0x420] ss:$16 sps:$4 sm:$0xff]   ;;  %v8927_v35 = vld [vmem:[#allocation2 + $0x464] ss:$16 sps:$4 sm:$0xff]  }
 0x45e   : > { %v4809_v57 = vrot.slane %v4808_v14, 2  ;;  %v4846_v53 = vrot.slane %v4845_v28, 4  ;;  %6551 = vmatpush1.bf16.msra.mxu0 %v8889_v36  ;;  %v4835_v11 = vrot.slane %v4834_v8, 2  ;;  %v4747_v6 = vmax.f32 %v4745_v45, %v4746_v63  ;;  %v8921_v45 = vld [vmem:[#allocation2 + $0x444] ss:$16 sps:$4 sm:$0xff]  }
 0x45f   : > { %v4822_v47 = vrot.slane %v4821_v37, 2  ;;  %6715 = vmatpush1.bf16.msra.mxu1 %v8892_v13  ;;  %6552 = vmatprep.subr.bf16.mxu0 %v8897_v15  ;;  %v5114_v56 = vpack.c.bf16 %v4734_v20, %v4734_v20  ;;  %v5113_v60 = vpack.c.bf16 %v4721_v40, %v4721_v40  ;;  %v5189_v46 = vpack.c.b16 %v11445_v12, %v11445_v12  ;;  %v8916_v13 = vld [vmem:[#allocation2 + $0x428] ss:$16 sps:$4 sm:$0xff]   ;;  %v8939_v32 = vld [vmem:[#allocation2 + $0x4a4] ss:$16 sps:$4 sm:$0xff]  }
 0x460   : > { %v4810_v29 = vmax.f32 %v4808_v14, %v4809_v57  ;;  %v4847_v34 = vmax.f32 %v4845_v28, %v4846_v53  ;;  %6716 = vmatprep.subr.bf16.mxu1 %v8900_v39  ;;  %v4836_v17 = vmax.f32 %v4834_v8, %v4835_v11  ;;  %v5166_v3 = vunpack.c.l.b16 %v5112_v1  ;;  %v8924_v14 = vld [vmem:[#allocation2 + $0x44c] ss:$16 sps:$4 sm:$0xff]   ;;  %v8919_v8 = vld [vmem:[#allocation2 + $0x440] ss:$16 sps:$4 sm:$0xff]   ;;  %v8933_v11 = vld [vmem:[#allocation2 + $0x484] ss:$16 sps:$4 sm:$0xff]  }
 0x461   : > { %v4823_v23 = vmax.f32 %v4821_v37, %v4822_v47  ;;  %v5115_v38 = vpack.c.bf16 %v4747_v6, %v4747_v6  ;;  %v5167_v9 = vunpack.c.l.b16 %v5113_v60  ;;  %v5168_v19 = vunpack.c.l.b16 %v5114_v56  ;;  %v8922_v37 = vld [vmem:[#allocation2 + $0x448] ss:$16 sps:$4 sm:$0xff]   ;;  %v8930_v57 = vld [vmem:[#allocation2 + $0x46c] ss:$16 sps:$4 sm:$0xff]   ;;  %v8925_v53 = vld [vmem:[#allocation2 + $0x460] ss:$16 sps:$4 sm:$0xff]  }
 0x462   : > { %v4811_v49 = vrot.slane %v4810_v29, 1  ;;  %v4848_v2 = vrot.slane %v4847_v34, 2  ;;  %6553 = vmatpush1.bf16.msra.mxu0 %v8895_v61  ;;  %v4837_v31 = vrot.slane %v4836_v17, 1  ;;  %v8928_v61 = vld [vmem:[#allocation2 + $0x468] ss:$16 sps:$4 sm:$0xff]  }
 0x463   : > { %6717 = vmatpush1.bf16.msra.mxu1 %v8898_v33  ;;  %6554 = vmatprep.subr.bf16.mxu0 %v8903_v5  ;;  %v4824_v62 = vrot.slane %v4823_v23, 1  ;;  %v5169_v28 = vunpack.c.l.b16 %v5115_v38  ;;  %v8936_v47 = vld [vmem:[#allocation2 + $0x48c] ss:$16 sps:$4 sm:$0xff]   ;;  %v8931_v33 = vld [vmem:[#allocation2 + $0x480] ss:$16 sps:$4 sm:$0xff]  }
 0x464   : > { %v4812_v10 = vmax.f32 %v4810_v29, %v4811_v49  ;;  %v4849_v43 = vmax.f32 %v4847_v34, %v4848_v2  ;;  %6718 = vmatprep.subr.bf16.mxu1 %v8906_v52  ;;  %v4838_v27 = vmax.f32 %v4836_v17, %v4837_v31  ;;  %v8934_v5 = vld [vmem:[#allocation2 + $0x488] ss:$16 sps:$4 sm:$0xff]   ;;  %v8942_v29 = vld [vmem:[#allocation2 + $0x4ac] ss:$16 sps:$4 sm:$0xff]   ;;  %v8937_v34 = vld [vmem:[#allocation2 + $0x4a0] ss:$16 sps:$4 sm:$0xff]  }
 0x465   : > { %v4825_v30 = vmax.f32 %v4823_v23, %v4824_v62  ;;  %v8940_v52 = vld [vmem:[#allocation2 + $0x4a8] ss:$16 sps:$4 sm:$0xff]   ;;  %v8945_v63 = vld [vmem:[#allocation2 + $0x4c4] ss:$16 sps:$4 sm:$0xff]   ;;  %v8948_v20 = vld [vmem:[#allocation2 + $0x4cc] ss:$16 sps:$4 sm:$0xff]  }
 0x466   : > { %v5120_v21 = vpack.c.bf16 %v4812_v10, %v4812_v10  ;;  %6555 = vmatpush1.bf16.msra.mxu0 %v8901_v7  ;;  %v4850_v54 = vrot.slane %v4849_v43, 1  ;;  %v5122_v42 = vpack.c.bf16 %v4838_v27, %v4838_v27  ;;  %v8943_v17 = vld [vmem:[#allocation2 + $0x4c0] ss:$16 sps:$4 sm:$0xff]   ;;  %v8946_v23 = vld [vmem:[#allocation2 + $0x4c8] ss:$16 sps:$4 sm:$0xff]  }
 0x467   : > { %6719 = vmatpush1.bf16.msra.mxu1 %v8904_v41  ;;  %6565 = vmatprep.subr.bf16.mxu0 %v8909_v55  ;;  %v5121_v44 = vpack.c.bf16 %v4825_v30, %v4825_v30  ;;  %v8951_v40 = vld [vmem:[#allocation2 + $0x4e4] ss:$16 sps:$4 sm:$0xff]   ;;  %v8954_v49 = vld [vmem:[#allocation2 + $0x4ec] ss:$16 sps:$4 sm:$0xff]   ;;  %v8949_v2 = vld [vmem:[#allocation2 + $0x4e0] ss:$16 sps:$4 sm:$0xff]  }
 0x468   : > { %6729 = vmatprep.subr.bf16.mxu1 %v8912_v51  ;;  %v5174_v22 = vunpack.c.l.b16 %v5120_v21  ;;  %v4851_v4 = vmax.f32 %v4849_v43, %v4850_v54  ;;  %v5176_v36 = vunpack.c.l.b16 %v5122_v42  ;;  %v8952_v7 = vld [vmem:[#allocation2 + $0x4e8] ss:$16 sps:$4 sm:$0xff]   ;;  %v8957_v31 = vld [vmem:[#allocation2 + $0x504] ss:$16 sps:$4 sm:$0xff]   ;;  %v8960_v41 = vld [vmem:[#allocation2 + $0x50c] ss:$16 sps:$4 sm:$0xff]  }
 0x469   : > { %6557 = vmatmul.mubr.bf16.vlgmr.msra.gmra.mrb[168].mxu0 %v5189_v46  ;;  %v5175_v25 = vunpack.c.l.b16 %v5121_v44  ;;  %v8955_v55 = vld [vmem:[#allocation2 + $0x500] ss:$16 sps:$4 sm:$0xff]   ;;  %v8958_v62 = vld [vmem:[#allocation2 + $0x508] ss:$16 sps:$4 sm:$0xff]   ;;  %v8963_v1 = vld [vmem:[#allocation2 + $0x524] ss:$16 sps:$4 sm:$0xff]  }
 0x46a   : > { %6721 = vmatmul.mubr.bf16.vlgmr.msra.gmra.mrb[216].mxu1 %v5189_v46  ;;  %6566 = vmatpush1.bf16.msra.mxu0 %v8907_v18  ;;  %v11459_v48 = vsel %vm5178_vm9, %v5174_v22, %v5166_v3  ;;  %v5123_v12 = vpack.c.bf16 %v4851_v4, %v4851_v4  ;;  %v11463_v15 = vsel %vm5178_vm9, %v5176_v36, %v5168_v19  ;;  %v8966_v10 = vld [vmem:[#allocation2 + $0x52c] ss:$16 sps:$4 sm:$0xff]   ;;  %v8961_v43 = vld [vmem:[#allocation2 + $0x520] ss:$16 sps:$4 sm:$0xff]   ;;  %v8964_v51 = vld [vmem:[#allocation2 + $0x528] ss:$16 sps:$4 sm:$0xff]  }
 0x46b   : > { %v5184_v50 = vsel %vm5178_vm9, %v5175_v25, %v5167_v9  ;;  %6730 = vmatpush1.bf16.msra.mxu1 %v8910_v59  ;;  %6567 = vmatprep.subr.bf16.mxu0 %v8915_v16  ;;  %v8969_v6 = vld [vmem:[#allocation2 + $0x544] ss:$16 sps:$4 sm:$0xff]   ;;  %v8972_v56 = vld [vmem:[#allocation2 + $0x54c] ss:$16 sps:$4 sm:$0xff]   ;;  %v8967_v27 = vld [vmem:[#allocation2 + $0x540] ss:$16 sps:$4 sm:$0xff]  }
 0x46c   : > { %v5192_v58 = vpack.c.b16 %v5184_v50, %v5184_v50  ;;  %6731 = vmatprep.subr.bf16.mxu1 %v8918_v26  ;;  %v5177_v39 = vunpack.c.l.b16 %v5123_v12  ;;  %v8970_v30 = vld [vmem:[#allocation2 + $0x548] ss:$16 sps:$4 sm:$0xff]   ;;  %v8975_v60 = vld [vmem:[#allocation2 + $0x564] ss:$16 sps:$4 sm:$0xff]   ;;  %v8978_v21 = vld [vmem:[#allocation2 + $0x56c] ss:$16 sps:$4 sm:$0xff]  }
 0x46d   : > { %v8973_v18 = vld [vmem:[#allocation2 + $0x560] ss:$16 sps:$4 sm:$0xff]   ;;  %v8976_v54 = vld [vmem:[#allocation2 + $0x568] ss:$16 sps:$4 sm:$0xff]   ;;  %v8981_v42 = vld [vmem:[#allocation2 + $0x584] ss:$16 sps:$4 sm:$0xff]  }
 0x46e   : > { %6597 = vmatprep.mubr.bf16.mxu0 %v5192_v58  ;;  %6761 = vmatprep.mubr.bf16.mxu1 %v5192_v58  ;;  %v11466_v0 = vsel %vm5178_vm9, %v5177_v39, %v5169_v28  ;;  %v8984_v46 = vld [vmem:[#allocation2 + $0x58c] ss:$16 sps:$4 sm:$0xff]   ;;  %v8979_v59 = vld [vmem:[#allocation2 + $0x580] ss:$16 sps:$4 sm:$0xff]   ;;  %v8982_v44 = vld [vmem:[#allocation2 + $0x588] ss:$16 sps:$4 sm:$0xff]  }
 0x46f   : > { %6568 = vmatpush1.bf16.msra.mxu0 %v8913_v24  ;;  %6732 = vmatpush1.bf16.msra.mxu1 %v8916_v13  ;;  %v8987_v16 = vld [vmem:[#allocation2 + $0x5a4] ss:$16 sps:$4 sm:$0xff]   ;;  %v8990_v26 = vld [vmem:[#allocation2 + $0x5ac] ss:$16 sps:$4 sm:$0xff]   ;;  %v8985_v3 = vld [vmem:[#allocation2 + $0x5a0] ss:$16 sps:$4 sm:$0xff]   ;;  %v5194_v28 = vpack.c.b16 %v11466_v0, %v11466_v0 }
 0x470   : > { %6569 = vmatprep.subr.bf16.mxu0 %v8921_v45  ;;  %6733 = vmatprep.subr.bf16.mxu1 %v8924_v14  ;;  %v8988_v22 = vld [vmem:[#allocation2 + $0x5a8] ss:$16 sps:$4 sm:$0xff]   ;;  %v8993_v4 = vld [vmem:[#allocation2 + $0x5c4] ss:$16 sps:$4 sm:$0xff]   ;;  %v8996_v38 = vld [vmem:[#allocation2 + $0x5cc] ss:$16 sps:$4 sm:$0xff]   ;;  %v5191_v45 = vpack.c.b16 %v11459_v48, %v11459_v48 }
 0x471   : > { %v8991_v9 = vld [vmem:[#allocation2 + $0x5c0] ss:$16 sps:$4 sm:$0xff]   ;;  %v8994_v25 = vld [vmem:[#allocation2 + $0x5c8] ss:$16 sps:$4 sm:$0xff]   ;;  %v8999_v19 = vld [vmem:[#allocation2 + $0x5e4] ss:$16 sps:$4 sm:$0xff]  }
 0x472   : > { %v9002_v36 = vld [vmem:[#allocation2 + $0x5ec] ss:$16 sps:$4 sm:$0xff]   ;;  %v8997_v12 = vld [vmem:[#allocation2 + $0x5e0] ss:$16 sps:$4 sm:$0xff]   ;;  %v9000_v50 = vld [vmem:[#allocation2 + $0x5e8] ss:$16 sps:$4 sm:$0xff]  }
 0x473   : > { %6570 = vmatpush1.bf16.msra.mxu0 %v8919_v8  ;;  %6734 = vmatpush1.bf16.msra.mxu1 %v8922_v37  ;;  %v9005_v24 = vld [vmem:[#allocation2 + $0x604] ss:$16 sps:$4 sm:$0xff]   ;;  %v9008_v13 = vld [vmem:[#allocation2 + $0x60c] ss:$16 sps:$4 sm:$0xff]   ;;  %v9003_v58 = vld [vmem:[#allocation2 + $0x600] ss:$16 sps:$4 sm:$0xff]  }
 0x474   : > { %6571 = vmatprep.subr.bf16.mxu0 %v8927_v35  ;;  %6735 = vmatprep.subr.bf16.mxu1 %v8930_v57  ;;  %v9006_v14 = vld [vmem:[#allocation2 + $0x608] ss:$16 sps:$4 sm:$0xff]   ;;  %v9011_v39 = vld [vmem:[#allocation2 + $0x624] ss:$16 sps:$4 sm:$0xff]   ;;  %v9014_v8 = vld [vmem:[#allocation2 + $0x62c] ss:$16 sps:$4 sm:$0xff]  }
 0x475   : > { %v9009_v37 = vld [vmem:[#allocation2 + $0x620] ss:$16 sps:$4 sm:$0xff]   ;;  %v9012_v35 = vld [vmem:[#allocation2 + $0x628] ss:$16 sps:$4 sm:$0xff]   ;;  %v9017_v57 = vld [vmem:[#allocation2 + $0x644] ss:$16 sps:$4 sm:$0xff]  }
 0x476   : > { %v9020_v48 = vld [vmem:[#allocation2 + $0x64c] ss:$16 sps:$4 sm:$0xff]   ;;  %v9023_v0 = vld [vmem:[#allocation2 + $0x664] ss:$16 sps:$4 sm:$0xff]  }
 0x477   : > { %6572 = vmatpush1.bf16.msra.mxu0 %v8925_v53  ;;  %6736 = vmatpush1.bf16.msra.mxu1 %v8928_v61  ;;  %v9015_v53 = vld [vmem:[#allocation2 + $0x640] ss:$16 sps:$4 sm:$0xff]   ;;  %v9018_v61 = vld [vmem:[#allocation2 + $0x648] ss:$16 sps:$4 sm:$0xff]  }
 0x478   : > { %6573 = vmatprep.subr.bf16.mxu0 %v8933_v11  ;;  %6737 = vmatprep.subr.bf16.mxu1 %v8936_v47  ;;  %v9026_v11 = vld [vmem:[#allocation2 + $0x66c] ss:$16 sps:$4 sm:$0xff]   ;;  %v9021_v47 = vld [vmem:[#allocation2 + $0x660] ss:$16 sps:$4 sm:$0xff]  }
 0x47b   : > { %6574 = vmatpush1.bf16.msra.mxu0 %v8931_v33  ;;  %6738 = vmatpush1.bf16.msra.mxu1 %v8934_v5  ;;  %v9024_v33 = vld [vmem:[#allocation2 + $0x668] ss:$16 sps:$4 sm:$0xff]   ;;  %v9029_v5 = vld [vmem:[#allocation2 + $0x684] ss:$16 sps:$4 sm:$0xff]  }
 0x47c   : > { %6575 = vmatprep.subr.bf16.mxu0 %v8939_v32  ;;  %6739 = vmatprep.subr.bf16.mxu1 %v8942_v29  ;;  %v9032_v32 = vld [vmem:[#allocation2 + $0x68c] ss:$16 sps:$4 sm:$0xff]   ;;  %v9027_v29 = vld [vmem:[#allocation2 + $0x680] ss:$16 sps:$4 sm:$0xff]  }
 0x47f   : > { %6576 = vmatpush1.bf16.msra.mxu0 %v8937_v34  ;;  %6740 = vmatpush1.bf16.msra.mxu1 %v8940_v52  ;;  %v9030_v34 = vld [vmem:[#allocation2 + $0x688] ss:$16 sps:$4 sm:$0xff]   ;;  %v9035_v52 = vld [vmem:[#allocation2 + $0x6a4] ss:$16 sps:$4 sm:$0xff]  }
 0x480   : > { %6577 = vmatprep.subr.bf16.mxu0 %v8945_v63  ;;  %6741 = vmatprep.subr.bf16.mxu1 %v8948_v20  ;;  %v9038_v63 = vld [vmem:[#allocation2 + $0x6ac] ss:$16 sps:$4 sm:$0xff]   ;;  %v9033_v20 = vld [vmem:[#allocation2 + $0x6a0] ss:$16 sps:$4 sm:$0xff]  }
 0x483   : > { %6578 = vmatpush1.bf16.msra.mxu0 %v8943_v17  ;;  %6742 = vmatpush1.bf16.msra.mxu1 %v8946_v23  ;;  %v9036_v17 = vld [vmem:[#allocation2 + $0x6a8] ss:$16 sps:$4 sm:$0xff]   ;;  %v9041_v23 = vld [vmem:[#allocation2 + $0x6c4] ss:$16 sps:$4 sm:$0xff]  }
 0x484   : > { %6579 = vmatprep.subr.bf16.mxu0 %v8951_v40  ;;  %6743 = vmatprep.subr.bf16.mxu1 %v8954_v49  ;;  %v9044_v40 = vld [vmem:[#allocation2 + $0x6cc] ss:$16 sps:$4 sm:$0xff]   ;;  %v9039_v49 = vld [vmem:[#allocation2 + $0x6c0] ss:$16 sps:$4 sm:$0xff]  }
 0x487   : > { %6580 = vmatpush1.bf16.msra.mxu0 %v8949_v2  ;;  %6744 = vmatpush1.bf16.msra.mxu1 %v8952_v7  ;;  %v9042_v2 = vld [vmem:[#allocation2 + $0x6c8] ss:$16 sps:$4 sm:$0xff]   ;;  %v9047_v7 = vld [vmem:[#allocation2 + $0x6e4] ss:$16 sps:$4 sm:$0xff]  }
 0x488   : > { %6581 = vmatprep.subr.bf16.mxu0 %v8957_v31  ;;  %6745 = vmatprep.subr.bf16.mxu1 %v8960_v41  ;;  %v9050_v31 = vld [vmem:[#allocation2 + $0x6ec] ss:$16 sps:$4 sm:$0xff]   ;;  %v9045_v41 = vld [vmem:[#allocation2 + $0x6e0] ss:$16 sps:$4 sm:$0xff]  }
 0x48b   : > { %6582 = vmatpush1.bf16.msra.mxu0 %v8955_v55  ;;  %6746 = vmatpush1.bf16.msra.mxu1 %v8958_v62  ;;  %v9048_v55 = vld [vmem:[#allocation2 + $0x6e8] ss:$16 sps:$4 sm:$0xff]   ;;  %v9053_v62 = vld [vmem:[#allocation2 + $0x704] ss:$16 sps:$4 sm:$0xff]  }
 0x48c   : > { %6583 = vmatprep.subr.bf16.mxu0 %v8963_v1  ;;  %6747 = vmatprep.subr.bf16.mxu1 %v8966_v10  ;;  %v9056_v1 = vld [vmem:[#allocation2 + $0x70c] ss:$16 sps:$4 sm:$0xff]   ;;  %v9051_v10 = vld [vmem:[#allocation2 + $0x700] ss:$16 sps:$4 sm:$0xff]  }
 0x48f   : > { %6584 = vmatpush1.bf16.msra.mxu0 %v8961_v43  ;;  %6748 = vmatpush1.bf16.msra.mxu1 %v8964_v51  ;;  %v9054_v43 = vld [vmem:[#allocation2 + $0x708] ss:$16 sps:$4 sm:$0xff]   ;;  %v9059_v51 = vld [vmem:[#allocation2 + $0x724] ss:$16 sps:$4 sm:$0xff]  }
 0x490   : > { %6585 = vmatprep.subr.bf16.mxu0 %v8969_v6  ;;  %6749 = vmatprep.subr.bf16.mxu1 %v8972_v56  ;;  %v9062_v6 = vld [vmem:[#allocation2 + $0x72c] ss:$16 sps:$4 sm:$0xff]   ;;  %v9057_v56 = vld [vmem:[#allocation2 + $0x720] ss:$16 sps:$4 sm:$0xff]  }
 0x493   : > { %6586 = vmatpush1.bf16.msra.mxu0 %v8967_v27  ;;  %6750 = vmatpush1.bf16.msra.mxu1 %v8970_v30  ;;  %v9060_v27 = vld [vmem:[#allocation2 + $0x728] ss:$16 sps:$4 sm:$0xff]   ;;  %v9065_v30 = vld [vmem:[#allocation2 + $0x744] ss:$16 sps:$4 sm:$0xff]  }
 0x494   : > { %6587 = vmatprep.subr.bf16.mxu0 %v8975_v60  ;;  %6751 = vmatprep.subr.bf16.mxu1 %v8978_v21  ;;  %v9068_v60 = vld [vmem:[#allocation2 + $0x74c] ss:$16 sps:$4 sm:$0xff]   ;;  %v9063_v21 = vld [vmem:[#allocation2 + $0x740] ss:$16 sps:$4 sm:$0xff]  }
 0x497   : > { %6588 = vmatpush1.bf16.msra.mxu0 %v8973_v18  ;;  %6752 = vmatpush1.bf16.msra.mxu1 %v8976_v54  ;;  %v9066_v18 = vld [vmem:[#allocation2 + $0x748] ss:$16 sps:$4 sm:$0xff]   ;;  %v9071_v54 = vld [vmem:[#allocation2 + $0x764] ss:$16 sps:$4 sm:$0xff]  }
 0x498   : > { %6589 = vmatprep.subr.bf16.mxu0 %v8981_v42  ;;  %6753 = vmatprep.subr.bf16.mxu1 %v8984_v46  ;;  %v9074_v42 = vld [vmem:[#allocation2 + $0x76c] ss:$16 sps:$4 sm:$0xff]   ;;  %v9069_v46 = vld [vmem:[#allocation2 + $0x760] ss:$16 sps:$4 sm:$0xff]  }
 0x49b   : > { %6590 = vmatpush1.bf16.msra.mxu0 %v8979_v59  ;;  %6754 = vmatpush1.bf16.msra.mxu1 %v8982_v44  ;;  %v9072_v59 = vld [vmem:[#allocation2 + $0x768] ss:$16 sps:$4 sm:$0xff]   ;;  %v9077_v44 = vld [vmem:[#allocation2 + $0x784] ss:$16 sps:$4 sm:$0xff]  }
 0x49c   : > { %6591 = vmatprep.subr.bf16.mxu0 %v8987_v16  ;;  %6755 = vmatprep.subr.bf16.mxu1 %v8990_v26  ;;  %v9080_v16 = vld [vmem:[#allocation2 + $0x78c] ss:$16 sps:$4 sm:$0xff]   ;;  %v9075_v26 = vld [vmem:[#allocation2 + $0x780] ss:$16 sps:$4 sm:$0xff]  }
 0x49f   : > { %6592 = vmatpush1.bf16.msra.mxu0 %v8985_v3  ;;  %6756 = vmatpush1.bf16.msra.mxu1 %v8988_v22  ;;  %v9078_v3 = vld [vmem:[#allocation2 + $0x788] ss:$16 sps:$4 sm:$0xff]   ;;  %v9083_v22 = vld [vmem:[#allocation2 + $0x7a4] ss:$16 sps:$4 sm:$0xff]  }
 0x4a0   : > { %6593 = vmatprep.subr.bf16.mxu0 %v8993_v4  ;;  %6757 = vmatprep.subr.bf16.mxu1 %v8996_v38  ;;  %v9086_v4 = vld [vmem:[#allocation2 + $0x7ac] ss:$16 sps:$4 sm:$0xff]   ;;  %v9081_v38 = vld [vmem:[#allocation2 + $0x7a0] ss:$16 sps:$4 sm:$0xff]  }
 0x4a3   : > { %6594 = vmatpush1.bf16.msra.mxu0 %v8991_v9  ;;  %6758 = vmatpush1.bf16.msra.mxu1 %v8994_v25  ;;  %v9084_v9 = vld [vmem:[#allocation2 + $0x7a8] ss:$16 sps:$4 sm:$0xff]   ;;  %v9089_v25 = vld [vmem:[#allocation2 + $0x7c4] ss:$16 sps:$4 sm:$0xff]  }
 0x4a4   : > { %6595 = vmatprep.subr.bf16.mxu0 %v8999_v19  ;;  %6759 = vmatprep.subr.bf16.mxu1 %v9002_v36  ;;  %v9092_v19 = vld [vmem:[#allocation2 + $0x7cc] ss:$16 sps:$4 sm:$0xff]   ;;  %v9087_v36 = vld [vmem:[#allocation2 + $0x7c0] ss:$16 sps:$4 sm:$0xff]  }
 0x4a7   : > { %6596 = vmatpush1.bf16.msra.mxu0 %v8997_v12  ;;  %6760 = vmatpush1.bf16.msra.mxu1 %v9000_v50  ;;  %v9090_v12 = vld [vmem:[#allocation2 + $0x7c8] ss:$16 sps:$4 sm:$0xff]   ;;  %v9095_v50 = vld [vmem:[#allocation2 + $0x7e4] ss:$16 sps:$4 sm:$0xff]  }
 0x4a8   : > { %6606 = vmatprep.subr.bf16.mxu0 %v9005_v24  ;;  %6770 = vmatprep.subr.bf16.mxu1 %v9008_v13  ;;  %v9098_v24 = vld [vmem:[#allocation2 + $0x7ec] ss:$16 sps:$4 sm:$0xff]   ;;  %v9093_v13 = vld [vmem:[#allocation2 + $0x7e0] ss:$16 sps:$4 sm:$0xff]  }
 0x4aa   : > { %6598 = vmatmul.mubr.bf16.vlgmr.msra.gmra.mrb[168].mxu0 %v5191_v45  ;;  %6762 = vmatmul.mubr.bf16.vlgmr.msra.gmra.mrb[216].mxu1 %v5191_v45  ;;  %v9101_v45 = vld [vmem:[%s11756_s9 + $0x4] ss:$8 sps:$4 sm:$0xff]  }
 0x4ab   : > { %6607 = vmatpush1.bf16.msra.mxu0 %v9003_v58  ;;  %6638 = vmatprep.mubr.bf16.mxu0 %v5194_v28  ;;  %v9096_v58 = vld [vmem:[#allocation2 + $0x7e8] ss:$16 sps:$4 sm:$0xff]  }
 0x4ac   : > { %6771 = vmatpush1.bf16.msra.mxu1 %v9006_v14  ;;  %6802 = vmatprep.mubr.bf16.mxu1 %v5194_v28  ;;  %v9099_v14 = vld [vmem:[%s11756_s9] ss:$8 sps:$4 sm:$0xff]   ;;  %v5193_v28 = vpack.c.b16 %v11463_v15, %v11463_v15 }
 0x4ad   : > { %6608 = vmatprep.subr.bf16.mxu0 %v9011_v39  ;;  %6772 = vmatprep.subr.bf16.mxu1 %v9014_v8  ;;  %v9104_v39 = vld [vmem:[%s11756_s9 + $0x14] ss:$8 sps:$4 sm:$0xff]   ;;  %v9102_v8 = vld [vmem:[%s11756_s9 + $0x10] ss:$8 sps:$4 sm:$0xff]   ;;  %v9105_v15 = vld [vmem:[%s11756_s9 + $0x20] ss:$8 sps:$4 sm:$0xff]  }
 0x4af   : > { %6609 = vmatpush1.bf16.msra.mxu0 %v9009_v37  ;;  %v9107_v37 = vld [vmem:[%s11756_s9 + $0x24] ss:$8 sps:$4 sm:$0xff]  }
 0x4b0   : > { %6773 = vmatpush1.bf16.msra.mxu1 %v9012_v35  ;;  %6610 = vmatprep.subr.bf16.mxu0 %v9017_v57  ;;  %v9110_v35 = vld [vmem:[%s11756_s9 + $0x34] ss:$8 sps:$4 sm:$0xff]   ;;  %v9108_v57 = vld [vmem:[%s11756_s9 + $0x30] ss:$8 sps:$4 sm:$0xff]  }
 0x4b1   : > { %6774 = vmatprep.subr.bf16.mxu1 %v9020_v48  ;;  %v9113_v48 = vld [vmem:[%s11756_s9 + $0x44] ss:$8 sps:$4 sm:$0xff]  }
 0x4b3   : > { %6611 = vmatpush1.bf16.msra.mxu0 %v9015_v53  ;;  %v9111_v53 = vld [vmem:[%s11756_s9 + $0x40] ss:$8 sps:$4 sm:$0xff]  }
 0x4b4   : > { %6775 = vmatpush1.bf16.msra.mxu1 %v9018_v61  ;;  %6612 = vmatprep.subr.bf16.mxu0 %v9023_v0  ;;  %v9116_v61 = vld [vmem:[%s11756_s9 + $0x54] ss:$8 sps:$4 sm:$0xff]   ;;  %v9114_v0 = vld [vmem:[%s11756_s9 + $0x50] ss:$8 sps:$4 sm:$0xff]  }
 0x4b5   : > { %6776 = vmatprep.subr.bf16.mxu1 %v9026_v11  ;;  %v9119_v11 = vld [vmem:[%s11756_s9 + $0x64] ss:$8 sps:$4 sm:$0xff]  }
 0x4b7   : > { %6613 = vmatpush1.bf16.msra.mxu0 %v9021_v47  ;;  %v9117_v47 = vld [vmem:[%s11756_s9 + $0x60] ss:$8 sps:$4 sm:$0xff]  }
 0x4b8   : > { %6777 = vmatpush1.bf16.msra.mxu1 %v9024_v33  ;;  %6614 = vmatprep.subr.bf16.mxu0 %v9029_v5  ;;  %v9122_v33 = vld [vmem:[%s11756_s9 + $0x74] ss:$8 sps:$4 sm:$0xff]   ;;  %v9120_v5 = vld [vmem:[%s11756_s9 + $0x70] ss:$8 sps:$4 sm:$0xff]  }
 0x4b9   : > { %6778 = vmatprep.subr.bf16.mxu1 %v9032_v32  ;;  %v9125_v32 = vld [vmem:[%s11756_s9 + $0x84] ss:$8 sps:$4 sm:$0xff]  }
 0x4bb   : > { %6615 = vmatpush1.bf16.msra.mxu0 %v9027_v29  ;;  %v9123_v29 = vld [vmem:[%s11756_s9 + $0x80] ss:$8 sps:$4 sm:$0xff]  }
 0x4bc   : > { %6779 = vmatpush1.bf16.msra.mxu1 %v9030_v34  ;;  %6616 = vmatprep.subr.bf16.mxu0 %v9035_v52  ;;  %v9128_v34 = vld [vmem:[%s11756_s9 + $0x94] ss:$8 sps:$4 sm:$0xff]   ;;  %v9126_v52 = vld [vmem:[%s11756_s9 + $0x90] ss:$8 sps:$4 sm:$0xff]  }
 0x4bd   : > { %6780 = vmatprep.subr.bf16.mxu1 %v9038_v63  ;;  %v9131_v63 = vld [vmem:[%s11756_s9 + $0xa4] ss:$8 sps:$4 sm:$0xff]  }
 0x4bf   : > { %6617 = vmatpush1.bf16.msra.mxu0 %v9033_v20  ;;  %v9129_v20 = vld [vmem:[%s11756_s9 + $0xa0] ss:$8 sps:$4 sm:$0xff]  }
 0x4c0   : > { %6781 = vmatpush1.bf16.msra.mxu1 %v9036_v17  ;;  %6618 = vmatprep.subr.bf16.mxu0 %v9041_v23  ;;  %v9134_v17 = vld [vmem:[%s11756_s9 + $0xb4] ss:$8 sps:$4 sm:$0xff]   ;;  %v9132_v23 = vld [vmem:[%s11756_s9 + $0xb0] ss:$8 sps:$4 sm:$0xff]  }
 0x4c1   : > { %6782 = vmatprep.subr.bf16.mxu1 %v9044_v40  ;;  %v9137_v40 = vld [vmem:[%s11756_s9 + $0xc4] ss:$8 sps:$4 sm:$0xff]  }
 0x4c3   : > { %6619 = vmatpush1.bf16.msra.mxu0 %v9039_v49  ;;  %v9135_v49 = vld [vmem:[%s11756_s9 + $0xc0] ss:$8 sps:$4 sm:$0xff]  }
 0x4c4   : > { %6783 = vmatpush1.bf16.msra.mxu1 %v9042_v2  ;;  %6620 = vmatprep.subr.bf16.mxu0 %v9047_v7  ;;  %v9140_v2 = vld [vmem:[%s11756_s9 + $0xd4] ss:$8 sps:$4 sm:$0xff]   ;;  %v9138_v7 = vld [vmem:[%s11756_s9 + $0xd0] ss:$8 sps:$4 sm:$0xff]  }
 0x4c5   : > { %6784 = vmatprep.subr.bf16.mxu1 %v9050_v31  ;;  %v9141_v31 = vld [vmem:[%s11756_s9 + $0xe0] ss:$8 sps:$4 sm:$0xff]  }
 0x4c7   : > { %6621 = vmatpush1.bf16.msra.mxu0 %v9045_v41  ;;  %v9143_v41 = vld [vmem:[%s11756_s9 + $0xe4] ss:$8 sps:$4 sm:$0xff]  }
 0x4c8   : > { %6785 = vmatpush1.bf16.msra.mxu1 %v9048_v55  ;;  %6622 = vmatprep.subr.bf16.mxu0 %v9053_v62  ;;  %v9146_v55 = vld [vmem:[%s11756_s9 + $0xf4] ss:$8 sps:$4 sm:$0xff]   ;;  %v9144_v62 = vld [vmem:[%s11756_s9 + $0xf0] ss:$8 sps:$4 sm:$0xff]  }
 0x4c9   : > { %6786 = vmatprep.subr.bf16.mxu1 %v9056_v1  ;;  %v9149_v1 = vld [vmem:[%s11756_s9 + $0x104] ss:$8 sps:$4 sm:$0xff]  }
 0x4cb   : > { %6623 = vmatpush1.bf16.msra.mxu0 %v9051_v10  ;;  %v9195_v10 = vld [vmem:[%s11758_s11 + $0x40] sm:$0xff]  }
 0x4cc   : > { %6787 = vmatpush1.bf16.msra.mxu1 %v9054_v43  ;;  %6624 = vmatprep.subr.bf16.mxu0 %v9059_v51  ;;  %v9196_v43 = vld [vmem:[%s11758_s11] sm:$0xff]   ;;  %v9197_v51 = vld [vmem:[%s11758_s11 + $0x48] sm:$0xff]  }
 0x4cd   : > { %6788 = vmatprep.subr.bf16.mxu1 %v9062_v6  ;;  %v9198_v6 = vld [vmem:[%s11758_s11 + $0x8] sm:$0xff]  }
 0x4cf   : > { %6625 = vmatpush1.bf16.msra.mxu0 %v9057_v56  ;;  %v9199_v56 = vld [vmem:[%s11758_s11 + $0x50] sm:$0xff]  }
 0x4d0   : > { %6789 = vmatpush1.bf16.msra.mxu1 %v9060_v27  ;;  %6626 = vmatprep.subr.bf16.mxu0 %v9065_v30  ;;  %v9200_v27 = vld [vmem:[%s11758_s11 + $0x10] sm:$0xff]   ;;  %v9201_v30 = vld [vmem:[%s11758_s11 + $0x58] sm:$0xff]  }
 0x4d1   : > { %6790 = vmatprep.subr.bf16.mxu1 %v9068_v60  ;;  %v9202_v60 = vld [vmem:[%s11758_s11 + $0x18] sm:$0xff]  }
 0x4d3   : > { %6627 = vmatpush1.bf16.msra.mxu0 %v9063_v21  ;;  %v9203_v21 = vld [vmem:[%s11758_s11 + $0x60] sm:$0xff]  }
 0x4d4   : > { %6791 = vmatpush1.bf16.msra.mxu1 %v9066_v18  ;;  %6628 = vmatprep.subr.bf16.mxu0 %v9071_v54  ;;  %v9204_v18 = vld [vmem:[%s11758_s11 + $0x20] sm:$0xff]   ;;  %v9205_v54 = vld [vmem:[%s11758_s11 + $0x68] sm:$0xff]  }
 0x4d5   : > { %6792 = vmatprep.subr.bf16.mxu1 %v9074_v42  ;;  %v9206_v42 = vld [vmem:[%s11758_s11 + $0x28] sm:$0xff]  }
 0x4d7   : > { %6629 = vmatpush1.bf16.msra.mxu0 %v9069_v46  ;;  %v11612_v46 = vld [vmem:[%s11755_s8] sm:$0xf] }
 0x4d8   : > { %6793 = vmatpush1.bf16.msra.mxu1 %v9072_v59  ;;  %6630 = vmatprep.subr.bf16.mxu0 %v9077_v44  ;;  %v11802_v59 = vld [vmem:[#allocation6_spill] sm:$0xff] }
 0x4d9   : > { %6794 = vmatprep.subr.bf16.mxu1 %v9080_v16  ;;  %v5129_v44 = vrot.slane %v11612_v46, %v11802_v59  ;;  %v11803_v16 = vld [vmem:[#allocation7_spill] sm:$0xff] }
 0x4db   : > { %6631 = vmatpush1.bf16.msra.mxu0 %v9075_v26  ;;  %v5133_v26 = vrot.slane %v11612_v46, %v11803_v16 }
 0x4dc   : > { %6795 = vmatpush1.bf16.msra.mxu1 %v9078_v3  ;;  %6632 = vmatprep.subr.bf16.mxu0 %v9083_v22  ;;  %v11804_v3 = vld [vmem:[#allocation5_spill] sm:$0xff] }
 0x4dd   : > { %6796 = vmatprep.subr.bf16.mxu1 %v9086_v4  ;;  %v11805_v22 = vsub.s32 3, %v11804_v3 }
 0x4df   : > { %6633 = vmatpush1.bf16.msra.mxu0 %v9081_v38  ;;  %v5141_v4 = vrot.slane %v11612_v46, %v11805_v22  ;;  %v9210_v22 = vld [vmem:[%s11758_s11 + $0x38] sm:$0xff]  }
 0x4e0   : > { %6797 = vmatpush1.bf16.msra.mxu1 %v9084_v9  ;;  %6634 = vmatprep.subr.bf16.mxu0 %v9089_v25 }
 0x4e1   : > { %6798 = vmatprep.subr.bf16.mxu1 %v9092_v19 }
 0x4e3   : > { %6635 = vmatpush1.bf16.msra.mxu0 %v9087_v36 }
 0x4e4   : > { %6799 = vmatpush1.bf16.msra.mxu1 %v9090_v12  ;;  %6636 = vmatprep.subr.bf16.mxu0 %v9095_v50 }
 0x4e5   : > { %6800 = vmatprep.subr.bf16.mxu1 %v9098_v24 }
 0x4e7   : > { %6637 = vmatpush1.bf16.msra.mxu0 %v9093_v13 }
 0x4e8   : > { %6801 = vmatpush1.bf16.msra.mxu1 %v9096_v58  ;;  %7223 = vmatprep.subr.bf16.mxu0 %v9101_v45 }
 0x4e9   : > { %8299 = vmatprep.subr.bf16.mxu1 %v9195_v10  ;;  %v9183_v10 = vld [vmem:[%s11756_s9 + $0x1c0] ss:$8 sps:$4 sm:$0xff]  }
 0x4ea   : > { %6639 = vmatmul.mubr.bf16.vlgmr.msra.gmra.mrb[168].mxu0 %v5193_v28 }
 0x4eb   : > { %6803 = vmatmul.mubr.bf16.vlgmr.msra.gmra.mrb[216].mxu1 %v5193_v28  ;;  %7224 = vmatpush1.bf16.msra.mxu0 %v9099_v14 }
 0x4ec   : > { %7225 = vmatprep.subr.bf16.mxu0 %v9104_v39  ;;  %8300 = vmatpush3.bf16.msra.mxu1 %v9196_v43  ;;  %v9188_v43 = vld [vmem:[%s11756_s9 + $0x1d4] ss:$8 sps:$4 sm:$0xff]  }
 0x4ed   : > { %8301 = vmatprep.subr.bf16.mxu1 %v9197_v51  ;;  %v11806_v51 = vsub.s32 2, %v11804_v3  ;;  %v9209_v3 = vld [vmem:[%s11758_s11 + $0x78] sm:$0xff]  }
 0x4ef   : > { %7226 = vmatpush1.bf16.msra.mxu0 %v9102_v8 }
 0x4f0   : > { %7227 = vmatprep.subr.bf16.mxu0 %v9107_v37  ;;  %8302 = vmatpush3.bf16.msra.mxu1 %v9198_v6  ;;  %v5137_v6 = vrot.slane %v11612_v46, %v11806_v51 }
 0x4f1   : > { %8303 = vmatprep.subr.bf16.mxu1 %v9199_v56  ;;  %v9186_v56 = vld [vmem:[%s11756_s9 + $0x1d0] ss:$8 sps:$4 sm:$0xff]  }
 0x4f3   : > { %7228 = vmatpush1.bf16.msra.mxu0 %v9105_v15 }
 0x4f4   : > { %7229 = vmatprep.subr.bf16.mxu0 %v9110_v35  ;;  %8304 = vmatpush3.bf16.msra.mxu1 %v9200_v27  ;;  %v9147_v35 = vld [vmem:[%s11756_s9 + $0x100] ss:$8 sps:$4 sm:$0xff]   ;;  %v9191_v27 = vld [vmem:[%s11756_s9 + $0x1e4] ss:$8 sps:$4 sm:$0xff]  }
 0x4f5   : > { %8305 = vmatprep.subr.bf16.mxu1 %v9201_v30 }
 0x4f7   : > { %7230 = vmatpush1.bf16.msra.mxu0 %v9108_v57 }
 0x4f8   : > { %7231 = vmatprep.subr.bf16.mxu0 %v9113_v48  ;;  %8306 = vmatpush3.bf16.msra.mxu1 %v9202_v60  ;;  %v9189_v60 = vld [vmem:[%s11756_s9 + $0x1e0] ss:$8 sps:$4 sm:$0xff]  }
 0x4f9   : > { %8307 = vmatprep.subr.bf16.mxu1 %v9203_v21  ;;  %v9194_v21 = vld [vmem:[%s11756_s9 + $0x1f4] ss:$8 sps:$4 sm:$0xff]  }
 0x4fb   : > { %7232 = vmatpush1.bf16.msra.mxu0 %v9111_v53  ;;  %v9152_v53 = vld [vmem:[%s11756_s9 + $0x114] ss:$8 sps:$4 sm:$0xff]  }
 0x4fc   : > { %7233 = vmatprep.subr.bf16.mxu0 %v9116_v61  ;;  %8308 = vmatpush3.bf16.msra.mxu1 %v9204_v18 }
 0x4fd   : > { %8309 = vmatprep.subr.bf16.mxu1 %v9205_v54  ;;  %v9192_v54 = vld [vmem:[%s11756_s9 + $0x1f0] ss:$8 sps:$4 sm:$0xff]  }
 0x4ff   : > { %7234 = vmatpush1.bf16.msra.mxu0 %v9114_v0  ;;  %v9150_v0 = vld [vmem:[%s11756_s9 + $0x110] ss:$8 sps:$4 sm:$0xff]  }
 0x500   : > { %7235 = vmatprep.subr.bf16.mxu0 %v9119_v11  ;;  %8310 = vmatpush3.bf16.msra.mxu1 %v9206_v42  ;;  %v9155_v11 = vld [vmem:[%s11756_s9 + $0x124] ss:$8 sps:$4 sm:$0xff]  }
 0x503   : > { %7236 = vmatpush1.bf16.msra.mxu0 %v9117_v47  ;;  %v9153_v47 = vld [vmem:[%s11756_s9 + $0x120] ss:$8 sps:$4 sm:$0xff]  }
 0x504   : > { %7237 = vmatprep.subr.bf16.mxu0 %v9122_v33  ;;  %v9158_v33 = vld [vmem:[%s11756_s9 + $0x134] ss:$8 sps:$4 sm:$0xff]  }
 0x507   : > { %7238 = vmatpush1.bf16.msra.mxu0 %v9120_v5  ;;  %v9156_v5 = vld [vmem:[%s11756_s9 + $0x130] ss:$8 sps:$4 sm:$0xff]  }
 0x508   : > { %7239 = vmatprep.subr.bf16.mxu0 %v9125_v32  ;;  %v9161_v32 = vld [vmem:[%s11756_s9 + $0x144] ss:$8 sps:$4 sm:$0xff]  }
 0x50b   : > { %7240 = vmatpush1.bf16.msra.mxu0 %v9123_v29  ;;  %v9159_v29 = vld [vmem:[%s11756_s9 + $0x140] ss:$8 sps:$4 sm:$0xff]  }
 0x50c   : > { %7241 = vmatprep.subr.bf16.mxu0 %v9128_v34  ;;  %v9164_v34 = vld [vmem:[%s11756_s9 + $0x154] ss:$8 sps:$4 sm:$0xff]  }
 0x50f   : > { %7242 = vmatpush1.bf16.msra.mxu0 %v9126_v52  ;;  %v9162_v52 = vld [vmem:[%s11756_s9 + $0x150] ss:$8 sps:$4 sm:$0xff]  }
 0x510   : > { %7243 = vmatprep.subr.bf16.mxu0 %v9131_v63  ;;  %v9167_v63 = vld [vmem:[%s11756_s9 + $0x164] ss:$8 sps:$4 sm:$0xff]  }
 0x513   : > { %7244 = vmatpush1.bf16.msra.mxu0 %v9129_v20  ;;  %v9165_v20 = vld [vmem:[%s11756_s9 + $0x160] ss:$8 sps:$4 sm:$0xff]  }
 0x514   : > { %7245 = vmatprep.subr.bf16.mxu0 %v9134_v17  ;;  %v9170_v17 = vld [vmem:[%s11756_s9 + $0x174] ss:$8 sps:$4 sm:$0xff]  }
 0x517   : > { %7246 = vmatpush1.bf16.msra.mxu0 %v9132_v23  ;;  %v9168_v23 = vld [vmem:[%s11756_s9 + $0x170] ss:$8 sps:$4 sm:$0xff]  }
 0x518   : > { %7247 = vmatprep.subr.bf16.mxu0 %v9137_v40  ;;  %v9173_v40 = vld [vmem:[%s11756_s9 + $0x184] ss:$8 sps:$4 sm:$0xff]  }
 0x51b   : > { %7248 = vmatpush1.bf16.msra.mxu0 %v9135_v49  ;;  %v9171_v49 = vld [vmem:[%s11756_s9 + $0x180] ss:$8 sps:$4 sm:$0xff]  }
 0x51c   : > { %7249 = vmatprep.subr.bf16.mxu0 %v9140_v2  ;;  %v9176_v2 = vld [vmem:[%s11756_s9 + $0x194] ss:$8 sps:$4 sm:$0xff]  }
 0x51f   : > { %7250 = vmatpush1.bf16.msra.mxu0 %v9138_v7  ;;  %v9174_v7 = vld [vmem:[%s11756_s9 + $0x190] ss:$8 sps:$4 sm:$0xff]  }
 0x520   : > { %7251 = vmatprep.subr.bf16.mxu0 %v9143_v41  ;;  %v9177_v41 = vld [vmem:[%s11756_s9 + $0x1a0] ss:$8 sps:$4 sm:$0xff]  }
 0x523   : > { %7252 = vmatpush1.bf16.msra.mxu0 %v9141_v31  ;;  %v9179_v31 = vld [vmem:[%s11756_s9 + $0x1a4] ss:$8 sps:$4 sm:$0xff]  }
 0x524   : > { %7253 = vmatprep.subr.bf16.mxu0 %v9146_v55  ;;  %v9182_v55 = vld [vmem:[%s11756_s9 + $0x1b4] ss:$8 sps:$4 sm:$0xff]  }
 0x527   : > { %7254 = vmatpush1.bf16.msra.mxu0 %v9144_v62  ;;  %v9180_v62 = vld [vmem:[%s11756_s9 + $0x1b0] ss:$8 sps:$4 sm:$0xff]  }
 0x528   : > { %7264 = vmatprep.subr.bf16.mxu0 %v9149_v1  ;;  %v9185_v1 = vld [vmem:[%s11756_s9 + $0x1c4] ss:$8 sps:$4 sm:$0xff]  }
 0x5bd   : > { %v6640_v38 = vpop.f32.mrb[168].mxu0 }
 0x5be   : > { %v8589_v9 = vadd.f32 %v6640_v38, %v5129_v44  ;;  %v11621_v25 = vpop.f32.mrb[216].mxu1  ;;  %v6642_v19 = vpop.f32.mrb[169].mxu0  ;;  %v9207_v44 = vld [vmem:[%s11758_s11 + $0x70] sm:$0xff]  }
 0x5bf   : > { %v8590_v36 = vadd.f32 %v6642_v19, %v5133_v26  ;;  %v6806_v12 = vpop.f32.mrb[217].mxu1  ;;  %v6644_v50 = vpop.f32.mrb[170].mxu0  ;;  %v8591_v30 = vadd.f32 %v11621_v25, %v5137_v6  ;;  %v9208_v26 = vld [vmem:[%s11758_s11 + $0x30] sm:$0xff]   ;;  %8311 = vmatprep.subr.bf16.mxu1 %v9207_v44 }
 0x5c0   : > { %vm6811_vm9 = vcmp.gt.f32.partialorder %v8589_v9, 0.0  ;;  %v6815_v24 = vmul.f32 0.2, %v8589_v9  ;;  %v8592_v13 = vadd.f32 %v6806_v12, %v5141_v4  ;;  %v6808_v58 = vpop.f32.mrb[218].mxu1  ;;  %v6645_v45 = vpop.f32.mrb[171].mxu0  ;;  %8312 = vmatpush3.bf16.msra.mxu1 %v9208_v26 }
 0x5c1   : > { %vm6812_vm15 = vcmp.gt.f32.partialorder %v8590_v36, 0.0  ;;  %v6816_v14 = vmul.f32 0.2, %v8590_v36  ;;  %v6809_v8 = vpop.f32.mrb[219].mxu1  ;;  %v6817_v18 = vmul.f32 0.2, %v8591_v30  ;;  %8313 = vmatprep.subr.bf16.mxu1 %v9209_v3 }
 0x5c2   : > { %v6819_v28 = vsel %vm6811_vm9, %v8589_v9, %v6815_v24  ;;  %vm6814_vm0 = vcmp.gt.f32.partialorder %v8592_v13, 0.0  ;;  %v6818_v39 = vmul.f32 0.2, %v8592_v13  ;;  %vm6813_vm1 = vcmp.gt.f32.partialorder %v8591_v30, 0.0  ;;  %v6891_v4 = vld [vmem:[%s11757_s10] sm:$0x3] }
 0x5c3   : > { %v6820_v37 = vsel %vm6812_vm15, %v8590_v36, %v6816_v14  ;;  %v6887_v48 = vpack.c.bf16 %v6819_v28, %v6819_v28  ;;  %v6821_v42 = vsel %vm6813_vm1, %v8591_v30, %v6817_v18  ;;  %v6896_v38 = vrot.slane %v6891_v4, %v11802_v59 }
 0x5c4   : > { %v6888_v15 = vpack.c.bf16 %v6820_v37, %v6820_v37  ;;  %v6822_v57 = vsel %vm6814_vm0, %v8592_v13, %v6818_v39  ;;  %v6889_v46 = vpack.c.bf16 %v6821_v42, %v6821_v42  ;;  %8314 = vmatpush3.bf16.msra.mxu1 %v9210_v22  ;;  %v6900_v9 = vrot.slane %v6891_v4, %v11803_v16  ;;  %v8146_v16 = vld [vmem:[%s11759_s12] ss:$0 sm:$0xff] }
 0x5c5   : > { %v6890_v61 = vpack.c.bf16 %v6822_v57, %v6822_v57 }
 0x5c6   : > { %7255 = vmatprep.mubr.bf16.mxu0 %v6888_v15 }
 0x5c7   : > { %7256 = vmatmul.mubr.bf16.vlgmr.msra.gmra.mrb[172].mxu0 %v6887_v48 }
 0x5c8   : > { %7265 = vmatpush1.bf16.msra.mxu0 %v9147_v35  ;;  %7296 = vmatprep.mubr.bf16.mxu0 %v6890_v61 }
 0x5c9   : > { %7266 = vmatprep.subr.bf16.mxu0 %v9152_v53 }
 0x5cc   : > { %7267 = vmatpush1.bf16.msra.mxu0 %v9150_v0 }
 0x5cd   : > { %7268 = vmatprep.subr.bf16.mxu0 %v9155_v11 }
 0x5d0   : > { %7269 = vmatpush1.bf16.msra.mxu0 %v9153_v47 }
 0x5d1   : > { %7270 = vmatprep.subr.bf16.mxu0 %v9158_v33 }
 0x5d4   : > { %7271 = vmatpush1.bf16.msra.mxu0 %v9156_v5 }
 0x5d5   : > { %7272 = vmatprep.subr.bf16.mxu0 %v9161_v32 }
 0x5d8   : > { %7273 = vmatpush1.bf16.msra.mxu0 %v9159_v29 }
 0x5d9   : > { %7274 = vmatprep.subr.bf16.mxu0 %v9164_v34 }
 0x5dc   : > { %7275 = vmatpush1.bf16.msra.mxu0 %v9162_v52 }
 0x5dd   : > { %7276 = vmatprep.subr.bf16.mxu0 %v9167_v63 }
 0x5e0   : > { %7277 = vmatpush1.bf16.msra.mxu0 %v9165_v20 }
 0x5e1   : > { %7278 = vmatprep.subr.bf16.mxu0 %v9170_v17 }
 0x5e4   : > { %7279 = vmatpush1.bf16.msra.mxu0 %v9168_v23 }
 0x5e5   : > { %7280 = vmatprep.subr.bf16.mxu0 %v9173_v40 }
 0x5e8   : > { %7281 = vmatpush1.bf16.msra.mxu0 %v9171_v49 }
 0x5e9   : > { %7282 = vmatprep.subr.bf16.mxu0 %v9176_v2 }
 0x5ec   : > { %7283 = vmatpush1.bf16.msra.mxu0 %v9174_v7 }
 0x5ed   : > { %7284 = vmatprep.subr.bf16.mxu0 %v9179_v31 }
 0x5f0   : > { %7285 = vmatpush1.bf16.msra.mxu0 %v9177_v41 }
 0x5f1   : > { %7286 = vmatprep.subr.bf16.mxu0 %v9182_v55 }
 0x5f4   : > { %7287 = vmatpush1.bf16.msra.mxu0 %v9180_v62 }
 0x5f5   : > { %7288 = vmatprep.subr.bf16.mxu0 %v9185_v1 }
 0x5f8   : > { %7289 = vmatpush1.bf16.msra.mxu0 %v9183_v10 }
 0x5f9   : > { %7290 = vmatprep.subr.bf16.mxu0 %v9188_v43 }
 0x5fc   : > { %7291 = vmatpush1.bf16.msra.mxu0 %v9186_v56 }
 0x5fd   : > { %7292 = vmatprep.subr.bf16.mxu0 %v9191_v27 }
 0x600   : > { %7293 = vmatpush1.bf16.msra.mxu0 %v9189_v60 }
 0x601   : > { %7294 = vmatprep.subr.bf16.mxu0 %v9194_v21 }
 0x604   : > { %7295 = vmatpush1.bf16.msra.mxu0 %v9192_v54 }
 0x607   : > { %7297 = vmatmul.mubr.bf16.vlgmr.msra.gmra.mrb[172].mxu0 %v6889_v46 }
 0x6da   : > { %v7298_v25 = vpop.f32.mrb[172].mxu0 }
 0x6db   : > { %v8593_v19 = vadd.f32 %v7298_v25, %v6896_v38  ;;  %v7300_v36 = vpop.f32.mrb[173].mxu0 }
 0x6dc   : > { %v8594_v12 = vadd.f32 %v7300_v36, %v6900_v9  ;;  %v7302_v50 = vpop.f32.mrb[174].mxu0 }
 0x6dd   : > { %vm7305_vm2 = vcmp.gt.f32.partialorder %v8593_v19, 0.0  ;;  %v7307_v24 = vmul.f32 0.2, %v8593_v19  ;;  %v7303_v13 = vpop.f32.mrb[175].mxu0 }
 0x6de   : > { %vm7306_vm3 = vcmp.gt.f32.partialorder %v8594_v12, 0.0  ;;  %v7308_v58 = vmul.f32 0.2, %v8594_v12 }
 0x6df   : > { %v7309_v45 = vsel %vm7305_vm2, %v8593_v19, %v7307_v24 }
 0x6e0   : > { %v7310_v14 = vsel %vm7306_vm3, %v8594_v12, %v7308_v58  ;;  %v7343_v39 = vpack.c.bf16 %v7309_v45, %v7309_v45 }
 0x6e1   : > { %v7344_v28 = vpack.c.bf16 %v7310_v14, %v7310_v14 }
 0x6e3   : > { %7480 = vmatprep.mubr.bf16.mxu1 %v7344_v28 }
 0x6e4   : > { %7481 = vmatmul.mubr.bf16.vlgmr.msra.gmra.mrb[220].mxu1 %v7343_v39 }
 0x7b7   : > { %v8315_v59 = vpop.f32.mrb[220].mxu1 }
 0x7b8   : > { %v8316_v8 = vpop.f32.mrb[221].mxu1 }
 0x7b9   : > { %v8317_v37 = vadd.f32 %v8316_v8, %v8315_v59  ;;  %v8318_v15 = vpop.f32.mrb[222].mxu1 }
 0x7ba   : > { %v8319_v35 = vpop.f32.mrb[223].mxu1 }
 0x7bb   : > { %v7483_v57 = vadd.f32 %v8317_v37, %v8146_v16 }
 0x7bd   : > { %7488 = vst [vmem:[%s453_s17] sm:$0x3] %v7483_v57 }
 0x7be PF: > { %s24_s25 = sadd.s32 1, %s9251_s25  }
 0x7bf   : > { %p21_p3 = scmp.ge.s32.totalorder %s24_s25, 4  }
 0x7c1   :  { %23 = sbr.rel (!%p21_p3) target bundleno = 1 (0x1), region = 107 }
 0x7c8   :  { %7508 = vsyncpa [#allocation3], 1 }
 0x7c9   :  { %7510 = vsyncpa [#allocation3 + $0x1], 1 }

</bundles_post_ra>
